<compile_context>
chip_gen: v6e
topology: v6e:2x2x1
jax: 0.10.0
libtpu: 0.0.40
codegen_flags: <defaults>
</compile_context>

<pallas_src>
import jax
import jax.numpy as jnp
from jax.experimental import pallas as pl
from jax.experimental.pallas import tpu as pltpu

# Padded (lane-dense) layer dims: every matmul dimension is a multiple of 128.
K_IN = 896                                   # 784 padded to 7*128
DIMS = [K_IN, 512, 256, 128, 128, 128]       # padded in/out dims per layer
TRUE_DIMS = [784, 512, 256, 128, 64, 10]     # real (PyTorch) dims
TILE_M = 256                                 # batch tile (multiple of 256 and 128)
OUT_PAD = DIMS[-1]                           # 128
NUM_CLASSES = 10


def _mlp_kernel(x_ref,
                w1_ref, b1_ref,
                w2_ref, b2_ref,
                w3_ref, b3_ref,
                w4_ref, b4_ref,
                w5_ref, b5_ref,
                o_ref):
    """relu(x@W1+b1) -> ... -> relu(.@W4+b4) -> .@W5+b5 on one (TILE_M, K_IN) batch tile.

    Operands are bf16, accumulation is f32 on the MXU; biases/ReLU/output in f32.
    """
    h = x_ref[...]  # (TILE_M, 896) bf16

    h = jnp.dot(h, w1_ref[...], preferred_element_type=jnp.float32) + b1_ref[...]
    h = jnp.maximum(h, 0.0).astype(jnp.bfloat16)

    h = jnp.dot(h, w2_ref[...], preferred_element_type=jnp.float32) + b2_ref[...]
    h = jnp.maximum(h, 0.0).astype(jnp.bfloat16)

    h = jnp.dot(h, w3_ref[...], preferred_element_type=jnp.float32) + b3_ref[...]
    h = jnp.maximum(h, 0.0).astype(jnp.bfloat16)

    h = jnp.dot(h, w4_ref[...], preferred_element_type=jnp.float32) + b4_ref[...]
    h = jnp.maximum(h, 0.0).astype(jnp.bfloat16)

    h = jnp.dot(h, w5_ref[...], preferred_element_type=jnp.float32) + b5_ref[...]
    o_ref[...] = h  # (TILE_M, 128) f32; only [:, :10] is meaningful


def _pad_params(params):
    """Zero-pad canonical (in,out) weights/biases to lane-dense padded dims; cast W to bf16."""
    padded = []
    for (w, b), din, dout in zip(params, DIMS[:-1], DIMS[1:]):
        w_p = jnp.zeros((din, dout), jnp.bfloat16)
        w_p = w_p.at[: w.shape[0], : w.shape[1]].set(w.astype(jnp.bfloat16))
        b_p = jnp.zeros((1, dout), jnp.float32)
        b_p = b_p.at[:, : b.shape[1]].set(b.astype(jnp.float32))
        padded.append((w_p, b_p))
    return padded


@jax.jit
def net_forward(x, params):
    """Forward pass of `Net`. x: (N, 1, 28, 28) (or anything flattening to (N, 784))."""
    x = x.astype(jnp.float32).reshape(-1, TRUE_DIMS[0])  # torch: x.view(-1, 784)
    n = x.shape[0]

    # Pad batch to a multiple of TILE_M and the feature dim 784 -> 896 (zeros).
    n_pad = ((n + TILE_M - 1) // TILE_M) * TILE_M
    x = jnp.pad(x, ((0, n_pad - n), (0, K_IN - TRUE_DIMS[0]))).astype(jnp.bfloat16)

    (w1, b1), (w2, b2), (w3, b3), (w4, b4), (w5, b5) = _pad_params(params)

    n_tiles = n_pad // TILE_M

    # Tiled x/out; weights & biases pinned with constant index_map (VMEM-resident).
    x_spec = pl.BlockSpec((TILE_M, K_IN), lambda i: (i, 0))
    out_spec = pl.BlockSpec((TILE_M, OUT_PAD), lambda i: (i, 0))

    def const_spec(shape):
        return pl.BlockSpec(shape, lambda i: (0, 0))

    in_specs = [x_spec]
    for din, dout in zip(DIMS[:-1], DIMS[1:]):
        in_specs.append(const_spec((din, dout)))   # weight
        in_specs.append(const_spec((1, dout)))     # bias

    # Advisory cost estimate.
    flops = 2 * sum(a * b for a, b in zip(DIMS[:-1], DIMS[1:])) * n_pad
    weight_bytes = sum(a * b * 2 + b * 4 for a, b in zip(DIMS[:-1], DIMS[1:]))
    bytes_accessed = n_pad * K_IN * 2 + weight_bytes + n_pad * OUT_PAD * 4
    cost = pl.CostEstimate(flops=flops, transcendentals=0,
                           bytes_accessed=bytes_accessed)

    out = pl.pallas_call(
        _mlp_kernel,
        out_shape=jax.ShapeDtypeStruct((n_pad, OUT_PAD), jnp.float32),
        grid=(n_tiles,),
        in_specs=in_specs,
        out_specs=out_spec,
        compiler_params=pltpu.CompilerParams(
            dimension_semantics=("parallel",)),
        cost_estimate=cost,
    )(x, w1, b1, w2, b2, w3, b3, w4, b4, w5, b5)

    return out[:n, :NUM_CLASSES]


def init_params(key):
    """Deterministic init mirroring torch.nn.Linear's U(-1/sqrt(fan_in), +1/sqrt(fan_in)).

    Canonical (unpadded) shapes: weights (in_features, out_features), biases (1, out_features).
    """
    params = []
    for i in range(5):
        fan_in, fan_out = TRUE_DIMS[i], TRUE_DIMS[i + 1]
        key, kw, kb = jax.random.split(key, 3)
        bound = 1.0 / (fan_in ** 0.5)
        w = jax.random.uniform(kw, (fan_in, fan_out), jnp.float32, -bound, bound)
        b = jax.random.uniform(kb, (1, fan_out), jnp.float32, -bound, bound)
        params.append((w, b))
    return params


def reference_forward(x, params):
    """Pure-JAX f32 reference for correctness checking."""
    h = x.astype(jnp.float32).reshape(-1, TRUE_DIMS[0])
    for i, (w, b) in enumerate(params):
        h = h @ w + b
        if i < 4:
            h = jnp.maximum(h, 0.0)
    return h


if __name__ == "__main__":
    key = jax.random.PRNGKey(0)
    key, kx = jax.random.split(key)

    # MNIST-like input, small batch: (2, 1, 28, 28) NCHW.
    x = jax.random.normal(kx, (2, 1, 28, 28), dtype=jnp.float32)

    params = init_params(jax.random.PRNGKey(0))

    out = net_forward(x, params)
    out = jax.block_until_ready(out)

    ref = reference_forward(x, params)
    assert out.shape == (2, 10), out.shape
    # bf16 matmul operands with f32 accumulation: loosen tolerance accordingly.
    assert jnp.allclose(out, ref, atol=5e-2, rtol=5e-2), "mismatch vs reference"

    print("KERNEL_OK")
</pallas_src>

<mosaic_0001>
module attributes {stable_mosaic.version = 11 : i64} {
  func.func @_mlp_kernel(%arg0: i32, %arg1: memref<256x896xbf16, #tpu.memory_space<vmem>>, %arg2: memref<896x512xbf16, #tpu.memory_space<vmem>>, %arg3: memref<1x512xf32, #tpu.memory_space<vmem>>, %arg4: memref<512x256xbf16, #tpu.memory_space<vmem>>, %arg5: memref<1x256xf32, #tpu.memory_space<vmem>>, %arg6: memref<256x128xbf16, #tpu.memory_space<vmem>>, %arg7: memref<1x128xf32, #tpu.memory_space<vmem>>, %arg8: memref<128x128xbf16, #tpu.memory_space<vmem>>, %arg9: memref<1x128xf32, #tpu.memory_space<vmem>>, %arg10: memref<128x128xbf16, #tpu.memory_space<vmem>>, %arg11: memref<1x128xf32, #tpu.memory_space<vmem>>, %arg12: memref<256x128xf32, #tpu.memory_space<vmem>>) attributes {dimension_semantics = [#tpu.dimension_semantics<parallel>], iteration_bounds = array<i64: 1>, scalar_prefetch = 0 : i64, scratch_operands = 0 : i64, tpu.core_type = #tpu.core_type<tc>, window_params = [{transform_indices = @transform_0, window_bounds = array<i64: 256, 896>}, {pipeline_mode = #tpu.pipeline_mode<synchronous>, transform_indices = @transform_1, window_bounds = array<i64: 896, 512>}, {pipeline_mode = #tpu.pipeline_mode<synchronous>, transform_indices = @transform_2, window_bounds = array<i64: 1, 512>}, {pipeline_mode = #tpu.pipeline_mode<synchronous>, transform_indices = @transform_3, window_bounds = array<i64: 512, 256>}, {pipeline_mode = #tpu.pipeline_mode<synchronous>, transform_indices = @transform_4, window_bounds = array<i64: 1, 256>}, {pipeline_mode = #tpu.pipeline_mode<synchronous>, transform_indices = @transform_5, window_bounds = array<i64: 256, 128>}, {pipeline_mode = #tpu.pipeline_mode<synchronous>, transform_indices = @transform_6, window_bounds = array<i64: 1, 128>}, {pipeline_mode = #tpu.pipeline_mode<synchronous>, transform_indices = @transform_7, window_bounds = array<i64: 128, 128>}, {pipeline_mode = #tpu.pipeline_mode<synchronous>, transform_indices = @transform_8, window_bounds = array<i64: 1, 128>}, {pipeline_mode = #tpu.pipeline_mode<synchronous>, transform_indices = @transform_9, window_bounds = array<i64: 128, 128>}, {pipeline_mode = #tpu.pipeline_mode<synchronous>, transform_indices = @transform_10, window_bounds = array<i64: 1, 128>}, {transform_indices = @transform_11, window_bounds = array<i64: 256, 128>}]} {
    %c0 = arith.constant 0 : index
    %c0_0 = arith.constant 0 : index
    %0 = vector.load %arg1[%c0, %c0_0] : memref<256x896xbf16, #tpu.memory_space<vmem>>, vector<256x896xbf16>
    %c0_1 = arith.constant 0 : index
    %c0_2 = arith.constant 0 : index
    %1 = vector.load %arg2[%c0_1, %c0_2] : memref<896x512xbf16, #tpu.memory_space<vmem>>, vector<896x512xbf16>
    %cst = arith.constant dense<0.000000e+00> : vector<256x512xf32>
    %2 = tpu.matmul %0, %1, %cst {dimension_numbers = #tpu.dot_dimension_numbers<[1], [0], [0], [1], [0, 0, 1, 1], [], []>} : vector<256x896xbf16>, vector<896x512xbf16>, vector<256x512xf32> -> vector<256x512xf32>
    %c0_3 = arith.constant 0 : index
    %c0_4 = arith.constant 0 : index
    %3 = vector.load %arg3[%c0_3, %c0_4] : memref<1x512xf32, #tpu.memory_space<vmem>>, vector<1x512xf32>
    %4 = vector.broadcast %3 : vector<1x512xf32> to vector<256x512xf32>
    %5 = arith.addf %2, %4 : vector<256x512xf32>
    %cst_5 = arith.constant 0.000000e+00 : f32
    %6 = vector.broadcast %cst_5 : f32 to vector<256x512xf32>
    %7 = arith.maximumf %5, %6 : vector<256x512xf32>
    %8 = arith.truncf %7 : vector<256x512xf32> to vector<256x512xbf16>
    %c0_6 = arith.constant 0 : index
    %c0_7 = arith.constant 0 : index
    %9 = vector.load %arg4[%c0_6, %c0_7] : memref<512x256xbf16, #tpu.memory_space<vmem>>, vector<512x256xbf16>
    %cst_8 = arith.constant dense<0.000000e+00> : vector<256x256xf32>
    %10 = tpu.matmul %8, %9, %cst_8 {dimension_numbers = #tpu.dot_dimension_numbers<[1], [0], [0], [1], [0, 0, 1, 1], [], []>} : vector<256x512xbf16>, vector<512x256xbf16>, vector<256x256xf32> -> vector<256x256xf32>
    %c0_9 = arith.constant 0 : index
    %c0_10 = arith.constant 0 : index
    %11 = vector.load %arg5[%c0_9, %c0_10] : memref<1x256xf32, #tpu.memory_space<vmem>>, vector<1x256xf32>
    %12 = vector.broadcast %11 : vector<1x256xf32> to vector<256x256xf32>
    %13 = arith.addf %10, %12 : vector<256x256xf32>
    %cst_11 = arith.constant 0.000000e+00 : f32
    %14 = vector.broadcast %cst_11 : f32 to vector<256x256xf32>
    %15 = arith.maximumf %13, %14 : vector<256x256xf32>
    %16 = arith.truncf %15 : vector<256x256xf32> to vector<256x256xbf16>
    %c0_12 = arith.constant 0 : index
    %c0_13 = arith.constant 0 : index
    %17 = vector.load %arg6[%c0_12, %c0_13] : memref<256x128xbf16, #tpu.memory_space<vmem>>, vector<256x128xbf16>
    %cst_14 = arith.constant dense<0.000000e+00> : vector<256x128xf32>
    %18 = tpu.matmul %16, %17, %cst_14 {dimension_numbers = #tpu.dot_dimension_numbers<[1], [0], [0], [1], [0, 0, 1, 1], [], []>} : vector<256x256xbf16>, vector<256x128xbf16>, vector<256x128xf32> -> vector<256x128xf32>
    %c0_15 = arith.constant 0 : index
    %c0_16 = arith.constant 0 : index
    %19 = vector.load %arg7[%c0_15, %c0_16] : memref<1x128xf32, #tpu.memory_space<vmem>>, vector<1x128xf32>
    %20 = vector.broadcast %19 : vector<1x128xf32> to vector<256x128xf32>
    %21 = arith.addf %18, %20 : vector<256x128xf32>
    %cst_17 = arith.constant 0.000000e+00 : f32
    %22 = vector.broadcast %cst_17 : f32 to vector<256x128xf32>
    %23 = arith.maximumf %21, %22 : vector<256x128xf32>
    %24 = arith.truncf %23 : vector<256x128xf32> to vector<256x128xbf16>
    %c0_18 = arith.constant 0 : index
    %c0_19 = arith.constant 0 : index
    %25 = vector.load %arg8[%c0_18, %c0_19] : memref<128x128xbf16, #tpu.memory_space<vmem>>, vector<128x128xbf16>
    %cst_20 = arith.constant dense<0.000000e+00> : vector<256x128xf32>
    %26 = tpu.matmul %24, %25, %cst_20 {dimension_numbers = #tpu.dot_dimension_numbers<[1], [0], [0], [1], [0, 0, 1, 1], [], []>} : vector<256x128xbf16>, vector<128x128xbf16>, vector<256x128xf32> -> vector<256x128xf32>
    %c0_21 = arith.constant 0 : index
    %c0_22 = arith.constant 0 : index
    %27 = vector.load %arg9[%c0_21, %c0_22] : memref<1x128xf32, #tpu.memory_space<vmem>>, vector<1x128xf32>
    %28 = vector.broadcast %27 : vector<1x128xf32> to vector<256x128xf32>
    %29 = arith.addf %26, %28 : vector<256x128xf32>
    %cst_23 = arith.constant 0.000000e+00 : f32
    %30 = vector.broadcast %cst_23 : f32 to vector<256x128xf32>
    %31 = arith.maximumf %29, %30 : vector<256x128xf32>
    %32 = arith.truncf %31 : vector<256x128xf32> to vector<256x128xbf16>
    %c0_24 = arith.constant 0 : index
    %c0_25 = arith.constant 0 : index
    %33 = vector.load %arg10[%c0_24, %c0_25] : memref<128x128xbf16, #tpu.memory_space<vmem>>, vector<128x128xbf16>
    %cst_26 = arith.constant dense<0.000000e+00> : vector<256x128xf32>
    %34 = tpu.matmul %32, %33, %cst_26 {dimension_numbers = #tpu.dot_dimension_numbers<[1], [0], [0], [1], [0, 0, 1, 1], [], []>} : vector<256x128xbf16>, vector<128x128xbf16>, vector<256x128xf32> -> vector<256x128xf32>
    %c0_27 = arith.constant 0 : index
    %c0_28 = arith.constant 0 : index
    %35 = vector.load %arg11[%c0_27, %c0_28] : memref<1x128xf32, #tpu.memory_space<vmem>>, vector<1x128xf32>
    %36 = vector.broadcast %35 : vector<1x128xf32> to vector<256x128xf32>
    %37 = arith.addf %34, %36 : vector<256x128xf32>
    %c0_29 = arith.constant 0 : index
    %c0_30 = arith.constant 0 : index
    %38 = vector.load %arg12[%c0_29, %c0_30] : memref<256x128xf32, #tpu.memory_space<vmem>>, vector<256x128xf32>
    tpu.vector_store %arg12[%c0_29, %c0_30], %37 {strides = array<i32>} : memref<256x128xf32, #tpu.memory_space<vmem>>, vector<256x128xf32>,
    return
  }
  func.func @transform_0(%arg0: i32) -> (i32, i32) {
    %c0_i32 = arith.constant 0 : i32
    %c0_i32_0 = arith.constant 0 : i32
    return %arg0, %c0_i32 : i32, i32
  }
  func.func @transform_1(%arg0: i32) -> (i32, i32) {
    %c0_i32 = arith.constant 0 : i32
    %c0_i32_0 = arith.constant 0 : i32
    %c0_i32_1 = arith.constant 0 : i32
    return %c0_i32, %c0_i32_0 : i32, i32
  }
  func.func @transform_2(%arg0: i32) -> (i32, i32) {
    %c0_i32 = arith.constant 0 : i32
    %c0_i32_0 = arith.constant 0 : i32
    %c0_i32_1 = arith.constant 0 : i32
    return %c0_i32, %c0_i32_0 : i32, i32
  }
  func.func @transform_3(%arg0: i32) -> (i32, i32) {
    %c0_i32 = arith.constant 0 : i32
    %c0_i32_0 = arith.constant 0 : i32
    %c0_i32_1 = arith.constant 0 : i32
    return %c0_i32, %c0_i32_0 : i32, i32
  }
  func.func @transform_4(%arg0: i32) -> (i32, i32) {
    %c0_i32 = arith.constant 0 : i32
    %c0_i32_0 = arith.constant 0 : i32
    %c0_i32_1 = arith.constant 0 : i32
    return %c0_i32, %c0_i32_0 : i32, i32
  }
  func.func @transform_5(%arg0: i32) -> (i32, i32) {
    %c0_i32 = arith.constant 0 : i32
    %c0_i32_0 = arith.constant 0 : i32
    %c0_i32_1 = arith.constant 0 : i32
    return %c0_i32, %c0_i32_0 : i32, i32
  }
  func.func @transform_6(%arg0: i32) -> (i32, i32) {
    %c0_i32 = arith.constant 0 : i32
    %c0_i32_0 = arith.constant 0 : i32
    %c0_i32_1 = arith.constant 0 : i32
    return %c0_i32, %c0_i32_0 : i32, i32
  }
  func.func @transform_7(%arg0: i32) -> (i32, i32) {
    %c0_i32 = arith.constant 0 : i32
    %c0_i32_0 = arith.constant 0 : i32
    %c0_i32_1 = arith.constant 0 : i32
    return %c0_i32, %c0_i32_0 : i32, i32
  }
  func.func @transform_8(%arg0: i32) -> (i32, i32) {
    %c0_i32 = arith.constant 0 : i32
    %c0_i32_0 = arith.constant 0 : i32
    %c0_i32_1 = arith.constant 0 : i32
    return %c0_i32, %c0_i32_0 : i32, i32
  }
  func.func @transform_9(%arg0: i32) -> (i32, i32) {
    %c0_i32 = arith.constant 0 : i32
    %c0_i32_0 = arith.constant 0 : i32
    %c0_i32_1 = arith.constant 0 : i32
    return %c0_i32, %c0_i32_0 : i32, i32
  }
  func.func @transform_10(%arg0: i32) -> (i32, i32) {
    %c0_i32 = arith.constant 0 : i32
    %c0_i32_0 = arith.constant 0 : i32
    %c0_i32_1 = arith.constant 0 : i32
    return %c0_i32, %c0_i32_0 : i32, i32
  }
  func.func @transform_11(%arg0: i32) -> (i32, i32) {
    %c0_i32 = arith.constant 0 : i32
    %c0_i32_0 = arith.constant 0 : i32
    return %arg0, %c0_i32 : i32, i32
  }
}

</mosaic_0001>

<bundles_post_ra>
// kernel: net_forward.1
= control target key start
LH: loop header
LB: loop body
LE: loop exit
PB: predicated region body
PF: predicated region fallthrough
CT: control target
= control target key end

     0   :  { %s9869_s1 = inlined_call_operand.vmem [shape: bf16[896,512], index: 1, kind: input, shape index: {}]   ;;  %s9870_s0 = inlined_call_operand.vmem [shape: bf16[256,896], index: 0, kind: input, shape index: {}]   ;;  %s9871_s2 = inlined_call_operand.vmem [shape: f32[1,512], index: 2, kind: input, shape index: {}]   ;;  %s9872_s3 = inlined_call_operand.vmem [shape: bf16[512,256], index: 3, kind: input, shape index: {}]   ;;  %s9873_s5 = inlined_call_operand.vmem [shape: bf16[256,128], index: 5, kind: input, shape index: {}]   ;;  %s9874_s4 = inlined_call_operand.vmem [shape: f32[1,256], index: 4, kind: input, shape index: {}]   ;;  %s9875_s7 = inlined_call_operand.vmem [shape: bf16[128,128], index: 7, kind: input, shape index: {}]   ;;  %s9876_s6 = inlined_call_operand.vmem [shape: f32[1,128], index: 6, kind: input, shape index: {}]   ;;  %s9877_s9 = inlined_call_operand.vmem [shape: bf16[128,128], index: 9, kind: input, shape index: {}]   ;;  %s9878_s8 = inlined_call_operand.vmem [shape: f32[1,128], index: 8, kind: input, shape index: {}]   ;;  %s9879_s10 = inlined_call_operand.vmem [shape: f32[1,128], index: 10, kind: input, shape index: {}]   ;;  %s9880_s11 = inlined_call_operand.vmem [shape: f32[256,128], index: 11, kind: output, shape index: {}]  }
   0x1   :  { %v6307_v0 = vld [vmem:[%s9869_s1 + $0xe4] ss:$16 sps:$4 sm:$0xff]   ;;  %v6311_v2 = vld [vmem:[%s9869_s1 + $0xe0] ss:$16 sps:$4 sm:$0xff]   ;;  %v6408_v51 = vld [vmem:[%s9870_s0 + $0xc] ss:$28 sps:$4 sm:$0xff]  }
   0x2   :  { %v6309_v1 = vld [vmem:[%s9869_s1 + $0x2e4] ss:$16 sps:$4 sm:$0xff]   ;;  %2109 = vmatprep.subr.bf16.mxu0 %v6307_v0  ;;  %v6312_v3 = vld [vmem:[%s9869_s1 + $0x2e0] ss:$16 sps:$4 sm:$0xff]   ;;  %2334 = vmatprep.mubr.bf16.mxu1 %v6408_v51 }
   0x3   :  { %2302 = vmatprep.subr.bf16.mxu1 %v6309_v1  ;;  %v6313_v4 = vld [vmem:[%s9869_s1 + $0xc4] ss:$16 sps:$4 sm:$0xff]   ;;  %2110 = vmatpush1.bf16.msra.mxu0 %v6311_v2  ;;  %v6317_v6 = vld [vmem:[%s9869_s1 + $0xc0] ss:$16 sps:$4 sm:$0xff]  }
   0x4   :  { %2303 = vmatpush1.bf16.msra.mxu1 %v6312_v3  ;;  %v6315_v5 = vld [vmem:[%s9869_s1 + $0x2c4] ss:$16 sps:$4 sm:$0xff]   ;;  %2111 = vmatprep.subr.bf16.mxu0 %v6313_v4  ;;  %v6318_v7 = vld [vmem:[%s9869_s1 + $0x2c0] ss:$16 sps:$4 sm:$0xff]  }
   0x5   :  { %2304 = vmatprep.subr.bf16.mxu1 %v6315_v5  ;;  %v6319_v8 = vld [vmem:[%s9869_s1 + $0xa4] ss:$16 sps:$4 sm:$0xff]   ;;  %v6323_v10 = vld [vmem:[%s9869_s1 + $0xa0] ss:$16 sps:$4 sm:$0xff]  }
   0x6   :  { %v6321_v9 = vld [vmem:[%s9869_s1 + $0x2a4] ss:$16 sps:$4 sm:$0xff]   ;;  %v6324_v11 = vld [vmem:[%s9869_s1 + $0x2a0] ss:$16 sps:$4 sm:$0xff]  }
   0x7   :  { %2112 = vmatpush1.bf16.msra.mxu0 %v6317_v6  ;;  %v6325_v12 = vld [vmem:[%s9869_s1 + $0x84] ss:$16 sps:$4 sm:$0xff]   ;;  %v6329_v14 = vld [vmem:[%s9869_s1 + $0x80] ss:$16 sps:$4 sm:$0xff]  }
   0x8   :  { %2305 = vmatpush1.bf16.msra.mxu1 %v6318_v7  ;;  %2113 = vmatprep.subr.bf16.mxu0 %v6319_v8  ;;  %v6327_v13 = vld [vmem:[%s9869_s1 + $0x284] ss:$16 sps:$4 sm:$0xff]   ;;  %v6330_v15 = vld [vmem:[%s9869_s1 + $0x280] ss:$16 sps:$4 sm:$0xff]   ;;  %v6415_v8 = vld [vmem:[%s9870_s0 + $0x3c] ss:$28 sps:$4 sm:$0xff]  }
   0x9   :  { %2306 = vmatprep.subr.bf16.mxu1 %v6321_v9  ;;  %v6331_v16 = vld [vmem:[%s9869_s1 + $0x64] ss:$16 sps:$4 sm:$0xff]   ;;  %v6335_v18 = vld [vmem:[%s9869_s1 + $0x60] ss:$16 sps:$4 sm:$0xff]  }
   0xa   :  { %v6333_v17 = vld [vmem:[%s9869_s1 + $0x264] ss:$16 sps:$4 sm:$0xff]   ;;  %v6336_v19 = vld [vmem:[%s9869_s1 + $0x260] ss:$16 sps:$4 sm:$0xff]  }
   0xb   :  { %2114 = vmatpush1.bf16.msra.mxu0 %v6323_v10  ;;  %v6337_v20 = vld [vmem:[%s9869_s1 + $0x44] ss:$16 sps:$4 sm:$0xff]   ;;  %v6341_v22 = vld [vmem:[%s9869_s1 + $0x40] ss:$16 sps:$4 sm:$0xff]  }
   0xc   :  { %2307 = vmatpush1.bf16.msra.mxu1 %v6324_v11  ;;  %2115 = vmatprep.subr.bf16.mxu0 %v6325_v12  ;;  %v6339_v21 = vld [vmem:[%s9869_s1 + $0x244] ss:$16 sps:$4 sm:$0xff]   ;;  %v6342_v23 = vld [vmem:[%s9869_s1 + $0x240] ss:$16 sps:$4 sm:$0xff]  }
   0xd   :  { %2308 = vmatprep.subr.bf16.mxu1 %v6327_v13  ;;  %v6343_v24 = vld [vmem:[%s9869_s1 + $0x24] ss:$16 sps:$4 sm:$0xff]   ;;  %v6347_v26 = vld [vmem:[%s9869_s1 + $0x20] ss:$16 sps:$4 sm:$0xff]  }
   0xe   :  { %v6345_v25 = vld [vmem:[%s9869_s1 + $0x224] ss:$16 sps:$4 sm:$0xff]   ;;  %v6348_v27 = vld [vmem:[%s9869_s1 + $0x220] ss:$16 sps:$4 sm:$0xff]  }
   0xf   :  { %2116 = vmatpush1.bf16.msra.mxu0 %v6329_v14  ;;  %v6349_v28 = vld [vmem:[%s9869_s1 + $0x4] ss:$16 sps:$4 sm:$0xff]   ;;  %v6353_v30 = vld [vmem:[%s9869_s1] ss:$16 sps:$4 sm:$0xff]  }
  0x10   :  { %2309 = vmatpush1.bf16.msra.mxu1 %v6330_v15  ;;  %2117 = vmatprep.subr.bf16.mxu0 %v6331_v16  ;;  %v6351_v29 = vld [vmem:[%s9869_s1 + $0x204] ss:$16 sps:$4 sm:$0xff]   ;;  %v6354_v31 = vld [vmem:[%s9869_s1 + $0x200] ss:$16 sps:$4 sm:$0xff]  }
  0x11   :  { %2310 = vmatprep.subr.bf16.mxu1 %v6333_v17  ;;  %v6355_v32 = vld [vmem:[%s9869_s1 + $0x1e4] ss:$16 sps:$4 sm:$0xff]   ;;  %v6359_v34 = vld [vmem:[%s9869_s1 + $0x1e0] ss:$16 sps:$4 sm:$0xff]  }
  0x12   :  { %v6357_v33 = vld [vmem:[%s9869_s1 + $0x3e4] ss:$16 sps:$4 sm:$0xff]   ;;  %v6360_v35 = vld [vmem:[%s9869_s1 + $0x3e0] ss:$16 sps:$4 sm:$0xff]  }
  0x13   :  { %2118 = vmatpush1.bf16.msra.mxu0 %v6335_v18  ;;  %v6361_v36 = vld [vmem:[%s9869_s1 + $0x1c4] ss:$16 sps:$4 sm:$0xff]   ;;  %v6365_v38 = vld [vmem:[%s9869_s1 + $0x1c0] ss:$16 sps:$4 sm:$0xff]  }
  0x14   :  { %2311 = vmatpush1.bf16.msra.mxu1 %v6336_v19  ;;  %2119 = vmatprep.subr.bf16.mxu0 %v6337_v20  ;;  %v6363_v37 = vld [vmem:[%s9869_s1 + $0x3c4] ss:$16 sps:$4 sm:$0xff]   ;;  %v6366_v39 = vld [vmem:[%s9869_s1 + $0x3c0] ss:$16 sps:$4 sm:$0xff]   ;;  %v6426_v19 = vld [vmem:[%s9870_s0 + $0x7c] ss:$28 sps:$4 sm:$0xff]  }
  0x15   :  { %2312 = vmatprep.subr.bf16.mxu1 %v6339_v21  ;;  %v6367_v40 = vld [vmem:[%s9869_s1 + $0x1a4] ss:$16 sps:$4 sm:$0xff]   ;;  %v6371_v42 = vld [vmem:[%s9869_s1 + $0x1a0] ss:$16 sps:$4 sm:$0xff]  }
  0x16   :  { %v6369_v41 = vld [vmem:[%s9869_s1 + $0x3a4] ss:$16 sps:$4 sm:$0xff]   ;;  %v6372_v43 = vld [vmem:[%s9869_s1 + $0x3a0] ss:$16 sps:$4 sm:$0xff]  }
  0x17   :  { %2120 = vmatpush1.bf16.msra.mxu0 %v6341_v22  ;;  %v6373_v44 = vld [vmem:[%s9869_s1 + $0x184] ss:$16 sps:$4 sm:$0xff]   ;;  %v6377_v46 = vld [vmem:[%s9869_s1 + $0x180] ss:$16 sps:$4 sm:$0xff]  }
  0x18   :  { %2313 = vmatpush1.bf16.msra.mxu1 %v6342_v23  ;;  %2121 = vmatprep.subr.bf16.mxu0 %v6343_v24  ;;  %v6375_v45 = vld [vmem:[%s9869_s1 + $0x384] ss:$16 sps:$4 sm:$0xff]   ;;  %v6378_v47 = vld [vmem:[%s9869_s1 + $0x380] ss:$16 sps:$4 sm:$0xff]  }
  0x19   :  { %2314 = vmatprep.subr.bf16.mxu1 %v6345_v25  ;;  %v6379_v48 = vld [vmem:[%s9869_s1 + $0x164] ss:$16 sps:$4 sm:$0xff]   ;;  %v6383_v52 = vld [vmem:[%s9869_s1 + $0x160] ss:$16 sps:$4 sm:$0xff]  }
  0x1a   :  { %v6405_v49 = vld [vmem:[%s9870_s0 + $0x4] ss:$28 sps:$4 sm:$0xff]   ;;  %v6419_v16 = vld [vmem:[%s9870_s0 + $0x38] ss:$28 sps:$4 sm:$0xff]  }
  0x1b   :  { %2122 = vmatpush1.bf16.msra.mxu0 %v6347_v26  ;;  %v6381_v50 = vld [vmem:[%s9869_s1 + $0x364] ss:$16 sps:$4 sm:$0xff]   ;;  %2141 = vmatprep.mubr.bf16.mxu0 %v6405_v49  ;;  %v6384_v53 = vld [vmem:[%s9869_s1 + $0x360] ss:$16 sps:$4 sm:$0xff]   ;;  %v6457_v49 = vld [vmem:[%s9870_s0 + $0x11c] ss:$28 sps:$4 sm:$0xff]  }
  0x1c   :  { %2315 = vmatpush1.bf16.msra.mxu1 %v6348_v27  ;;  %2123 = vmatprep.subr.bf16.mxu0 %v6349_v28  ;;  %v6385_v54 = vld [vmem:[%s9869_s1 + $0x144] ss:$16 sps:$4 sm:$0xff]   ;;  %v6389_v56 = vld [vmem:[%s9869_s1 + $0x140] ss:$16 sps:$4 sm:$0xff]  }
  0x1d   :  { %2316 = vmatprep.subr.bf16.mxu1 %v6351_v29  ;;  %v6387_v55 = vld [vmem:[%s9869_s1 + $0x344] ss:$16 sps:$4 sm:$0xff]   ;;  %v6390_v57 = vld [vmem:[%s9869_s1 + $0x340] ss:$16 sps:$4 sm:$0xff]   ;;  %v6436_v29 = vld [vmem:[%s9870_s0 + $0xac] ss:$28 sps:$4 sm:$0xff]  }
  0x1e   :  { %v6391_v58 = vld [vmem:[%s9869_s1 + $0x124] ss:$16 sps:$4 sm:$0xff]   ;;  %v6395_v60 = vld [vmem:[%s9869_s1 + $0x120] ss:$16 sps:$4 sm:$0xff]  }
  0x1f   :  { %2124 = vmatpush1.bf16.msra.mxu0 %v6353_v30  ;;  %v6393_v59 = vld [vmem:[%s9869_s1 + $0x324] ss:$16 sps:$4 sm:$0xff]   ;;  %v6396_v61 = vld [vmem:[%s9869_s1 + $0x320] ss:$16 sps:$4 sm:$0xff]  }
  0x20   :  { %2317 = vmatpush1.bf16.msra.mxu1 %v6354_v31  ;;  %2125 = vmatprep.subr.bf16.mxu0 %v6355_v32  ;;  %v6397_v62 = vld [vmem:[%s9869_s1 + $0x104] ss:$16 sps:$4 sm:$0xff]   ;;  %v6401_v0 = vld [vmem:[%s9869_s1 + $0x100] ss:$16 sps:$4 sm:$0xff]  }
  0x21   :  { %2318 = vmatprep.subr.bf16.mxu1 %v6357_v33  ;;  %v6399_v63 = vld [vmem:[%s9869_s1 + $0x304] ss:$16 sps:$4 sm:$0xff]   ;;  %v6402_v1 = vld [vmem:[%s9869_s1 + $0x300] ss:$16 sps:$4 sm:$0xff]  }
  0x22   :  { %v6411_v2 = vld [vmem:[%s9869_s1 + $0x4e4] ss:$16 sps:$4 sm:$0xff]   ;;  %v6403_v4 = vld [vmem:[%s9870_s0] ss:$28 sps:$4 sm:$0xff]   ;;  %v6428_v26 = vld [vmem:[%s9870_s0 + $0x70] ss:$28 sps:$4 sm:$0xff]  }
  0x23   :  { %2126 = vmatpush2.bf16.msra.mxu0 %v6359_v34  ;;  %v6414_v3 = vld [vmem:[%s9869_s1 + $0x6e4] ss:$16 sps:$4 sm:$0xff]   ;;  %v6409_v6 = vld [vmem:[%s9869_s1 + $0x4e0] ss:$16 sps:$4 sm:$0xff]  }
  0x24   :  { %2319 = vmatpush2.bf16.msra.mxu1 %v6360_v35  ;;  %2127 = vmatprep.subr.bf16.mxu0 %v6361_v36  ;;  %v6406_v5 = vld [vmem:[%s9870_s0 + $0x8] ss:$28 sps:$4 sm:$0xff]   ;;  %v6412_v7 = vld [vmem:[%s9869_s1 + $0x6e0] ss:$16 sps:$4 sm:$0xff]   ;;  %v6429_v28 = vld [vmem:[%s9870_s0 + $0x78] ss:$28 sps:$4 sm:$0xff]  }
  0x25   :  { %2320 = vmatprep.subr.bf16.mxu1 %v6363_v37  ;;  %v6417_v9 = vld [vmem:[%s9870_s0 + $0x44] ss:$28 sps:$4 sm:$0xff]   ;;  %v6424_v18 = vld [vmem:[%s9870_s0 + $0x74] ss:$28 sps:$4 sm:$0xff]  }
  0x26   :  { %v6423_v10 = vld [vmem:[%s9869_s1 + $0x4c4] ss:$16 sps:$4 sm:$0xff]   ;;  %v6421_v12 = vld [vmem:[%s9869_s1 + $0x4c0] ss:$16 sps:$4 sm:$0xff]  }
  0x27   :  { %2128 = vmatpush2.bf16.msra.mxu0 %v6365_v38  ;;  %v6435_v11 = vld [vmem:[%s9869_s1 + $0x6c4] ss:$16 sps:$4 sm:$0xff]   ;;  %v6433_v14 = vld [vmem:[%s9869_s1 + $0x6c0] ss:$16 sps:$4 sm:$0xff]  }
  0x28   :  { %2321 = vmatpush2.bf16.msra.mxu1 %v6366_v39  ;;  %2129 = vmatprep.subr.bf16.mxu0 %v6367_v40  ;;  %v6432_v13 = vld [vmem:[%s9869_s1 + $0x4a4] ss:$16 sps:$4 sm:$0xff]   ;;  %v6420_v17 = vld [vmem:[%s9870_s0 + $0x40] ss:$28 sps:$4 sm:$0xff]   ;;  %v6441_v38 = vld [vmem:[%s9870_s0 + $0xb0] ss:$28 sps:$4 sm:$0xff]  }
  0x29   :  { %2322 = vmatprep.subr.bf16.mxu1 %v6369_v41  ;;  %v6456_v15 = vld [vmem:[%s9869_s1 + $0x6a4] ss:$16 sps:$4 sm:$0xff]   ;;  %v6430_v20 = vld [vmem:[%s9869_s1 + $0x4a0] ss:$16 sps:$4 sm:$0xff]   ;;  %v6447_v40 = vld [vmem:[%s9870_s0 + $0xec] ss:$28 sps:$4 sm:$0xff]  }
  0x2a   :  { %v6454_v21 = vld [vmem:[%s9869_s1 + $0x6a0] ss:$16 sps:$4 sm:$0xff]   ;;  %v6444_v22 = vld [vmem:[%s9869_s1 + $0x484] ss:$16 sps:$4 sm:$0xff]  }
  0x2b   :  { %2130 = vmatpush2.bf16.msra.mxu0 %v6371_v42  ;;  %v6477_v23 = vld [vmem:[%s9869_s1 + $0x684] ss:$16 sps:$4 sm:$0xff]   ;;  %v6442_v24 = vld [vmem:[%s9869_s1 + $0x480] ss:$16 sps:$4 sm:$0xff]  }
  0x2c   :  { %2323 = vmatpush2.bf16.msra.mxu1 %v6372_v43  ;;  %2131 = vmatprep.subr.bf16.mxu0 %v6373_v44  ;;  %v6475_v25 = vld [vmem:[%s9869_s1 + $0x680] ss:$16 sps:$4 sm:$0xff]   ;;  %v6453_v27 = vld [vmem:[%s9869_s1 + $0x464] ss:$16 sps:$4 sm:$0xff]  }
  0x2d   :  { %2324 = vmatprep.subr.bf16.mxu1 %v6375_v45  ;;  %v6438_v30 = vld [vmem:[%s9870_s0 + $0xb4] ss:$28 sps:$4 sm:$0xff]   ;;  %v6440_v37 = vld [vmem:[%s9870_s0 + $0xa8] ss:$28 sps:$4 sm:$0xff]   ;;  %v6449_v44 = vld [vmem:[%s9870_s0 + $0xe0] ss:$28 sps:$4 sm:$0xff]  }
  0x2e   :  { %v6451_v31 = vld [vmem:[%s9869_s1 + $0x460] ss:$16 sps:$4 sm:$0xff]   ;;  %v6465_v32 = vld [vmem:[%s9869_s1 + $0x444] ss:$16 sps:$4 sm:$0xff]  }
  0x2f   :  { %2132 = vmatpush2.bf16.msra.mxu0 %v6377_v46  ;;  %v6463_v33 = vld [vmem:[%s9869_s1 + $0x440] ss:$16 sps:$4 sm:$0xff]   ;;  %v6498_v35 = vld [vmem:[%s9869_s1 + $0x664] ss:$16 sps:$4 sm:$0xff]  }
  0x30   :  { %2325 = vmatpush2.bf16.msra.mxu1 %v6378_v47  ;;  %2133 = vmatprep.subr.bf16.mxu0 %v6379_v48  ;;  %v6496_v34 = vld [vmem:[%s9869_s1 + $0x660] ss:$16 sps:$4 sm:$0xff]   ;;  %v6474_v36 = vld [vmem:[%s9869_s1 + $0x424] ss:$16 sps:$4 sm:$0xff]  }
  0x31   :  { %2326 = vmatprep.subr.bf16.mxu1 %v6381_v50  ;;  %v6445_v39 = vld [vmem:[%s9870_s0 + $0xe4] ss:$28 sps:$4 sm:$0xff]  }
  0x32   :  { %v6472_v41 = vld [vmem:[%s9869_s1 + $0x420] ss:$16 sps:$4 sm:$0xff]   ;;  %v6486_v42 = vld [vmem:[%s9869_s1 + $0x404] ss:$16 sps:$4 sm:$0xff]  }
  0x33   :  { %2134 = vmatpush2.bf16.msra.mxu0 %v6383_v52  ;;  %v6484_v43 = vld [vmem:[%s9869_s1 + $0x400] ss:$16 sps:$4 sm:$0xff]   ;;  %v6495_v45 = vld [vmem:[%s9869_s1 + $0x5e4] ss:$16 sps:$4 sm:$0xff]  }
  0x34   :  { %2327 = vmatpush2.bf16.msra.mxu1 %v6384_v53  ;;  %2135 = vmatprep.subr.bf16.mxu0 %v6385_v54  ;;  %v6517_v46 = vld [vmem:[%s9869_s1 + $0x640] ss:$16 sps:$4 sm:$0xff]   ;;  %v6519_v47 = vld [vmem:[%s9869_s1 + $0x644] ss:$16 sps:$4 sm:$0xff]  }
  0x35   :  { %2328 = vmatprep.subr.bf16.mxu1 %v6387_v55  ;;  %v6450_v48 = vld [vmem:[%s9870_s0 + $0xe8] ss:$28 sps:$4 sm:$0xff]   ;;  %v6493_v51 = vld [vmem:[%s9869_s1 + $0x5e0] ss:$16 sps:$4 sm:$0xff]   ;;  %v6461_v53 = vld [vmem:[%s9870_s0 + $0x118] ss:$28 sps:$4 sm:$0xff]  }
  0x36   :  { %v6459_v50 = vld [vmem:[%s9870_s0 + $0x124] ss:$28 sps:$4 sm:$0xff]  }
  0x37   :  { %2136 = vmatpush2.bf16.msra.mxu0 %v6389_v56  ;;  %v6507_v52 = vld [vmem:[%s9869_s1 + $0x5c4] ss:$16 sps:$4 sm:$0xff]   ;;  %v6462_v54 = vld [vmem:[%s9870_s0 + $0x120] ss:$28 sps:$4 sm:$0xff]  }
  0x38   :  { %2329 = vmatpush2.bf16.msra.mxu1 %v6390_v57  ;;  %2137 = vmatprep.subr.bf16.mxu0 %v6391_v58  ;;  %v6505_v55 = vld [vmem:[%s9869_s1 + $0x5c0] ss:$16 sps:$4 sm:$0xff]   ;;  %v6516_v57 = vld [vmem:[%s9869_s1 + $0x5a4] ss:$16 sps:$4 sm:$0xff]  }
  0x39   :  { %2330 = vmatprep.subr.bf16.mxu1 %v6393_v59  ;;  %v6466_v56 = vld [vmem:[%s9870_s0 + $0x154] ss:$28 sps:$4 sm:$0xff]  }
  0x3a   :  { %v6538_v58 = vld [vmem:[%s9869_s1 + $0x620] ss:$16 sps:$4 sm:$0xff]   ;;  %v6540_v59 = vld [vmem:[%s9869_s1 + $0x624] ss:$16 sps:$4 sm:$0xff]  }
  0x3b   :  { %2138 = vmatpush2.bf16.msra.mxu0 %v6395_v60  ;;  %v6468_v60 = vld [vmem:[%s9870_s0 + $0x15c] ss:$28 sps:$4 sm:$0xff]  }
  0x3c   :  { %2331 = vmatpush2.bf16.msra.mxu1 %v6396_v61  ;;  %2139 = vmatprep.subr.bf16.mxu0 %v6397_v62  ;;  %v6514_v61 = vld [vmem:[%s9869_s1 + $0x5a0] ss:$16 sps:$4 sm:$0xff]   ;;  %v6528_v62 = vld [vmem:[%s9869_s1 + $0x584] ss:$16 sps:$4 sm:$0xff]  }
  0x3d   :  { %2332 = vmatprep.subr.bf16.mxu1 %v6399_v63  ;;  %v6470_v63 = vld [vmem:[%s9870_s0 + $0x150] ss:$28 sps:$4 sm:$0xff]  }
  0x3f   :  { %2140 = vmatpush2.bf16.msra.mxu0 %v6401_v0  ;;  %v6471_v0 = vld [vmem:[%s9870_s0 + $0x158] ss:$28 sps:$4 sm:$0xff]  }
  0x40   :  { %2333 = vmatpush2.bf16.msra.mxu1 %v6402_v1  ;;  %2495 = vmatprep.subr.bf16.mxu0 %v6411_v2  ;;  %v6526_v1 = vld [vmem:[%s9869_s1 + $0x580] ss:$16 sps:$4 sm:$0xff]   ;;  %v6478_v2 = vld [vmem:[%s9870_s0 + $0x18c] ss:$28 sps:$4 sm:$0xff]  }
  0x41   :  { %2688 = vmatprep.subr.bf16.mxu1 %v6414_v3  ;;  %v6537_v3 = vld [vmem:[%s9869_s1 + $0x564] ss:$16 sps:$4 sm:$0xff]  }
  0x42   :  { %2142 = vmatmul.mubr.bf16.vlgmr.msra.gmra.mxu0 %v6403_v4  ;;  %v6480_v4 = vld [vmem:[%s9870_s0 + $0x194] ss:$28 sps:$4 sm:$0xff]  }
  0x43   :  { %2335 = vmatmul.mubr.bf16.vlgmr.msra.gmra.mxu1 %v6406_v5  ;;  %2496 = vmatpush1.bf16.msra.mxu0 %v6409_v6  ;;  %v6535_v5 = vld [vmem:[%s9869_s1 + $0x560] ss:$16 sps:$4 sm:$0xff]   ;;  %v6549_v6 = vld [vmem:[%s9869_s1 + $0x544] ss:$16 sps:$4 sm:$0xff]  }
  0x44   :  { %2689 = vmatpush1.bf16.msra.mxu1 %v6412_v7  ;;  %2151 = vmatprep.mubr.bf16.mxu0 %v6415_v8  ;;  %v6561_v7 = vld [vmem:[%s9869_s1 + $0x604] ss:$16 sps:$4 sm:$0xff]   ;;  %v6559_v8 = vld [vmem:[%s9869_s1 + $0x600] ss:$16 sps:$4 sm:$0xff]  }
  0x45   :  { %2344 = vmatprep.mubr.bf16.mxu1 %v6417_v9  ;;  %2497 = vmatprep.subr.bf16.mxu0 %v6423_v10  ;;  %v6482_v9 = vld [vmem:[%s9870_s0 + $0x188] ss:$28 sps:$4 sm:$0xff]   ;;  %v6547_v10 = vld [vmem:[%s9869_s1 + $0x540] ss:$16 sps:$4 sm:$0xff]  }
  0x46   :  { %2690 = vmatprep.subr.bf16.mxu1 %v6435_v11  ;;  %v6483_v11 = vld [vmem:[%s9870_s0 + $0x190] ss:$28 sps:$4 sm:$0xff]  }
  0x47   :  { %2498 = vmatpush1.bf16.msra.mxu0 %v6421_v12  ;;  %v6558_v12 = vld [vmem:[%s9869_s1 + $0x524] ss:$16 sps:$4 sm:$0xff]  }
  0x48   :  { %2691 = vmatpush1.bf16.msra.mxu1 %v6433_v14  ;;  %2499 = vmatprep.subr.bf16.mxu0 %v6432_v13  ;;  %v6487_v13 = vld [vmem:[%s9870_s0 + $0x1c4] ss:$28 sps:$4 sm:$0xff]   ;;  %v6489_v14 = vld [vmem:[%s9870_s0 + $0x1cc] ss:$28 sps:$4 sm:$0xff]  }
  0x49   :  { %2692 = vmatprep.subr.bf16.mxu1 %v6456_v15  ;;  %v6556_v15 = vld [vmem:[%s9869_s1 + $0x520] ss:$16 sps:$4 sm:$0xff]  }
  0x4a   :  { %2152 = vmatmul.mubr.bf16.gmra.mxu0 %v6419_v16  ;;  %v6570_v16 = vld [vmem:[%s9869_s1 + $0x504] ss:$16 sps:$4 sm:$0xff]  }
  0x4b   :  { %2345 = vmatmul.mubr.bf16.gmra.mxu1 %v6420_v17  ;;  %2161 = vmatprep.mubr.bf16.mxu0 %v6424_v18  ;;  %v6580_v17 = vld [vmem:[%s9869_s1 + $0x2ec] ss:$16 sps:$4 sm:$0xff]  }
  0x4c   :  { %2354 = vmatprep.mubr.bf16.mxu1 %v6426_v19  ;;  %2500 = vmatpush1.bf16.msra.mxu0 %v6430_v20  ;;  %v6491_v18 = vld [vmem:[%s9870_s0 + $0x1c0] ss:$28 sps:$4 sm:$0xff]  }
  0x4d   :  { %2693 = vmatpush1.bf16.msra.mxu1 %v6454_v21  ;;  %2501 = vmatprep.subr.bf16.mxu0 %v6444_v22  ;;  %v6568_v19 = vld [vmem:[%s9869_s1 + $0x500] ss:$16 sps:$4 sm:$0xff]   ;;  %v6577_v20 = vld [vmem:[%s9869_s1 + $0xec] ss:$16 sps:$4 sm:$0xff]   ;;  %v6492_v21 = vld [vmem:[%s9870_s0 + $0x1c8] ss:$28 sps:$4 sm:$0xff]  }
  0x4e   :  { %2694 = vmatprep.subr.bf16.mxu1 %v6477_v23  ;;  %v6499_v22 = vld [vmem:[%s9870_s0 + $0x1fc] ss:$28 sps:$4 sm:$0xff]   ;;  %v6501_v23 = vld [vmem:[%s9870_s0 + $0x204] ss:$28 sps:$4 sm:$0xff]  }
  0x50   :  { %2502 = vmatpush1.bf16.msra.mxu0 %v6442_v24  ;;  %v6503_v24 = vld [vmem:[%s9870_s0 + $0x1f8] ss:$28 sps:$4 sm:$0xff]  }
  0x51   :  { %2695 = vmatpush1.bf16.msra.mxu1 %v6475_v25  ;;  %2503 = vmatprep.subr.bf16.mxu0 %v6453_v27  ;;  %v6504_v25 = vld [vmem:[%s9870_s0 + $0x200] ss:$28 sps:$4 sm:$0xff]  }
  0x52   :  { %2162 = vmatmul.mubr.bf16.gmra.mxu0 %v6428_v26  ;;  %2696 = vmatprep.subr.bf16.mxu1 %v6498_v35  ;;  %v6508_v26 = vld [vmem:[%s9870_s0 + $0x234] ss:$28 sps:$4 sm:$0xff]   ;;  %v6510_v27 = vld [vmem:[%s9870_s0 + $0x23c] ss:$28 sps:$4 sm:$0xff]   ;;  %v6531_v35 = vld [vmem:[%s9870_s0 + $0x2ac] ss:$28 sps:$4 sm:$0xff]  }
  0x53   :  { %2355 = vmatmul.mubr.bf16.gmra.mxu1 %v6429_v28  ;;  %2171 = vmatprep.mubr.bf16.mxu0 %v6436_v29  ;;  %v6512_v28 = vld [vmem:[%s9870_s0 + $0x230] ss:$28 sps:$4 sm:$0xff]   ;;  %v6513_v29 = vld [vmem:[%s9870_s0 + $0x238] ss:$28 sps:$4 sm:$0xff]  }
  0x54   :  { %2364 = vmatprep.mubr.bf16.mxu1 %v6438_v30  ;;  %2504 = vmatpush1.bf16.msra.mxu0 %v6451_v31  ;;  %v6520_v30 = vld [vmem:[%s9870_s0 + $0x26c] ss:$28 sps:$4 sm:$0xff]   ;;  %v6522_v31 = vld [vmem:[%s9870_s0 + $0x274] ss:$28 sps:$4 sm:$0xff]  }
  0x55   :  { %2505 = vmatprep.subr.bf16.mxu0 %v6465_v32  ;;  %2697 = vmatpush1.bf16.msra.mxu1 %v6496_v34  ;;  %v6524_v32 = vld [vmem:[%s9870_s0 + $0x268] ss:$28 sps:$4 sm:$0xff]  }
  0x56   :  { %2698 = vmatprep.subr.bf16.mxu1 %v6519_v47  ;;  %v6529_v34 = vld [vmem:[%s9870_s0 + $0x2a4] ss:$28 sps:$4 sm:$0xff]   ;;  %v6564_v47 = vld [vmem:[%s9870_s0 + $0x354] ss:$28 sps:$4 sm:$0xff]  }
  0x58   :  { %2506 = vmatpush1.bf16.msra.mxu0 %v6463_v33  ;;  %v6525_v33 = vld [vmem:[%s9870_s0 + $0x270] ss:$28 sps:$4 sm:$0xff]  }
  0x59   :  { %2507 = vmatprep.subr.bf16.mxu0 %v6474_v36  ;;  %2699 = vmatpush1.bf16.msra.mxu1 %v6517_v46  ;;  %v6533_v36 = vld [vmem:[%s9870_s0 + $0x2a0] ss:$28 sps:$4 sm:$0xff]   ;;  %v6562_v46 = vld [vmem:[%s9870_s0 + $0x34c] ss:$28 sps:$4 sm:$0xff]  }
  0x5a   :  { %2172 = vmatmul.mubr.bf16.gmra.mxu0 %v6440_v37  ;;  %2700 = vmatprep.subr.bf16.mxu1 %v6540_v59  ;;  %v6534_v37 = vld [vmem:[%s9870_s0 + $0x2a8] ss:$28 sps:$4 sm:$0xff]  }
  0x5b   :  { %2365 = vmatmul.mubr.bf16.gmra.mxu1 %v6441_v38  ;;  %2181 = vmatprep.mubr.bf16.mxu0 %v6445_v39  ;;  %v6541_v38 = vld [vmem:[%s9870_s0 + $0x2dc] ss:$28 sps:$4 sm:$0xff]   ;;  %v6543_v39 = vld [vmem:[%s9870_s0 + $0x2e4] ss:$28 sps:$4 sm:$0xff]  }
  0x5c   :  { %2374 = vmatprep.mubr.bf16.mxu1 %v6447_v40  ;;  %2508 = vmatpush1.bf16.msra.mxu0 %v6472_v41  ;;  %v6545_v40 = vld [vmem:[%s9870_s0 + $0x2d8] ss:$28 sps:$4 sm:$0xff]   ;;  %v6546_v41 = vld [vmem:[%s9870_s0 + $0x2e0] ss:$28 sps:$4 sm:$0xff]  }
  0x5d   :  { %2509 = vmatprep.subr.bf16.mxu0 %v6486_v42  ;;  %2701 = vmatpush1.bf16.msra.mxu1 %v6538_v58  ;;  %v6550_v42 = vld [vmem:[%s9870_s0 + $0x314] ss:$28 sps:$4 sm:$0xff]   ;;  %v6590_v58 = vld [vmem:[%s9869_s1 + $0x2cc] ss:$16 sps:$4 sm:$0xff]   ;;  %v6585_v59 = vld [vmem:[%s9869_s1 + $0xc8] ss:$16 sps:$4 sm:$0xff]  }
  0x5e   :  { %2702 = vmatprep.subr.bf16.mxu1 %v6561_v7  ;;  %v6608_v7 = vld [vmem:[%s9869_s1 + $0x288] ss:$16 sps:$4 sm:$0xff]  }
  0x60   :  { %2510 = vmatpush1.bf16.msra.mxu0 %v6484_v43  ;;  %v6552_v43 = vld [vmem:[%s9870_s0 + $0x31c] ss:$28 sps:$4 sm:$0xff]  }
  0x61   :  { %2511 = vmatprep.subr.bf16.mxu0 %v6495_v45  ;;  %2703 = vmatpush1.bf16.msra.mxu1 %v6559_v8  ;;  %v6555_v45 = vld [vmem:[%s9870_s0 + $0x318] ss:$28 sps:$4 sm:$0xff]   ;;  %v6593_v8 = vld [vmem:[%s9870_s0 + $0x80] ss:$28 sps:$4 sm:$0xff]  }
  0x62   :  { %2182 = vmatmul.mubr.bf16.gmra.mxu0 %v6449_v44  ;;  %3074 = vmatprep.subr.bf16.mxu1 %v6580_v17  ;;  %v6554_v44 = vld [vmem:[%s9870_s0 + $0x310] ss:$28 sps:$4 sm:$0xff]   ;;  %v6625_v17 = vld [vmem:[%s9869_s1 + $0x48] ss:$16 sps:$4 sm:$0xff]  }
  0x63   :  { %2375 = vmatmul.mubr.bf16.gmra.mxu1 %v6450_v48  ;;  %2191 = vmatprep.mubr.bf16.mxu0 %v6457_v49  ;;  %v6566_v48 = vld [vmem:[%s9870_s0 + $0x348] ss:$28 sps:$4 sm:$0xff]   ;;  %v6567_v49 = vld [vmem:[%s9870_s0 + $0x350] ss:$28 sps:$4 sm:$0xff]  }
  0x64   :  { %2384 = vmatprep.mubr.bf16.mxu1 %v6459_v50  ;;  %2512 = vmatpush2.bf16.msra.mxu0 %v6493_v51  ;;  %v6573_v50 = vld [vmem:[%s9870_s0 + $0x14] ss:$28 sps:$4 sm:$0xff]   ;;  %v9883_v51 = vmov 0  }
  0x65   :  { %2513 = vmatprep.subr.bf16.mxu0 %v6507_v52  ;;  %v6571_v52 = vld [vmem:[%s9870_s0 + $0x10] ss:$28 sps:$4 sm:$0xff]  }
  0x68   :  { %2514 = vmatpush2.bf16.msra.mxu0 %v6505_v55  ;;  %v6578_v55 = vld [vmem:[%s9869_s1 + $0x2e8] ss:$16 sps:$4 sm:$0xff]  }
  0x69   :  { %2515 = vmatprep.subr.bf16.mxu0 %v6516_v57  ;;  %v6587_v57 = vld [vmem:[%s9869_s1 + $0xcc] ss:$16 sps:$4 sm:$0xff]  }
  0x6a   :  { %2192 = vmatmul.mubr.bf16.gmra.mxu0 %v6461_v53  ;;  %v6574_v53 = vld [vmem:[%s9870_s0 + $0x18] ss:$28 sps:$4 sm:$0xff]  }
  0x6b   :  { %2385 = vmatmul.mubr.bf16.gmra.mxu1 %v6462_v54  ;;  %2201 = vmatprep.mubr.bf16.mxu0 %v6466_v56  ;;  %v6575_v54 = vld [vmem:[%s9869_s1 + $0xe8] ss:$16 sps:$4 sm:$0xff]  }
  0x6c   :  { %2394 = vmatprep.mubr.bf16.mxu1 %v6468_v60  ;;  %2516 = vmatpush2.bf16.msra.mxu0 %v6514_v61  ;;  %v6581_v56 = vld [vmem:[%s9870_s0 + $0x4c] ss:$28 sps:$4 sm:$0xff]  }
  0x6d   :  { %2517 = vmatprep.subr.bf16.mxu0 %v6528_v62  ;;  %v6588_v60 = vld [vmem:[%s9869_s1 + $0x2c8] ss:$16 sps:$4 sm:$0xff]   ;;  %v6597_v62 = vld [vmem:[%s9869_s1 + $0xac] ss:$16 sps:$4 sm:$0xff]  }
  0x6e   :  { %v6583_v61 = vld [vmem:[%s9870_s0 + $0x48] ss:$28 sps:$4 sm:$0xff]  }
  0x70   :  { %2518 = vmatpush2.bf16.msra.mxu0 %v6526_v1  ;;  %v6591_v1 = vld [vmem:[%s9870_s0 + $0x84] ss:$28 sps:$4 sm:$0xff]  }
  0x71   :  { %2519 = vmatprep.subr.bf16.mxu0 %v6537_v3  ;;  %v6598_v3 = vld [vmem:[%s9869_s1 + $0x2a8] ss:$16 sps:$4 sm:$0xff]  }
  0x72   :  { %2202 = vmatmul.mubr.bf16.gmra.mxu0 %v6470_v63  ;;  %v6600_v63 = vld [vmem:[%s9869_s1 + $0x2ac] ss:$16 sps:$4 sm:$0xff]  }
  0x73   :  { %2395 = vmatmul.mubr.bf16.gmra.mxu1 %v6471_v0  ;;  %2211 = vmatprep.mubr.bf16.mxu0 %v6478_v2  ;;  %v6584_v0 = vld [vmem:[%s9870_s0 + $0x50] ss:$28 sps:$4 sm:$0xff]   ;;  %v6595_v2 = vld [vmem:[%s9869_s1 + $0xa8] ss:$16 sps:$4 sm:$0xff]  }
  0x74   :  { %2404 = vmatprep.mubr.bf16.mxu1 %v6480_v4  ;;  %2520 = vmatpush2.bf16.msra.mxu0 %v6535_v5  ;;  %v6607_v4 = vld [vmem:[%s9869_s1 + $0x8c] ss:$16 sps:$4 sm:$0xff]  }
  0x75   :  { %2521 = vmatprep.subr.bf16.mxu0 %v6549_v6  ;;  %v6610_v5 = vld [vmem:[%s9869_s1 + $0x28c] ss:$16 sps:$4 sm:$0xff]   ;;  %v6605_v6 = vld [vmem:[%s9869_s1 + $0x88] ss:$16 sps:$4 sm:$0xff]  }
  0x78   :  { %2522 = vmatpush2.bf16.msra.mxu0 %v6547_v10  ;;  %v6601_v10 = vld [vmem:[%s9870_s0 + $0xbc] ss:$28 sps:$4 sm:$0xff]  }
  0x79   :  { %2523 = vmatprep.subr.bf16.mxu0 %v6558_v12  ;;  %v6620_v12 = vld [vmem:[%s9869_s1 + $0x26c] ss:$16 sps:$4 sm:$0xff]  }
  0x7a   :  { %2212 = vmatmul.mubr.bf16.gmra.mxu0 %v6482_v9  ;;  %v6594_v9 = vld [vmem:[%s9870_s0 + $0x88] ss:$28 sps:$4 sm:$0xff]  }
  0x7b   :  { %2405 = vmatmul.mubr.bf16.gmra.mxu1 %v6483_v11  ;;  %2221 = vmatprep.mubr.bf16.mxu0 %v6487_v13  ;;  %v6617_v11 = vld [vmem:[%s9869_s1 + $0x6c] ss:$16 sps:$4 sm:$0xff]   ;;  %v6615_v13 = vld [vmem:[%s9869_s1 + $0x68] ss:$16 sps:$4 sm:$0xff]  }
  0x7c   :  { %2414 = vmatprep.mubr.bf16.mxu1 %v6489_v14  ;;  %2524 = vmatpush2.bf16.msra.mxu0 %v6556_v15  ;;  %v6618_v14 = vld [vmem:[%s9869_s1 + $0x268] ss:$16 sps:$4 sm:$0xff]   ;;  %v6627_v15 = vld [vmem:[%s9869_s1 + $0x4c] ss:$16 sps:$4 sm:$0xff]  }
  0x7d   :  { %2525 = vmatprep.subr.bf16.mxu0 %v6570_v16  ;;  %v6630_v16 = vld [vmem:[%s9869_s1 + $0x24c] ss:$16 sps:$4 sm:$0xff]  }
  0x80   :  { %2526 = vmatpush2.bf16.msra.mxu0 %v6568_v19  ;;  %v6603_v19 = vld [vmem:[%s9870_s0 + $0xb8] ss:$28 sps:$4 sm:$0xff]  }
  0x81   :  { %2881 = vmatprep.subr.bf16.mxu0 %v6577_v20  ;;  %v6604_v20 = vld [vmem:[%s9870_s0 + $0xc0] ss:$28 sps:$4 sm:$0xff]  }
  0x82   :  { %2222 = vmatmul.mubr.bf16.gmra.mxu0 %v6491_v18  ;;  %v6628_v18 = vld [vmem:[%s9869_s1 + $0x248] ss:$16 sps:$4 sm:$0xff]  }
  0x83   :  { %2415 = vmatmul.mubr.bf16.gmra.mxu1 %v6492_v21  ;;  %2231 = vmatprep.mubr.bf16.mxu0 %v6499_v22  ;;  %v6637_v21 = vld [vmem:[%s9869_s1 + $0x2c] ss:$16 sps:$4 sm:$0xff]  }
  0x84   :  { %2424 = vmatprep.mubr.bf16.mxu1 %v6501_v23  ;;  %v6640_v22 = vld [vmem:[%s9869_s1 + $0x22c] ss:$16 sps:$4 sm:$0xff]   ;;  %v6611_v23 = vld [vmem:[%s9870_s0 + $0xf4] ss:$28 sps:$4 sm:$0xff]  }
  0x8a   :  { %2232 = vmatmul.mubr.bf16.gmra.mxu0 %v6503_v24  ;;  %v6635_v24 = vld [vmem:[%s9869_s1 + $0x28] ss:$16 sps:$4 sm:$0xff]  }
  0x8b   :  { %2425 = vmatmul.mubr.bf16.gmra.mxu1 %v6504_v25  ;;  %2241 = vmatprep.mubr.bf16.mxu0 %v6508_v26  ;;  %v6638_v25 = vld [vmem:[%s9869_s1 + $0x228] ss:$16 sps:$4 sm:$0xff]   ;;  %v6647_v26 = vld [vmem:[%s9869_s1 + $0xc] ss:$16 sps:$4 sm:$0xff]  }
  0x8c   :  { %2434 = vmatprep.mubr.bf16.mxu1 %v6510_v27  ;;  %v6650_v27 = vld [vmem:[%s9869_s1 + $0x20c] ss:$16 sps:$4 sm:$0xff]  }
  0x92   :  { %2242 = vmatmul.mubr.bf16.gmra.mxu0 %v6512_v28  ;;  %v6645_v28 = vld [vmem:[%s9869_s1 + $0x8] ss:$16 sps:$4 sm:$0xff]  }
  0x93   :  { %2435 = vmatmul.mubr.bf16.gmra.mxu1 %v6513_v29  ;;  %2251 = vmatprep.mubr.bf16.mxu0 %v6520_v30  ;;  %v6648_v29 = vld [vmem:[%s9869_s1 + $0x208] ss:$16 sps:$4 sm:$0xff]   ;;  %v6657_v30 = vld [vmem:[%s9869_s1 + $0x1ec] ss:$16 sps:$4 sm:$0xff]  }
  0x94   :  { %2444 = vmatprep.mubr.bf16.mxu1 %v6522_v31  ;;  %v6660_v31 = vld [vmem:[%s9869_s1 + $0x3ec] ss:$16 sps:$4 sm:$0xff]  }
  0x9a   :  { %2252 = vmatmul.mubr.bf16.gmra.mxu0 %v6524_v32  ;;  %v6613_v32 = vld [vmem:[%s9870_s0 + $0xf0] ss:$28 sps:$4 sm:$0xff]  }
  0x9b   :  { %2445 = vmatmul.mubr.bf16.gmra.mxu1 %v6525_v33  ;;  %2261 = vmatprep.mubr.bf16.mxu0 %v6529_v34  ;;  %v6614_v33 = vld [vmem:[%s9870_s0 + $0xf8] ss:$28 sps:$4 sm:$0xff]   ;;  %v6621_v34 = vld [vmem:[%s9870_s0 + $0x12c] ss:$28 sps:$4 sm:$0xff]  }
  0x9c   :  { %2454 = vmatprep.mubr.bf16.mxu1 %v6531_v35  ;;  %v6655_v35 = vld [vmem:[%s9869_s1 + $0x1e8] ss:$16 sps:$4 sm:$0xff]  }
  0xa2   :  { %2262 = vmatmul.mubr.bf16.gmra.mxu0 %v6533_v36  ;;  %v6658_v36 = vld [vmem:[%s9869_s1 + $0x3e8] ss:$16 sps:$4 sm:$0xff]  }
  0xa3   :  { %2455 = vmatmul.mubr.bf16.gmra.mxu1 %v6534_v37  ;;  %2271 = vmatprep.mubr.bf16.mxu0 %v6541_v38  ;;  %v6667_v37 = vld [vmem:[%s9869_s1 + $0x1cc] ss:$16 sps:$4 sm:$0xff]  }
  0xa4   :  { %2464 = vmatprep.mubr.bf16.mxu1 %v6543_v39  ;;  %v6670_v38 = vld [vmem:[%s9869_s1 + $0x3cc] ss:$16 sps:$4 sm:$0xff]   ;;  %v6665_v39 = vld [vmem:[%s9869_s1 + $0x1c8] ss:$16 sps:$4 sm:$0xff]  }
  0xaa   :  { %2272 = vmatmul.mubr.bf16.gmra.mxu0 %v6545_v40  ;;  %v6668_v40 = vld [vmem:[%s9869_s1 + $0x3c8] ss:$16 sps:$4 sm:$0xff]  }
  0xab   :  { %2465 = vmatmul.mubr.bf16.gmra.mxu1 %v6546_v41  ;;  %2281 = vmatprep.mubr.bf16.mxu0 %v6550_v42  ;;  %v6677_v41 = vld [vmem:[%s9869_s1 + $0x1ac] ss:$16 sps:$4 sm:$0xff]  }
  0xac   :  { %2474 = vmatprep.mubr.bf16.mxu1 %v6552_v43  ;;  %v6680_v42 = vld [vmem:[%s9869_s1 + $0x3ac] ss:$16 sps:$4 sm:$0xff]   ;;  %v6623_v43 = vld [vmem:[%s9870_s0 + $0x128] ss:$28 sps:$4 sm:$0xff]  }
  0xb2   :  { %2282 = vmatmul.mubr.bf16.gmra.mxu0 %v6554_v44  ;;  %v6624_v44 = vld [vmem:[%s9870_s0 + $0x130] ss:$28 sps:$4 sm:$0xff]  }
  0xb3   :  { %2475 = vmatmul.mubr.bf16.gmra.mxu1 %v6555_v45  ;;  %2291 = vmatprep.mubr.bf16.mxu0 %v6562_v46  ;;  %v6631_v45 = vld [vmem:[%s9870_s0 + $0x164] ss:$28 sps:$4 sm:$0xff]   ;;  %v6675_v46 = vld [vmem:[%s9869_s1 + $0x1a8] ss:$16 sps:$4 sm:$0xff]  }
  0xb4   :  { %2484 = vmatprep.mubr.bf16.mxu1 %v6564_v47  ;;  %v6678_v47 = vld [vmem:[%s9869_s1 + $0x3a8] ss:$16 sps:$4 sm:$0xff]  }
  0xba   :  { %2292 = vmatmul.mubr.bf16.gmra.mxu0 %v6566_v48  ;;  %v6687_v48 = vld [vmem:[%s9869_s1 + $0x18c] ss:$16 sps:$4 sm:$0xff]  }
  0xbb   :  { %2485 = vmatmul.mubr.bf16.gmra.mxu1 %v6567_v49  ;;  %2527 = vmatprep.mubr.bf16.mxu0 %v6573_v50  ;;  %v6690_v49 = vld [vmem:[%s9869_s1 + $0x38c] ss:$16 sps:$4 sm:$0xff]   ;;  %v6685_v50 = vld [vmem:[%s9869_s1 + $0x188] ss:$16 sps:$4 sm:$0xff]  }
  0xbc   :  { %2720 = vmatprep.mubr.bf16.mxu1 %v9883_v51 }
  0xc2   :  { %2528 = vmatmul.mubr.bf16.vlgmr.msra.gmra.mxu0 %v6571_v52  ;;  %v6688_v52 = vld [vmem:[%s9869_s1 + $0x388] ss:$16 sps:$4 sm:$0xff]  }
  0xc3   :  { %2721 = vmatmul.mubr.bf16.vlgmr.msra.gmra.mxu1 %v6574_v53  ;;  %2882 = vmatpush1.bf16.msra.mxu0 %v6575_v54  ;;  %v6697_v53 = vld [vmem:[%s9869_s1 + $0x16c] ss:$16 sps:$4 sm:$0xff]  }
  0xc4   :  { %3075 = vmatpush1.bf16.msra.mxu1 %v6578_v55  ;;  %2537 = vmatprep.mubr.bf16.mxu0 %v6581_v56  ;;  %v6700_v54 = vld [vmem:[%s9869_s1 + $0x36c] ss:$16 sps:$4 sm:$0xff]   ;;  %v6634_v56 = vld [vmem:[%s9870_s0 + $0x168] ss:$28 sps:$4 sm:$0xff]  }
  0xc5   :  { %2730 = vmatprep.mubr.bf16.mxu1 %v9883_v51  ;;  %2883 = vmatprep.subr.bf16.mxu0 %v6587_v57  ;;  %v6633_v55 = vld [vmem:[%s9870_s0 + $0x160] ss:$28 sps:$4 sm:$0xff]  }
  0xc6   :  { %3076 = vmatprep.subr.bf16.mxu1 %v6590_v58  ;;  %v6641_v57 = vld [vmem:[%s9870_s0 + $0x19c] ss:$28 sps:$4 sm:$0xff]  }
  0xc7   :  { %2884 = vmatpush1.bf16.msra.mxu0 %v6585_v59  ;;  %v6695_v58 = vld [vmem:[%s9869_s1 + $0x168] ss:$16 sps:$4 sm:$0xff]  }
  0xc8   :  { %3077 = vmatpush1.bf16.msra.mxu1 %v6588_v60  ;;  %2885 = vmatprep.subr.bf16.mxu0 %v6597_v62  ;;  %v6698_v59 = vld [vmem:[%s9869_s1 + $0x368] ss:$16 sps:$4 sm:$0xff]   ;;  %v6707_v60 = vld [vmem:[%s9869_s1 + $0x14c] ss:$16 sps:$4 sm:$0xff]   ;;  %v393_v62 = vlaneseq }
  0xc9   :  { %3078 = vmatprep.subr.bf16.mxu1 %v6600_v63  ;;  %v6705_v63 = vld [vmem:[%s9869_s1 + $0x148] ss:$16 sps:$4 sm:$0xff]  }
  0xca   :  { %2538 = vmatmul.mubr.bf16.gmra.mxu0 %v6583_v61  ;;  %v6710_v61 = vld [vmem:[%s9869_s1 + $0x34c] ss:$16 sps:$4 sm:$0xff]  }
  0xcb   :  { %2731 = vmatmul.mubr.bf16.gmra.mxu1 %v6584_v0  ;;  %2547 = vmatprep.mubr.bf16.mxu0 %v6591_v1  ;;  %v6708_v0 = vld [vmem:[%s9869_s1 + $0x348] ss:$16 sps:$4 sm:$0xff]   ;;  %v6717_v1 = vld [vmem:[%s9869_s1 + $0x12c] ss:$16 sps:$4 sm:$0xff]  }
  0xcc   :  { %2740 = vmatprep.mubr.bf16.mxu1 %v9883_v51  ;;  %2886 = vmatpush1.bf16.msra.mxu0 %v6595_v2  ;;  %v6720_v2 = vld [vmem:[%s9869_s1 + $0x32c] ss:$16 sps:$4 sm:$0xff]  }
  0xcd   :  { %3079 = vmatpush1.bf16.msra.mxu1 %v6598_v3  ;;  %2887 = vmatprep.subr.bf16.mxu0 %v6607_v4  ;;  %v6643_v3 = vld [vmem:[%s9870_s0 + $0x198] ss:$28 sps:$4 sm:$0xff]   ;;  %v6644_v4 = vld [vmem:[%s9870_s0 + $0x1a0] ss:$28 sps:$4 sm:$0xff]  }
  0xce   :  { %3080 = vmatprep.subr.bf16.mxu1 %v6610_v5  ;;  %v6651_v5 = vld [vmem:[%s9870_s0 + $0x1d4] ss:$28 sps:$4 sm:$0xff]  }
  0xd0   :  { %2888 = vmatpush1.bf16.msra.mxu0 %v6605_v6  ;;  %v7890_v6 = vshrl.u32 %v393_v62, 7 }
  0xd1   :  { %3081 = vmatpush1.bf16.msra.mxu1 %v6608_v7  ;;  %2889 = vmatprep.subr.bf16.mxu0 %v6617_v11  ;;  %v6715_v7 = vld [vmem:[%s9869_s1 + $0x128] ss:$16 sps:$4 sm:$0xff]  }
  0xd2   :  { %3082 = vmatprep.subr.bf16.mxu1 %v6620_v12  ;;  %2548 = vmatmul.mubr.bf16.gmra.mxu0 %v6593_v8  ;;  %9888 = vst [vmem:[#allocation2_spill] sm:$0xff] %v7890_v6  ;;  %v6718_v8 = vld [vmem:[%s9869_s1 + $0x328] ss:$16 sps:$4 sm:$0xff]   ;;  %v9881_v11 = vsub.s32 0, %v7890_v6  ;;  %v391_v12 = vld [vmem:[%s9871_s2] sm:$0xf] }
  0xd3   :  { %2741 = vmatmul.mubr.bf16.gmra.mxu1 %v6594_v9  ;;  %2557 = vmatprep.mubr.bf16.mxu0 %v6601_v10  ;;  %v6727_v9 = vld [vmem:[%s9869_s1 + $0x10c] ss:$16 sps:$4 sm:$0xff]  }
  0xd4   :  { %2750 = vmatprep.mubr.bf16.mxu1 %v9883_v51  ;;  %2890 = vmatpush1.bf16.msra.mxu0 %v6615_v13  ;;  %v6730_v10 = vld [vmem:[%s9869_s1 + $0x30c] ss:$16 sps:$4 sm:$0xff]   ;;  %v6725_v13 = vld [vmem:[%s9869_s1 + $0x108] ss:$16 sps:$4 sm:$0xff]  }
  0xd5   :  { %3083 = vmatpush1.bf16.msra.mxu1 %v6618_v14  ;;  %2891 = vmatprep.subr.bf16.mxu0 %v6627_v15  ;;  %v6728_v14 = vld [vmem:[%s9869_s1 + $0x308] ss:$16 sps:$4 sm:$0xff]   ;;  %v9882_v15 = vsub.s32 1, %v7890_v6 }
  0xd6   :  { %3084 = vmatprep.subr.bf16.mxu1 %v6630_v16  ;;  %v6733_v16 = vld [vmem:[%s9869_s1 + $0x4ec] ss:$16 sps:$4 sm:$0xff]  }
  0xd8   :  { %2892 = vmatpush1.bf16.msra.mxu0 %v6625_v17  ;;  %v6736_v17 = vld [vmem:[%s9869_s1 + $0x6ec] ss:$16 sps:$4 sm:$0xff]  }
  0xd9   :  { %3085 = vmatpush1.bf16.msra.mxu1 %v6628_v18  ;;  %2893 = vmatprep.subr.bf16.mxu0 %v6637_v21  ;;  %v6653_v18 = vld [vmem:[%s9870_s0 + $0x1d0] ss:$28 sps:$4 sm:$0xff]  }
  0xda   :  { %3086 = vmatprep.subr.bf16.mxu1 %v6640_v22  ;;  %2558 = vmatmul.mubr.bf16.gmra.mxu0 %v6603_v19  ;;  %v6654_v19 = vld [vmem:[%s9870_s0 + $0x1d8] ss:$28 sps:$4 sm:$0xff]   ;;  %v6661_v21 = vld [vmem:[%s9870_s0 + $0x20c] ss:$28 sps:$4 sm:$0xff]   ;;  %v7937_v22 = vrot.slane %v391_v12, %v9882_v15 }
  0xdb   :  { %2751 = vmatmul.mubr.bf16.gmra.mxu1 %v6604_v20  ;;  %2567 = vmatprep.mubr.bf16.mxu0 %v6611_v23  ;;  %v7930_v20 = vrot.slane %v391_v12, %v9881_v11 }
  0xdc   :  { %2760 = vmatprep.mubr.bf16.mxu1 %v9883_v51  ;;  %2894 = vmatpush1.bf16.msra.mxu0 %v6635_v24 }
  0xdd   :  { %3087 = vmatpush1.bf16.msra.mxu1 %v6638_v25  ;;  %2895 = vmatprep.subr.bf16.mxu0 %v6647_v26 }
  0xde   :  { %3088 = vmatprep.subr.bf16.mxu1 %v6650_v27 }
  0xe0   :  { %2896 = vmatpush1.bf16.msra.mxu0 %v6645_v28 }
  0xe1   :  { %3089 = vmatpush1.bf16.msra.mxu1 %v6648_v29  ;;  %2897 = vmatprep.subr.bf16.mxu0 %v6657_v30 }
  0xe2   :  { %3090 = vmatprep.subr.bf16.mxu1 %v6660_v31  ;;  %2568 = vmatmul.mubr.bf16.gmra.mxu0 %v6613_v32  ;;  %v6663_v32 = vld [vmem:[%s9870_s0 + $0x208] ss:$28 sps:$4 sm:$0xff]  }
  0xe3   :  { %2761 = vmatmul.mubr.bf16.gmra.mxu1 %v6614_v33  ;;  %2577 = vmatprep.mubr.bf16.mxu0 %v6621_v34  ;;  %v6664_v33 = vld [vmem:[%s9870_s0 + $0x210] ss:$28 sps:$4 sm:$0xff]  }
  0xe4   :  { %2770 = vmatprep.mubr.bf16.mxu1 %v9883_v51  ;;  %2898 = vmatpush2.bf16.msra.mxu0 %v6655_v35 }
  0xe5   :  { %3091 = vmatpush2.bf16.msra.mxu1 %v6658_v36  ;;  %2899 = vmatprep.subr.bf16.mxu0 %v6667_v37  ;;  %v6671_v36 = vld [vmem:[%s9870_s0 + $0x244] ss:$28 sps:$4 sm:$0xff]  }
  0xe6   :  { %3092 = vmatprep.subr.bf16.mxu1 %v6670_v38 }
  0xe8   :  { %2900 = vmatpush2.bf16.msra.mxu0 %v6665_v39 }
  0xe9   :  { %3093 = vmatpush2.bf16.msra.mxu1 %v6668_v40  ;;  %2901 = vmatprep.subr.bf16.mxu0 %v6677_v41 }
  0xea   :  { %3094 = vmatprep.subr.bf16.mxu1 %v6680_v42  ;;  %2578 = vmatmul.mubr.bf16.gmra.mxu0 %v6623_v43 }
  0xeb   :  { %2771 = vmatmul.mubr.bf16.gmra.mxu1 %v6624_v44  ;;  %2587 = vmatprep.mubr.bf16.mxu0 %v6631_v45 }
  0xec   :  { %2780 = vmatprep.mubr.bf16.mxu1 %v9883_v51  ;;  %2902 = vmatpush2.bf16.msra.mxu0 %v6675_v46 }
  0xed   :  { %3095 = vmatpush2.bf16.msra.mxu1 %v6678_v47  ;;  %2903 = vmatprep.subr.bf16.mxu0 %v6687_v48 }
  0xee   :  { %3096 = vmatprep.subr.bf16.mxu1 %v6690_v49 }
  0xf0   :  { %2904 = vmatpush2.bf16.msra.mxu0 %v6685_v50 }
  0xf1   :  { %3097 = vmatpush2.bf16.msra.mxu1 %v6688_v52  ;;  %2905 = vmatprep.subr.bf16.mxu0 %v6697_v53  ;;  %v6673_v52 = vld [vmem:[%s9870_s0 + $0x240] ss:$28 sps:$4 sm:$0xff]   ;;  %v6674_v53 = vld [vmem:[%s9870_s0 + $0x248] ss:$28 sps:$4 sm:$0xff]  }
  0xf2   :  { %3098 = vmatprep.subr.bf16.mxu1 %v6700_v54  ;;  %2588 = vmatmul.mubr.bf16.gmra.mxu0 %v6633_v55 }
  0xf3   :  { %2781 = vmatmul.mubr.bf16.gmra.mxu1 %v6634_v56  ;;  %2597 = vmatprep.mubr.bf16.mxu0 %v6641_v57  ;;  %v6681_v56 = vld [vmem:[%s9870_s0 + $0x27c] ss:$28 sps:$4 sm:$0xff]  }
  0xf4   :  { %2790 = vmatprep.mubr.bf16.mxu1 %v9883_v51  ;;  %2906 = vmatpush2.bf16.msra.mxu0 %v6695_v58 }
  0xf5   :  { %3099 = vmatpush2.bf16.msra.mxu1 %v6698_v59  ;;  %2907 = vmatprep.subr.bf16.mxu0 %v6707_v60 }
  0xf6   :  { %3100 = vmatprep.subr.bf16.mxu1 %v6710_v61 }
  0xf8   :  { %2908 = vmatpush2.bf16.msra.mxu0 %v6705_v63 }
  0xf9   :  { %3101 = vmatpush2.bf16.msra.mxu1 %v6708_v0  ;;  %2909 = vmatprep.subr.bf16.mxu0 %v6717_v1 }
  0xfa   :  { %3102 = vmatprep.subr.bf16.mxu1 %v6720_v2  ;;  %2598 = vmatmul.mubr.bf16.gmra.mxu0 %v6643_v3 }
  0xfb   :  { %2791 = vmatmul.mubr.bf16.gmra.mxu1 %v6644_v4  ;;  %2607 = vmatprep.mubr.bf16.mxu0 %v6651_v5 }
  0xfc   :  { %2800 = vmatprep.mubr.bf16.mxu1 %v9883_v51  ;;  %2910 = vmatpush2.bf16.msra.mxu0 %v6715_v7 }
  0xfd   :  { %3103 = vmatpush2.bf16.msra.mxu1 %v6718_v8  ;;  %2911 = vmatprep.subr.bf16.mxu0 %v6727_v9  ;;  %v6683_v8 = vld [vmem:[%s9870_s0 + $0x278] ss:$28 sps:$4 sm:$0xff]   ;;  %v6684_v9 = vld [vmem:[%s9870_s0 + $0x280] ss:$28 sps:$4 sm:$0xff]  }
  0xfe   :  { %3104 = vmatprep.subr.bf16.mxu1 %v6730_v10 }
 0x100   :  { %2912 = vmatpush2.bf16.msra.mxu0 %v6725_v13  ;;  %v6693_v13 = vld [vmem:[%s9870_s0 + $0x2b4] ss:$28 sps:$4 sm:$0xff]  }
 0x101   :  { %3105 = vmatpush2.bf16.msra.mxu1 %v6728_v14  ;;  %3267 = vmatprep.subr.bf16.mxu0 %v6733_v16 }
 0x102   :  { %3460 = vmatprep.subr.bf16.mxu1 %v6736_v17  ;;  %v2143_v23 = vpop.f32.mrf.mxu0  ;;  %2608 = vmatmul.mubr.bf16.gmra.mxu0 %v6653_v18 }
 0x103   :  { %v2336_v24 = vpop.f32.mrf.mxu1  ;;  %2801 = vmatmul.mubr.bf16.gmra.mxu1 %v6654_v19  ;;  %v2144_v25 = vadd.f32 %v2143_v23, %v7930_v20  ;;  %2617 = vmatprep.mubr.bf16.mxu0 %v6661_v21 }
 0x104   :  { %2810 = vmatprep.mubr.bf16.mxu1 %v9883_v51  ;;  %v2145_v26 = vpop.f32.mrf.mxu0 }
 0x105   :  { %v2338_v27 = vpop.f32.mrf.mxu1  ;;  %v7941_v28 = vadd.f32 %v2336_v24, %v2144_v25  ;;  %v2146_v29 = vadd.f32 %v2145_v26, %v7937_v22 }
 0x106   :  { %v2147_v30 = vpop.f32.mrf.mxu0 }
 0x107   :  { %v2340_v31 = vpop.f32.mrf.mxu1  ;;  %v7950_v34 = vadd.f32 %v2338_v27, %v2146_v29  ;;  %v2148_v35 = vadd.f32 %v2147_v30, %v7930_v20 }
 0x108   :  { %v2149_v37 = vpop.f32.mrf.mxu0 }
 0x109   :  { %v2342_v38 = vpop.f32.mrf.mxu1  ;;  %v7956_v39 = vadd.f32 %v2340_v31, %v2148_v35  ;;  %v2150_v40 = vadd.f32 %v2149_v37, %v7937_v22  ;;  %v6703_v37 = vld [vmem:[%s9870_s0 + $0x2ec] ss:$28 sps:$4 sm:$0xff]  }
 0x10a   :  { %v2153_v41 = vpop.f32.mrf.mxu0  ;;  %2618 = vmatmul.mubr.bf16.gmra.mxu0 %v6663_v32  ;;  %v6691_v32 = vld [vmem:[%s9870_s0 + $0x2b0] ss:$28 sps:$4 sm:$0xff]  }
 0x10b   :  { %v2346_v42 = vpop.f32.mrf.mxu1  ;;  %2811 = vmatmul.mubr.bf16.gmra.mxu1 %v6664_v33  ;;  %v7959_v43 = vadd.f32 %v2342_v38, %v2150_v40  ;;  %v2154_v44 = vadd.f32 %v2153_v41, %v7930_v20  ;;  %2627 = vmatprep.mubr.bf16.mxu0 %v6671_v36  ;;  %v6694_v33 = vld [vmem:[%s9870_s0 + $0x2b8] ss:$28 sps:$4 sm:$0xff]  }
 0x10c   :  { %2820 = vmatprep.mubr.bf16.mxu1 %v9883_v51  ;;  %v2155_v45 = vpop.f32.mrf.mxu0 }
 0x10d   :  { %v2348_v46 = vpop.f32.mrf.mxu1  ;;  %v7963_v47 = vadd.f32 %v2346_v42, %v2154_v44  ;;  %v2156_v48 = vadd.f32 %v2155_v45, %v7937_v22 }
 0x10e   :  { %v2157_v49 = vpop.f32.mrf.mxu0 }
 0x10f   :  { %v2350_v50 = vpop.f32.mrf.mxu1  ;;  %v7972_v54 = vadd.f32 %v2348_v46, %v2156_v48  ;;  %v2158_v55 = vadd.f32 %v2157_v49, %v7930_v20 }
 0x110   :  { %v2159_v57 = vpop.f32.mrf.mxu0 }
 0x111   :  { %v2352_v58 = vpop.f32.mrf.mxu1  ;;  %v7978_v59 = vadd.f32 %v2350_v50, %v2158_v55  ;;  %v2160_v60 = vadd.f32 %v2159_v57, %v7937_v22  ;;  %v6701_v57 = vld [vmem:[%s9870_s0 + $0x2e8] ss:$28 sps:$4 sm:$0xff]  }
 0x112   :  { %v2163_v61 = vpop.f32.mrf.mxu0  ;;  %2628 = vmatmul.mubr.bf16.gmra.mxu0 %v6673_v52 }
 0x113   :  { %v2356_v62 = vpop.f32.mrf.mxu1  ;;  %2821 = vmatmul.mubr.bf16.gmra.mxu1 %v6674_v53  ;;  %v7981_v63 = vadd.f32 %v2352_v58, %v2160_v60  ;;  %v2164_v0 = vadd.f32 %v2163_v61, %v7930_v20  ;;  %2637 = vmatprep.mubr.bf16.mxu0 %v6681_v56  ;;  %v6704_v58 = vld [vmem:[%s9870_s0 + $0x2f0] ss:$28 sps:$4 sm:$0xff]  }
 0x114   :  { %2830 = vmatprep.mubr.bf16.mxu1 %v9883_v51  ;;  %v2165_v1 = vpop.f32.mrf.mxu0 }
 0x115   :  { %v2358_v2 = vpop.f32.mrf.mxu1  ;;  %v7985_v3 = vadd.f32 %v2356_v62, %v2164_v0  ;;  %v2166_v4 = vadd.f32 %v2165_v1, %v7937_v22  ;;  %v6713_v62 = vld [vmem:[%s9870_s0 + $0x324] ss:$28 sps:$4 sm:$0xff]  }
 0x116   :  { %v2167_v5 = vpop.f32.mrf.mxu0 }
 0x117   :  { %v2360_v7 = vpop.f32.mrf.mxu1  ;;  %v7994_v10 = vadd.f32 %v2358_v2, %v2166_v4  ;;  %v2168_v12 = vadd.f32 %v2167_v5, %v7930_v20 }
 0x118   :  { %v2169_v14 = vpop.f32.mrf.mxu0 }
 0x119   :  { %v2362_v16 = vpop.f32.mrf.mxu1  ;;  %v8000_v17 = vadd.f32 %v2360_v7, %v2168_v12  ;;  %v2170_v18 = vadd.f32 %v2169_v14, %v7937_v22 }
 0x11a   :  { %v2173_v19 = vpop.f32.mrf.mxu0  ;;  %2638 = vmatmul.mubr.bf16.gmra.mxu0 %v6683_v8 }
 0x11b   :  { %v2366_v21 = vpop.f32.mrf.mxu1  ;;  %2831 = vmatmul.mubr.bf16.gmra.mxu1 %v6684_v9  ;;  %v8003_v23 = vadd.f32 %v2362_v16, %v2170_v18  ;;  %v2174_v24 = vadd.f32 %v2173_v19, %v7930_v20  ;;  %2647 = vmatprep.mubr.bf16.mxu0 %v6693_v13 }
 0x11c   :  { %2840 = vmatprep.mubr.bf16.mxu1 %v9883_v51  ;;  %v2175_v25 = vpop.f32.mrf.mxu0 }
 0x11d   :  { %v2368_v26 = vpop.f32.mrf.mxu1  ;;  %v8007_v27 = vadd.f32 %v2366_v21, %v2174_v24  ;;  %v2176_v29 = vadd.f32 %v2175_v25, %v7937_v22  ;;  %v6711_v21 = vld [vmem:[%s9870_s0 + $0x320] ss:$28 sps:$4 sm:$0xff]   ;;  %v6714_v24 = vld [vmem:[%s9870_s0 + $0x328] ss:$28 sps:$4 sm:$0xff]  }
 0x11e   :  { %v2177_v30 = vpop.f32.mrf.mxu0 }
 0x11f   :  { %v2370_v31 = vpop.f32.mrf.mxu1  ;;  %v8016_v35 = vadd.f32 %v2368_v26, %v2176_v29  ;;  %v2178_v36 = vadd.f32 %v2177_v30, %v7930_v20  ;;  %v6723_v29 = vld [vmem:[%s9870_s0 + $0x35c] ss:$28 sps:$4 sm:$0xff]  }
 0x120   :  { %v2179_v38 = vpop.f32.mrf.mxu0 }
 0x121   :  { %v2372_v40 = vpop.f32.mrf.mxu1  ;;  %v8022_v41 = vadd.f32 %v2370_v31, %v2178_v36  ;;  %v2180_v42 = vadd.f32 %v2179_v38, %v7937_v22 }
 0x122   :  { %v2183_v44 = vpop.f32.mrf.mxu0  ;;  %2648 = vmatmul.mubr.bf16.gmra.mxu0 %v6691_v32 }
 0x123   :  { %v2376_v45 = vpop.f32.mrf.mxu1  ;;  %2841 = vmatmul.mubr.bf16.gmra.mxu1 %v6694_v33  ;;  %v8025_v46 = vadd.f32 %v2372_v40, %v2180_v42  ;;  %v2184_v48 = vadd.f32 %v2183_v44, %v7930_v20  ;;  %2657 = vmatprep.mubr.bf16.mxu0 %v6703_v37 }
 0x124   :  { %2850 = vmatprep.mubr.bf16.mxu1 %v9883_v51  ;;  %v2185_v49 = vpop.f32.mrf.mxu0 }
 0x125   :  { %v2378_v50 = vpop.f32.mrf.mxu1  ;;  %v8029_v52 = vadd.f32 %v2376_v45, %v2184_v48  ;;  %v2186_v53 = vadd.f32 %v2185_v49, %v7937_v22 }
 0x126   :  { %v2187_v55 = vpop.f32.mrf.mxu0 }
 0x127   :  { %v2380_v56 = vpop.f32.mrf.mxu1  ;;  %v8038_v60 = vadd.f32 %v2378_v50, %v2186_v53  ;;  %v2188_v61 = vadd.f32 %v2187_v55, %v7930_v20  ;;  %v6721_v53 = vld [vmem:[%s9870_s0 + $0x358] ss:$28 sps:$4 sm:$0xff]   ;;  %v6724_v55 = vld [vmem:[%s9870_s0 + $0x360] ss:$28 sps:$4 sm:$0xff]  }
 0x128   :  { %v2189_v0 = vpop.f32.mrf.mxu0 }
 0x129   :  { %v2382_v1 = vpop.f32.mrf.mxu1  ;;  %v8044_v2 = vadd.f32 %v2380_v56, %v2188_v61  ;;  %v2190_v4 = vadd.f32 %v2189_v0, %v7937_v22 }
 0x12a   :  { %v2193_v5 = vpop.f32.mrf.mxu0  ;;  %2658 = vmatmul.mubr.bf16.gmra.mxu0 %v6701_v57 }
 0x12b   :  { %v2386_v7 = vpop.f32.mrf.mxu1  ;;  %2851 = vmatmul.mubr.bf16.gmra.mxu1 %v6704_v58  ;;  %v8047_v8 = vadd.f32 %v2382_v1, %v2190_v4  ;;  %v2194_v9 = vadd.f32 %v2193_v5, %v7930_v20  ;;  %2667 = vmatprep.mubr.bf16.mxu0 %v6713_v62 }
 0x12c   :  { %2860 = vmatprep.mubr.bf16.mxu1 %v9883_v51  ;;  %v2195_v12 = vpop.f32.mrf.mxu0 }
 0x12d   :  { %v2388_v13 = vpop.f32.mrf.mxu1  ;;  %v8051_v14 = vadd.f32 %v2386_v7, %v2194_v9  ;;  %v2196_v16 = vadd.f32 %v2195_v12, %v7937_v22  ;;  %v6931_v9 = vld [vmem:[%s9870_s0 + $0x4] ss:$28 sps:$4 sm:$0xff]   ;;  %v6932_v12 = vld [vmem:[%s9870_s0 + $0xc] ss:$28 sps:$4 sm:$0xff]  }
 0x12e   :  { %v2197_v18 = vpop.f32.mrf.mxu0 }
 0x12f   :  { %v2390_v19 = vpop.f32.mrf.mxu1  ;;  %v8060_v25 = vadd.f32 %v2388_v13, %v2196_v16  ;;  %v2198_v26 = vadd.f32 %v2197_v18, %v7930_v20 }
 0x130   :  { %v2199_v30 = vpop.f32.mrf.mxu0 }
 0x131   :  { %v2392_v31 = vpop.f32.mrf.mxu1  ;;  %v8066_v32 = vadd.f32 %v2390_v19, %v2198_v26  ;;  %v2200_v33 = vadd.f32 %v2199_v30, %v7937_v22  ;;  %v6731_v30 = vld [vmem:[%s9869_s1 + $0x4e8] ss:$16 sps:$4 sm:$0xff]  }
 0x132   :  { %v2203_v36 = vpop.f32.mrf.mxu0  ;;  %2668 = vmatmul.mubr.bf16.gmra.mxu0 %v6711_v21 }
 0x133   :  { %v2396_v37 = vpop.f32.mrf.mxu1  ;;  %2861 = vmatmul.mubr.bf16.gmra.mxu1 %v6714_v24  ;;  %v8069_v38 = vadd.f32 %v2392_v31, %v2200_v33  ;;  %v2204_v40 = vadd.f32 %v2203_v36, %v7930_v20  ;;  %2677 = vmatprep.mubr.bf16.mxu0 %v6723_v29  ;;  %v6734_v31 = vld [vmem:[%s9869_s1 + $0x6e8] ss:$16 sps:$4 sm:$0xff]  }
 0x134   :  { %2870 = vmatprep.mubr.bf16.mxu1 %v9883_v51  ;;  %v2205_v42 = vpop.f32.mrf.mxu0 }
 0x135   :  { %v2398_v44 = vpop.f32.mrf.mxu1  ;;  %v8073_v45 = vadd.f32 %v2396_v37, %v2204_v40  ;;  %v2206_v48 = vadd.f32 %v2205_v42, %v7937_v22  ;;  %v6739_v42 = vld [vmem:[%s9869_s1 + $0x4cc] ss:$16 sps:$4 sm:$0xff]  }
 0x136   :  { %v2207_v49 = vpop.f32.mrf.mxu0 }
 0x137   :  { %v2400_v50 = vpop.f32.mrf.mxu1  ;;  %v8082_v56 = vadd.f32 %v2398_v44, %v2206_v48  ;;  %v2208_v57 = vadd.f32 %v2207_v49, %v7930_v20  ;;  %v6745_v44 = vld [vmem:[%s9869_s1 + $0x6cc] ss:$16 sps:$4 sm:$0xff]  }
 0x138   :  { %v2209_v58 = vpop.f32.mrf.mxu0 }
 0x139   :  { %v2402_v61 = vpop.f32.mrf.mxu1  ;;  %v8085_v62 = vadd.f32 %v2400_v50, %v2208_v57  ;;  %v2210_v0 = vadd.f32 %v2209_v58, %v7937_v22  ;;  %v6933_v50 = vld [vmem:[%s9870_s0] ss:$28 sps:$4 sm:$0xff]   ;;  %v6737_v58 = vld [vmem:[%s9869_s1 + $0x4c8] ss:$16 sps:$4 sm:$0xff]  }
 0x13a   :  { %v2213_v1 = vpop.f32.mrf.mxu0  ;;  %2678 = vmatmul.mubr.bf16.gmra.mxu0 %v6721_v53  ;;  %v6934_v53 = vld [vmem:[%s9870_s0 + $0x8] ss:$28 sps:$4 sm:$0xff]  }
 0x13b   :  { %v2406_v4 = vpop.f32.mrf.mxu1  ;;  %2871 = vmatmul.mubr.bf16.gmra.mxu1 %v6724_v55  ;;  %v8088_v5 = vadd.f32 %v2402_v61, %v2210_v0  ;;  %v2214_v7 = vadd.f32 %v2213_v1, %v7930_v20  ;;  %2913 = vmatprep.mubr.bf16.mxu0 %v6931_v9  ;;  %v6743_v61 = vld [vmem:[%s9869_s1 + $0x6c8] ss:$16 sps:$4 sm:$0xff]   ;;  %v6742_v9 = vld [vmem:[%s9869_s1 + $0x4ac] ss:$16 sps:$4 sm:$0xff]  }
 0x13c   :  { %3106 = vmatprep.mubr.bf16.mxu1 %v6932_v12  ;;  %v2215_v13 = vpop.f32.mrf.mxu0  ;;  %v6754_v12 = vld [vmem:[%s9869_s1 + $0x6ac] ss:$16 sps:$4 sm:$0xff]  }
 0x13d   :  { %v2408_v16 = vpop.f32.mrf.mxu1  ;;  %v8097_v18 = vadd.f32 %v2406_v4, %v2214_v7  ;;  %v2216_v19 = vadd.f32 %v2215_v13, %v7937_v22  ;;  %v6935_v4 = vld [vmem:[%s9870_s0 + $0x3c] ss:$28 sps:$4 sm:$0xff]   ;;  %v6936_v7 = vld [vmem:[%s9870_s0 + $0x44] ss:$28 sps:$4 sm:$0xff]  }
 0x13e   :  { %v2217_v21 = vpop.f32.mrf.mxu0 }
 0x13f   :  { %v2410_v24 = vpop.f32.mrf.mxu1  ;;  %v8100_v26 = vadd.f32 %v2408_v16, %v2216_v19  ;;  %v2218_v29 = vadd.f32 %v2217_v21, %v7930_v20 }
 0x140   :  { %v2219_v33 = vpop.f32.mrf.mxu0 }
 0x141   :  { %v2412_v36 = vpop.f32.mrf.mxu1  ;;  %v8109_v37 = vadd.f32 %v2410_v24, %v2218_v29  ;;  %v2220_v40 = vadd.f32 %v2219_v33, %v7937_v22  ;;  %v6740_v33 = vld [vmem:[%s9869_s1 + $0x4a8] ss:$16 sps:$4 sm:$0xff]  }
 0x142   :  { %v2223_v48 = vpop.f32.mrf.mxu0  ;;  %2914 = vmatmul.mubr.bf16.vlgmr.msra.gmra.mxu0 %v6933_v50 }
 0x143   :  { %v2416_v49 = vpop.f32.mrf.mxu1  ;;  %3107 = vmatmul.mubr.bf16.vlgmr.msra.gmra.mxu1 %v6934_v53  ;;  %v8124_v55 = vadd.f32 %v2412_v36, %v2220_v40  ;;  %v2224_v57 = vadd.f32 %v2223_v48, %v7930_v20  ;;  %3268 = vmatpush1.bf16.msra.mxu0 %v6731_v30  ;;  %v6752_v36 = vld [vmem:[%s9869_s1 + $0x6a8] ss:$16 sps:$4 sm:$0xff]   ;;  %v6763_v48 = vld [vmem:[%s9869_s1 + $0x68c] ss:$16 sps:$4 sm:$0xff]  }
 0x144   :  { %3461 = vmatpush1.bf16.msra.mxu1 %v6734_v31  ;;  %v2225_v0 = vpop.f32.mrf.mxu0  ;;  %2923 = vmatprep.mubr.bf16.mxu0 %v6935_v4  ;;  %v6937_v53 = vld [vmem:[%s9870_s0 + $0x38] ss:$28 sps:$4 sm:$0xff]  }
 0x145   :  { %v2418_v1 = vpop.f32.mrf.mxu1  ;;  %3116 = vmatprep.mubr.bf16.mxu1 %v6936_v7  ;;  %v8145_v13 = vadd.f32 %v2416_v49, %v2224_v57  ;;  %v2226_v16 = vadd.f32 %v2225_v0, %v7937_v22  ;;  %3269 = vmatprep.subr.bf16.mxu0 %v6739_v42  ;;  %v6938_v57 = vld [vmem:[%s9870_s0 + $0x40] ss:$28 sps:$4 sm:$0xff]   ;;  %v6939_v0 = vld [vmem:[%s9870_s0 + $0x74] ss:$28 sps:$4 sm:$0xff]  }
 0x146   :  { %3462 = vmatprep.subr.bf16.mxu1 %v6745_v44  ;;  %v2227_v19 = vpop.f32.mrf.mxu0  ;;  %v6748_v44 = vld [vmem:[%s9869_s1 + $0x48c] ss:$16 sps:$4 sm:$0xff]  }
 0x147   :  { %v2420_v21 = vpop.f32.mrf.mxu1  ;;  %v8148_v24 = vadd.f32 %v2418_v1, %v2226_v16  ;;  %v2228_v29 = vadd.f32 %v2227_v19, %v7930_v20  ;;  %3270 = vmatpush1.bf16.msra.mxu0 %v6737_v58  ;;  %v6940_v1 = vld [vmem:[%s9870_s0 + $0x7c] ss:$28 sps:$4 sm:$0xff]  }
 0x148   :  { %3463 = vmatpush1.bf16.msra.mxu1 %v6743_v61  ;;  %v2229_v30 = vpop.f32.mrf.mxu0  ;;  %3271 = vmatprep.subr.bf16.mxu0 %v6742_v9  ;;  %v6746_v9 = vld [vmem:[%s9869_s1 + $0x488] ss:$16 sps:$4 sm:$0xff]  }
 0x149   :  { %v2422_v31 = vpop.f32.mrf.mxu1  ;;  %3464 = vmatprep.subr.bf16.mxu1 %v6754_v12  ;;  %v8157_v40 = vadd.f32 %v2420_v21, %v2228_v29  ;;  %v2230_v42 = vadd.f32 %v2229_v30, %v7937_v22  ;;  %v6761_v12 = vld [vmem:[%s9869_s1 + $0x688] ss:$16 sps:$4 sm:$0xff]   ;;  %v6751_v21 = vld [vmem:[%s9869_s1 + $0x46c] ss:$16 sps:$4 sm:$0xff]  }
 0x14a   :  { %v2233_v49 = vpop.f32.mrf.mxu0  ;;  %2924 = vmatmul.mubr.bf16.gmra.mxu0 %v6937_v53  ;;  %v6772_v29 = vld [vmem:[%s9869_s1 + $0x66c] ss:$16 sps:$4 sm:$0xff]  }
 0x14b   :  { %v2426_v50 = vpop.f32.mrf.mxu1  ;;  %3117 = vmatmul.mubr.bf16.gmra.mxu1 %v6938_v57  ;;  %v8172_v58 = vadd.f32 %v2422_v31, %v2230_v42  ;;  %v2234_v61 = vadd.f32 %v2233_v49, %v7930_v20  ;;  %2933 = vmatprep.mubr.bf16.mxu0 %v6939_v0  ;;  %v6757_v57 = vld [vmem:[%s9869_s1 + $0x44c] ss:$16 sps:$4 sm:$0xff]  }
 0x14c   :  { %3126 = vmatprep.mubr.bf16.mxu1 %v6940_v1  ;;  %v2235_v4 = vpop.f32.mrf.mxu0  ;;  %3272 = vmatpush1.bf16.msra.mxu0 %v6740_v33 }
 0x14d   :  { %v2428_v7 = vpop.f32.mrf.mxu1  ;;  %3465 = vmatpush1.bf16.msra.mxu1 %v6752_v36  ;;  %v8187_v16 = vadd.f32 %v2426_v50, %v2234_v61  ;;  %v2236_v19 = vadd.f32 %v2235_v4, %v7937_v22  ;;  %3273 = vmatprep.subr.bf16.mxu0 %v6748_v44  ;;  %v6749_v44 = vld [vmem:[%s9869_s1 + $0x468] ss:$16 sps:$4 sm:$0xff]   ;;  %v6781_v61 = vld [vmem:[%s9869_s1 + $0x64c] ss:$16 sps:$4 sm:$0xff]  }
 0x14e   :  { %3466 = vmatprep.subr.bf16.mxu1 %v6763_v48  ;;  %v2237_v30 = vpop.f32.mrf.mxu0  ;;  %v6770_v48 = vld [vmem:[%s9869_s1 + $0x668] ss:$16 sps:$4 sm:$0xff]   ;;  %v6941_v4 = vld [vmem:[%s9870_s0 + $0x70] ss:$28 sps:$4 sm:$0xff]  }
 0x14f   :  { %v2430_v31 = vpop.f32.mrf.mxu1  ;;  %v8196_v33 = vadd.f32 %v2428_v7, %v2236_v19  ;;  %v2238_v36 = vadd.f32 %v2237_v30, %v7930_v20  ;;  %v6942_v7 = vld [vmem:[%s9870_s0 + $0x78] ss:$28 sps:$4 sm:$0xff]   ;;  %v6943_v19 = vld [vmem:[%s9870_s0 + $0xac] ss:$28 sps:$4 sm:$0xff]  }
 0x150   :  { %v2239_v42 = vpop.f32.mrf.mxu0  ;;  %3274 = vmatpush1.bf16.msra.mxu0 %v6746_v9 }
 0x151   :  { %v2432_v49 = vpop.f32.mrf.mxu1  ;;  %3467 = vmatpush1.bf16.msra.mxu1 %v6761_v12  ;;  %v8205_v50 = vadd.f32 %v2430_v31, %v2238_v36  ;;  %v2240_v53 = vadd.f32 %v2239_v42, %v7937_v22  ;;  %3275 = vmatprep.subr.bf16.mxu0 %v6751_v21  ;;  %v6944_v21 = vld [vmem:[%s9870_s0 + $0xb4] ss:$28 sps:$4 sm:$0xff]   ;;  %v6755_v31 = vld [vmem:[%s9869_s1 + $0x448] ss:$16 sps:$4 sm:$0xff]  }
 0x152   :  { %3468 = vmatprep.subr.bf16.mxu1 %v6772_v29  ;;  %v2243_v0 = vpop.f32.mrf.mxu0  ;;  %2934 = vmatmul.mubr.bf16.gmra.mxu0 %v6941_v4  ;;  %v6779_v36 = vld [vmem:[%s9869_s1 + $0x648] ss:$16 sps:$4 sm:$0xff]  }
 0x153   :  { %v2436_v1 = vpop.f32.mrf.mxu1  ;;  %3127 = vmatmul.mubr.bf16.gmra.mxu1 %v6942_v7  ;;  %v8220_v9 = vadd.f32 %v2432_v49, %v2240_v53  ;;  %v2244_v12 = vadd.f32 %v2243_v0, %v7930_v20  ;;  %2943 = vmatprep.mubr.bf16.mxu0 %v6943_v19  ;;  %v6760_v53 = vld [vmem:[%s9869_s1 + $0x42c] ss:$16 sps:$4 sm:$0xff]  }
 0x154   :  { %3136 = vmatprep.mubr.bf16.mxu1 %v6944_v21  ;;  %v2245_v29 = vpop.f32.mrf.mxu0  ;;  %3276 = vmatpush1.bf16.msra.mxu0 %v6749_v44  ;;  %v6790_v44 = vld [vmem:[%s9869_s1 + $0x62c] ss:$16 sps:$4 sm:$0xff]  }
 0x155   :  { %v2438_v30 = vpop.f32.mrf.mxu1  ;;  %3469 = vmatpush1.bf16.msra.mxu1 %v6770_v48  ;;  %v8235_v42 = vadd.f32 %v2436_v1, %v2244_v12  ;;  %v2246_v49 = vadd.f32 %v2245_v29, %v7937_v22  ;;  %3277 = vmatprep.subr.bf16.mxu0 %v6757_v57  ;;  %v6758_v57 = vld [vmem:[%s9869_s1 + $0x428] ss:$16 sps:$4 sm:$0xff]   ;;  %v6766_v29 = vld [vmem:[%s9869_s1 + $0x40c] ss:$16 sps:$4 sm:$0xff]  }
 0x156   :  { %3470 = vmatprep.subr.bf16.mxu1 %v6781_v61  ;;  %v2247_v0 = vpop.f32.mrf.mxu0  ;;  %v6788_v61 = vld [vmem:[%s9869_s1 + $0x628] ss:$16 sps:$4 sm:$0xff]  }
 0x157   :  { %v2440_v48 = vpop.f32.mrf.mxu1  ;;  %v8244_v4 = vadd.f32 %v2438_v30, %v2246_v49  ;;  %v2248_v7 = vadd.f32 %v2247_v0, %v7930_v20  ;;  %v6799_v30 = vld [vmem:[%s9869_s1 + $0x60c] ss:$16 sps:$4 sm:$0xff]   ;;  %v6945_v49 = vld [vmem:[%s9870_s0 + $0xa8] ss:$28 sps:$4 sm:$0xff]  }
 0x158   :  { %v2249_v1 = vpop.f32.mrf.mxu0  ;;  %3278 = vmatpush1.bf16.msra.mxu0 %v6755_v31 }
 0x159   :  { %v2442_v12 = vpop.f32.mrf.mxu1  ;;  %3471 = vmatpush1.bf16.msra.mxu1 %v6779_v36  ;;  %v8253_v19 = vadd.f32 %v2440_v48, %v2248_v7  ;;  %v2250_v21 = vadd.f32 %v2249_v1, %v7937_v22  ;;  %3279 = vmatprep.subr.bf16.mxu0 %v6760_v53  ;;  %v6946_v53 = vld [vmem:[%s9870_s0 + $0xb0] ss:$28 sps:$4 sm:$0xff]   ;;  %v6947_v48 = vld [vmem:[%s9870_s0 + $0xe4] ss:$28 sps:$4 sm:$0xff]  }
 0x15a   :  { %3472 = vmatprep.subr.bf16.mxu1 %v6790_v44  ;;  %v2253_v31 = vpop.f32.mrf.mxu0  ;;  %2944 = vmatmul.mubr.bf16.gmra.mxu0 %v6945_v49  ;;  %v6948_v7 = vld [vmem:[%s9870_s0 + $0xec] ss:$28 sps:$4 sm:$0xff]  }
 0x15b   :  { %v2446_v36 = vpop.f32.mrf.mxu1  ;;  %3137 = vmatmul.mubr.bf16.gmra.mxu1 %v6946_v53  ;;  %v8268_v0 = vadd.f32 %v2442_v12, %v2250_v21  ;;  %v2254_v44 = vadd.f32 %v2253_v31, %v7930_v20  ;;  %2953 = vmatprep.mubr.bf16.mxu0 %v6947_v48  ;;  %v6764_v12 = vld [vmem:[%s9869_s1 + $0x408] ss:$16 sps:$4 sm:$0xff]   ;;  %v6769_v48 = vld [vmem:[%s9869_s1 + $0x5ec] ss:$16 sps:$4 sm:$0xff]  }
 0x15c   :  { %3146 = vmatprep.mubr.bf16.mxu1 %v6948_v7  ;;  %v2255_v1 = vpop.f32.mrf.mxu0  ;;  %3280 = vmatpush1.bf16.msra.mxu0 %v6758_v57  ;;  %v6797_v21 = vld [vmem:[%s9869_s1 + $0x608] ss:$16 sps:$4 sm:$0xff]  }
 0x15d   :  { %v2448_v49 = vpop.f32.mrf.mxu1  ;;  %3473 = vmatpush1.bf16.msra.mxu1 %v6788_v61  ;;  %v8283_v31 = vadd.f32 %v2446_v36, %v2254_v44  ;;  %v2256_v53 = vadd.f32 %v2255_v1, %v7937_v22  ;;  %3281 = vmatprep.subr.bf16.mxu0 %v6766_v29  ;;  %v6767_v36 = vld [vmem:[%s9869_s1 + $0x5e8] ss:$16 sps:$4 sm:$0xff]  }
 0x15e   :  { %3474 = vmatprep.subr.bf16.mxu1 %v6799_v30  ;;  %v2257_v57 = vpop.f32.mrf.mxu0  ;;  %v6775_v30 = vld [vmem:[%s9869_s1 + $0x5cc] ss:$16 sps:$4 sm:$0xff]  }
 0x15f   :  { %v2450_v7 = vpop.f32.mrf.mxu1  ;;  %v8289_v11 = vadd.f32 %v2448_v49, %v2256_v53  ;;  %v2258_v61 = vadd.f32 %v2257_v57, %v7930_v20  ;;  %v6952_v57 = vld [vmem:[%s9870_s0 + $0x124] ss:$28 sps:$4 sm:$0xff]  }
 0x160   :  { %v2259_v15 = vpop.f32.mrf.mxu0  ;;  %3282 = vmatpush1.bf16.msra.mxu0 %v6764_v12  ;;  %v6949_v12 = vld [vmem:[%s9870_s0 + $0xe0] ss:$28 sps:$4 sm:$0xff]  }
 0x161   :  { %v2452_v51 = vpop.f32.mrf.mxu1  ;;  %3475 = vmatpush1.bf16.msra.mxu1 %v6797_v21  ;;  %v8295_v29 = vadd.f32 %v2450_v7, %v2258_v61  ;;  %v2260_v44 = vadd.f32 %v2259_v15, %v7937_v22  ;;  %3283 = vmatprep.subr.bf16.mxu0 %v6769_v48  ;;  %v6950_v21 = vld [vmem:[%s9870_s0 + $0xe8] ss:$28 sps:$4 sm:$0xff]   ;;  %v6951_v48 = vld [vmem:[%s9870_s0 + $0x11c] ss:$28 sps:$4 sm:$0xff]  }
 0x162   :  { %v2263_v1 = vpop.f32.mrf.mxu0  ;;  %2954 = vmatmul.mubr.bf16.gmra.mxu0 %v6949_v12  ;;  %v6778_v12 = vld [vmem:[%s9869_s1 + $0x5ac] ss:$16 sps:$4 sm:$0xff]  }
 0x163   :  { %9889 = vst [vmem:[#allocation3_spill] sm:$0xff] %v8295_v29  ;;  %v2456_v49 = vpop.f32.mrf.mxu1  ;;  %3147 = vmatmul.mubr.bf16.gmra.mxu1 %v6950_v21  ;;  %v8307_v53 = vadd.f32 %v2452_v51, %v2260_v44  ;;  %v2264_v15 = vadd.f32 %v2263_v1, %v7930_v20  ;;  %2963 = vmatprep.mubr.bf16.mxu0 %v6951_v48  ;;  %v6773_v51 = vld [vmem:[%s9869_s1 + $0x5c8] ss:$16 sps:$4 sm:$0xff]  }
 0x164   :  { %3156 = vmatprep.mubr.bf16.mxu1 %v6952_v57  ;;  %v2265_v7 = vpop.f32.mrf.mxu0  ;;  %3284 = vmatpush2.bf16.msra.mxu0 %v6767_v36 }
 0x165   :  { %9890 = vst [vmem:[#allocation4_spill] sm:$0xff] %v8307_v53  ;;  %v2458_v61 = vpop.f32.mrf.mxu1  ;;  %v8319_v44 = vadd.f32 %v2456_v49, %v2264_v15  ;;  %v2266_v1 = vadd.f32 %v2265_v7, %v7937_v22  ;;  %3285 = vmatprep.subr.bf16.mxu0 %v6775_v30  ;;  %v6776_v49 = vld [vmem:[%s9869_s1 + $0x5a8] ss:$16 sps:$4 sm:$0xff]   ;;  %v6784_v7 = vld [vmem:[%s9869_s1 + $0x58c] ss:$16 sps:$4 sm:$0xff]  }
 0x166   :  { %v2267_v21 = vpop.f32.mrf.mxu0 }
 0x167   :  { %9891 = vst [vmem:[#allocation5_spill] sm:$0xff] %v8319_v44  ;;  %v2460_v48 = vpop.f32.mrf.mxu1  ;;  %v8325_v6 = vadd.f32 %v2458_v61, %v2266_v1  ;;  %v2268_v57 = vadd.f32 %v2267_v21, %v7930_v20  ;;  %v6953_v21 = vld [vmem:[%s9870_s0 + $0x118] ss:$28 sps:$4 sm:$0xff]  }
 0x168   :  { %v2269_v36 = vpop.f32.mrf.mxu0  ;;  %3286 = vmatpush2.bf16.msra.mxu0 %v6773_v51  ;;  %v6954_v51 = vld [vmem:[%s9870_s0 + $0x120] ss:$28 sps:$4 sm:$0xff]  }
 0x169   :  { %9892 = vst [vmem:[#allocation6_spill] sm:$0xff] %v8325_v6  ;;  %v2462_v53 = vpop.f32.mrf.mxu1  ;;  %v8331_v15 = vadd.f32 %v2460_v48, %v2268_v57  ;;  %v2270_v30 = vadd.f32 %v2269_v36, %v7937_v22  ;;  %3287 = vmatprep.subr.bf16.mxu0 %v6778_v12  ;;  %v6955_v57 = vld [vmem:[%s9870_s0 + $0x154] ss:$28 sps:$4 sm:$0xff]   ;;  %v6956_v36 = vld [vmem:[%s9870_s0 + $0x15c] ss:$28 sps:$4 sm:$0xff]  }
 0x16a   :  { %v2273_v61 = vpop.f32.mrf.mxu0  ;;  %2964 = vmatmul.mubr.bf16.gmra.mxu0 %v6953_v21 }
 0x16b   :  { %9893 = vst [vmem:[#allocation7_spill] sm:$0xff] %v8331_v15  ;;  %v2466_v1 = vpop.f32.mrf.mxu1  ;;  %3157 = vmatmul.mubr.bf16.gmra.mxu1 %v6954_v51  ;;  %v8343_v48 = vadd.f32 %v2462_v53, %v2270_v30  ;;  %v2274_v12 = vadd.f32 %v2273_v61, %v7930_v20  ;;  %2973 = vmatprep.mubr.bf16.mxu0 %v6955_v57  ;;  %v6782_v53 = vld [vmem:[%s9869_s1 + $0x588] ss:$16 sps:$4 sm:$0xff]   ;;  %v6787_v51 = vld [vmem:[%s9869_s1 + $0x56c] ss:$16 sps:$4 sm:$0xff]  }
 0x16c   :  { %3166 = vmatprep.mubr.bf16.mxu1 %v6956_v36  ;;  %v2275_v21 = vpop.f32.mrf.mxu0  ;;  %3288 = vmatpush2.bf16.msra.mxu0 %v6776_v49 }
 0x16d   :  { %9894 = vst [vmem:[#allocation8_spill] sm:$0xff] %v8343_v48  ;;  %v2468_v15 = vpop.f32.mrf.mxu1  ;;  %v8355_v30 = vadd.f32 %v2466_v1, %v2274_v12  ;;  %v2276_v61 = vadd.f32 %v2275_v21, %v7937_v22  ;;  %3289 = vmatprep.subr.bf16.mxu0 %v6784_v7  ;;  %v6785_v1 = vld [vmem:[%s9869_s1 + $0x568] ss:$16 sps:$4 sm:$0xff]   ;;  %v6793_v21 = vld [vmem:[%s9869_s1 + $0x54c] ss:$16 sps:$4 sm:$0xff]  }
 0x16e   :  { %v2277_v57 = vpop.f32.mrf.mxu0 }
 0x16f   :  { %9895 = vst [vmem:[#allocation9_spill] sm:$0xff] %v8355_v30  ;;  %v2470_v48 = vpop.f32.mrf.mxu1  ;;  %v8361_v6 = vadd.f32 %v2468_v15, %v2276_v61  ;;  %v2278_v36 = vadd.f32 %v2277_v57, %v7930_v20  ;;  %v6957_v57 = vld [vmem:[%s9870_s0 + $0x150] ss:$28 sps:$4 sm:$0xff]  }
 0x170   :  { %v2279_v49 = vpop.f32.mrf.mxu0  ;;  %3290 = vmatpush2.bf16.msra.mxu0 %v6782_v53  ;;  %v6958_v53 = vld [vmem:[%s9870_s0 + $0x158] ss:$28 sps:$4 sm:$0xff]  }
 0x171   :  { %9896 = vst [vmem:[#allocation10_spill] sm:$0xff] %v8361_v6  ;;  %v2472_v44 = vpop.f32.mrf.mxu1  ;;  %v8367_v12 = vadd.f32 %v2470_v48, %v2278_v36  ;;  %v2280_v7 = vadd.f32 %v2279_v49, %v7937_v22  ;;  %3291 = vmatprep.subr.bf16.mxu0 %v6787_v51  ;;  %v6959_v36 = vld [vmem:[%s9870_s0 + $0x18c] ss:$28 sps:$4 sm:$0xff]   ;;  %v6960_v49 = vld [vmem:[%s9870_s0 + $0x194] ss:$28 sps:$4 sm:$0xff]  }
 0x172   :  { %v2283_v15 = vpop.f32.mrf.mxu0  ;;  %2974 = vmatmul.mubr.bf16.gmra.mxu0 %v6957_v57 }
 0x173   :  { %9897 = vst [vmem:[#allocation11_spill] sm:$0xff] %v8367_v12  ;;  %v2476_v61 = vpop.f32.mrf.mxu1  ;;  %3167 = vmatmul.mubr.bf16.gmra.mxu1 %v6958_v53  ;;  %v8379_v48 = vadd.f32 %v2472_v44, %v2280_v7  ;;  %v2284_v51 = vadd.f32 %v2283_v15, %v7930_v20  ;;  %2983 = vmatprep.mubr.bf16.mxu0 %v6959_v36  ;;  %v6791_v44 = vld [vmem:[%s9869_s1 + $0x548] ss:$16 sps:$4 sm:$0xff]   ;;  %v6796_v53 = vld [vmem:[%s9869_s1 + $0x52c] ss:$16 sps:$4 sm:$0xff]  }
 0x174   :  { %3176 = vmatprep.mubr.bf16.mxu1 %v6960_v49  ;;  %v2285_v57 = vpop.f32.mrf.mxu0  ;;  %3292 = vmatpush2.bf16.msra.mxu0 %v6785_v1 }
 0x175   :  { %9898 = vst [vmem:[#allocation12_spill] sm:$0xff] %v8379_v48  ;;  %v2478_v12 = vpop.f32.mrf.mxu1  ;;  %v8391_v7 = vadd.f32 %v2476_v61, %v2284_v51  ;;  %v2286_v15 = vadd.f32 %v2285_v57, %v7937_v22  ;;  %3293 = vmatprep.subr.bf16.mxu0 %v6793_v21  ;;  %v6794_v61 = vld [vmem:[%s9869_s1 + $0x528] ss:$16 sps:$4 sm:$0xff]   ;;  %v6802_v57 = vld [vmem:[%s9869_s1 + $0x50c] ss:$16 sps:$4 sm:$0xff]  }
 0x176   :  { %v2287_v36 = vpop.f32.mrf.mxu0 }
 0x177   :  { %9899 = vst [vmem:[#allocation13_spill] sm:$0xff] %v8391_v7  ;;  %v2480_v48 = vpop.f32.mrf.mxu1  ;;  %v8397_v6 = vadd.f32 %v2478_v12, %v2286_v15  ;;  %v2288_v49 = vadd.f32 %v2287_v36, %v7930_v20  ;;  %v6961_v36 = vld [vmem:[%s9870_s0 + $0x188] ss:$28 sps:$4 sm:$0xff]  }
 0x178   :  { %v2289_v1 = vpop.f32.mrf.mxu0  ;;  %3294 = vmatpush2.bf16.msra.mxu0 %v6791_v44  ;;  %v6962_v44 = vld [vmem:[%s9870_s0 + $0x190] ss:$28 sps:$4 sm:$0xff]  }
 0x179   :  { %9900 = vst [vmem:[#allocation14_spill] sm:$0xff] %v8397_v6  ;;  %v2482_v30 = vpop.f32.mrf.mxu1  ;;  %v8403_v51 = vadd.f32 %v2480_v48, %v2288_v49  ;;  %v2290_v21 = vadd.f32 %v2289_v1, %v7937_v22  ;;  %3295 = vmatprep.subr.bf16.mxu0 %v6796_v53  ;;  %v6963_v49 = vld [vmem:[%s9870_s0 + $0x1c4] ss:$28 sps:$4 sm:$0xff]   ;;  %v6964_v1 = vld [vmem:[%s9870_s0 + $0x1cc] ss:$28 sps:$4 sm:$0xff]  }
 0x17a   :  { %v2293_v12 = vpop.f32.mrf.mxu0  ;;  %2984 = vmatmul.mubr.bf16.gmra.mxu0 %v6961_v36 }
 0x17b   :  { %9901 = vst [vmem:[#allocation15_spill] sm:$0xff] %v8403_v51  ;;  %v2486_v15 = vpop.f32.mrf.mxu1  ;;  %3177 = vmatmul.mubr.bf16.gmra.mxu1 %v6962_v44  ;;  %v8415_v48 = vadd.f32 %v2482_v30, %v2290_v21  ;;  %v2294_v53 = vadd.f32 %v2293_v12, %v7930_v20  ;;  %2993 = vmatprep.mubr.bf16.mxu0 %v6963_v49  ;;  %v6800_v30 = vld [vmem:[%s9869_s1 + $0x508] ss:$16 sps:$4 sm:$0xff]  }
 0x17c   :  { %3186 = vmatprep.mubr.bf16.mxu1 %v6964_v1  ;;  %v2295_v36 = vpop.f32.mrf.mxu0  ;;  %3296 = vmatpush2.bf16.msra.mxu0 %v6794_v61  ;;  %v6805_v61 = vld [vmem:[%s9872_s3 + $0x74] ss:$8 sps:$4 sm:$0xff]  }
 0x17d   :  { %9902 = vst [vmem:[#allocation16_spill] sm:$0xff] %v8415_v48  ;;  %v2488_v51 = vpop.f32.mrf.mxu1  ;;  %v8427_v21 = vadd.f32 %v2486_v15, %v2294_v53  ;;  %v2296_v12 = vadd.f32 %v2295_v36, %v7937_v22  ;;  %3297 = vmatprep.subr.bf16.mxu0 %v6802_v57 }
 0x17e   :  { %v2297_v44 = vpop.f32.mrf.mxu0 }
 0x17f   :  { %9903 = vst [vmem:[#allocation17_spill] sm:$0xff] %v8427_v21  ;;  %v2490_v48 = vpop.f32.mrf.mxu1  ;;  %v8430_v49 = vadd.f32 %v2488_v51, %v2296_v12  ;;  %v2298_v6 = vadd.f32 %v2297_v44, %v7930_v20  ;;  %v6965_v51 = vld [vmem:[%s9870_s0 + $0x1c0] ss:$28 sps:$4 sm:$0xff]   ;;  %v6966_v20 = vld [vmem:[%s9870_s0 + $0x1c8] ss:$28 sps:$4 sm:$0xff]  }
 0x180   :  { %v2299_v7 = vpop.f32.mrf.mxu0  ;;  %3298 = vmatpush2.bf16.msra.mxu0 %v6800_v30 }
 0x181   :  { %9904 = vst [vmem:[#allocation18_spill] sm:$0xff] %v8430_v49  ;;  %v2492_v1 = vpop.f32.mrf.mxu1  ;;  %v8436_v29 = vadd.f32 %v2490_v48, %v2298_v6  ;;  %v2300_v15 = vadd.f32 %v2299_v7, %v7937_v22  ;;  %v6967_v6 = vld [vmem:[%s9870_s0 + $0x1fc] ss:$28 sps:$4 sm:$0xff]   ;;  %v6968_v22 = vld [vmem:[%s9870_s0 + $0x204] ss:$28 sps:$4 sm:$0xff]   ;;  %4241 = vmatprep.subr.bf16.mxu0 %v6805_v61 }
 0x182   :  { %v2529_v53 = vpop.f32.mrf.mxu0  ;;  %2994 = vmatmul.mubr.bf16.gmra.mxu0 %v6965_v51 }
 0x183   :  { %9905 = vst [vmem:[#allocation19_spill] sm:$0xff] %v8436_v29  ;;  %v2722_v36 = vpop.f32.mrf.mxu1  ;;  %3187 = vmatmul.mubr.bf16.gmra.mxu1 %v6966_v20  ;;  %v8445_v57 = vadd.f32 %v2492_v1, %v2300_v15  ;;  %v2530_v30 = vadd.f32 %v2529_v53, %v7941_v28  ;;  %3003 = vmatprep.mubr.bf16.mxu0 %v6967_v6 }
 0x184   :  { %3196 = vmatprep.mubr.bf16.mxu1 %v6968_v22  ;;  %v2531_v7 = vpop.f32.mrf.mxu0  ;;  %v6969_v22 = vld [vmem:[%s9870_s0 + $0x1f8] ss:$28 sps:$4 sm:$0xff]  }
 0x185   :  { %9906 = vst [vmem:[#allocation20_spill] sm:$0xff] %v8445_v57  ;;  %v2724_v48 = vpop.f32.mrf.mxu1  ;;  %v2723_v12 = vadd.f32 %v2722_v36, %v2530_v30  ;;  %v2532_v44 = vadd.f32 %v2531_v7, %v7950_v34  ;;  %v6970_v34 = vld [vmem:[%s9870_s0 + $0x200] ss:$28 sps:$4 sm:$0xff]  }
 0x186   :  { %v2533_v1 = vpop.f32.mrf.mxu0  ;;  %v6972_v7 = vld [vmem:[%s9870_s0 + $0x23c] ss:$28 sps:$4 sm:$0xff]  }
 0x187   :  { %v2726_v15 = vpop.f32.mrf.mxu1  ;;  %v2725_v51 = vadd.f32 %v2724_v48, %v2532_v44  ;;  %v2534_v28 = vadd.f32 %v2533_v1, %v7956_v39  ;;  %v3653_v61 = vmax.f32 %v2723_v12, 0.0 }
 0x188   :  { %v2535_v53 = vpop.f32.mrf.mxu0 }
 0x189   :  { %v2728_v20 = vpop.f32.mrf.mxu1  ;;  %v2727_v57 = vadd.f32 %v2726_v15, %v2534_v28  ;;  %v2536_v6 = vadd.f32 %v2535_v53, %v7959_v43  ;;  %v6971_v43 = vld [vmem:[%s9870_s0 + $0x234] ss:$28 sps:$4 sm:$0xff]   ;;  %v3654_v48 = vmax.f32 %v2725_v51, 0.0 }
 0x18a   :  { %v2539_v29 = vpop.f32.mrf.mxu0  ;;  %3004 = vmatmul.mubr.bf16.gmra.mxu0 %v6969_v22 }
 0x18b   :  { %v2732_v49 = vpop.f32.mrf.mxu1  ;;  %3197 = vmatmul.mubr.bf16.gmra.mxu1 %v6970_v34  ;;  %v3657_v36 = vmax.f32 %v2727_v57, 0.0  ;;  %v2729_v39 = vadd.f32 %v2728_v20, %v2536_v6  ;;  %v2540_v30 = vadd.f32 %v2539_v29, %v7963_v47  ;;  %3013 = vmatprep.mubr.bf16.mxu0 %v6971_v43 }
 0x18c   :  { %3206 = vmatprep.mubr.bf16.mxu1 %v6972_v7  ;;  %v2541_v44 = vpop.f32.mrf.mxu0 }
 0x18d   :  { %v2734_v1 = vpop.f32.mrf.mxu1  ;;  %v8470_v15 = vpack.c.bf16 %v3657_v36, %v3653_v61  ;;  %v3658_v12 = vmax.f32 %v2729_v39, 0.0  ;;  %v2733_v57 = vadd.f32 %v2732_v49, %v2540_v30  ;;  %v2542_v28 = vadd.f32 %v2541_v44, %v7972_v54  ;;  %v6973_v49 = vld [vmem:[%s9870_s0 + $0x230] ss:$28 sps:$4 sm:$0xff]   ;;  %v6974_v54 = vld [vmem:[%s9870_s0 + $0x238] ss:$28 sps:$4 sm:$0xff]  }
 0x18e   :  { %v2543_v47 = vpop.f32.mrf.mxu0  ;;  %v6976_v30 = vld [vmem:[%s9870_s0 + $0x274] ss:$28 sps:$4 sm:$0xff]  }
 0x18f   :  { %v2736_v29 = vpop.f32.mrf.mxu1  ;;  %v2735_v53 = vadd.f32 %v2734_v1, %v2542_v28  ;;  %v2544_v20 = vadd.f32 %v2543_v47, %v7978_v59  ;;  %v8474_v6 = vpack.c.bf16 %v3658_v12, %v3654_v48  ;;  %v3661_v59 = vmax.f32 %v2733_v57, 0.0 }
 0x190   :  { %v2545_v22 = vpop.f32.mrf.mxu0 }
 0x191   :  { %v2738_v34 = vpop.f32.mrf.mxu1  ;;  %v2737_v43 = vadd.f32 %v2736_v29, %v2544_v20  ;;  %v2546_v51 = vadd.f32 %v2545_v22, %v7981_v63  ;;  %v6975_v63 = vld [vmem:[%s9870_s0 + $0x26c] ss:$28 sps:$4 sm:$0xff]   ;;  %v3662_v48 = vmax.f32 %v2735_v53, 0.0 }
 0x192   :  { %v2549_v7 = vpop.f32.mrf.mxu0  ;;  %3014 = vmatmul.mubr.bf16.gmra.mxu0 %v6973_v49 }
 0x193   :  { %v2742_v21 = vpop.f32.mrf.mxu1  ;;  %3207 = vmatmul.mubr.bf16.gmra.mxu1 %v6974_v54  ;;  %v3665_v61 = vmax.f32 %v2737_v43, 0.0  ;;  %v2739_v36 = vadd.f32 %v2738_v34, %v2546_v51  ;;  %v2550_v39 = vadd.f32 %v2549_v7, %v7985_v3  ;;  %3023 = vmatprep.mubr.bf16.mxu0 %v6975_v63  ;;  %v6820_v3 = vld [vmem:[%s9872_s3 + $0x174] ss:$8 sps:$4 sm:$0xff]   ;;  %v6980_v63 = vld [vmem:[%s9870_s0 + $0x2ac] ss:$28 sps:$4 sm:$0xff]  }
 0x194   :  { %3216 = vmatprep.mubr.bf16.mxu1 %v6976_v30  ;;  %v2551_v44 = vpop.f32.mrf.mxu0  ;;  %4434 = vmatprep.subr.bf16.mxu1 %v6820_v3 }
 0x195   :  { %v2744_v1 = vpop.f32.mrf.mxu1  ;;  %v8490_v12 = vpack.c.bf16 %v3665_v61, %v3661_v59  ;;  %v3666_v57 = vmax.f32 %v2739_v36, 0.0  ;;  %v2743_v28 = vadd.f32 %v2742_v21, %v2550_v39  ;;  %v2552_v47 = vadd.f32 %v2551_v44, %v7994_v10  ;;  %v6977_v10 = vld [vmem:[%s9870_s0 + $0x268] ss:$28 sps:$4 sm:$0xff]   ;;  %v6978_v59 = vld [vmem:[%s9870_s0 + $0x270] ss:$28 sps:$4 sm:$0xff]  }
 0x196   :  { %v2553_v29 = vpop.f32.mrf.mxu0 }
 0x197   :  { %v2746_v20 = vpop.f32.mrf.mxu1  ;;  %v2745_v22 = vadd.f32 %v2744_v1, %v2552_v47  ;;  %v2554_v34 = vadd.f32 %v2553_v29, %v8000_v17  ;;  %v8497_v43 = vpack.c.bf16 %v3666_v57, %v3662_v48  ;;  %v3669_v17 = vmax.f32 %v2743_v28, 0.0 }
 0x198   :  { %v2555_v53 = vpop.f32.mrf.mxu0 }
 0x199   :  { %v2748_v51 = vpop.f32.mrf.mxu1  ;;  %v2747_v7 = vadd.f32 %v2746_v20, %v2554_v34  ;;  %v2556_v49 = vadd.f32 %v2555_v53, %v8003_v23  ;;  %v6979_v23 = vld [vmem:[%s9870_s0 + $0x2a4] ss:$28 sps:$4 sm:$0xff]   ;;  %v3670_v30 = vmax.f32 %v2745_v22, 0.0 }
 0x19a   :  { %v2559_v21 = vpop.f32.mrf.mxu0  ;;  %3024 = vmatmul.mubr.bf16.gmra.mxu0 %v6977_v10 }
 0x19b   :  { %v2752_v54 = vpop.f32.mrf.mxu1  ;;  %3217 = vmatmul.mubr.bf16.gmra.mxu1 %v6978_v59  ;;  %v3673_v61 = vmax.f32 %v2747_v7, 0.0  ;;  %v2749_v36 = vadd.f32 %v2748_v51, %v2556_v49  ;;  %v2560_v39 = vadd.f32 %v2559_v21, %v8007_v27  ;;  %3033 = vmatprep.mubr.bf16.mxu0 %v6979_v23 }
 0x19c   :  { %3226 = vmatprep.mubr.bf16.mxu1 %v6980_v63  ;;  %v2561_v48 = vpop.f32.mrf.mxu0 }
 0x19d   :  { %v2754_v44 = vpop.f32.mrf.mxu1  ;;  %v8513_v1 = vpack.c.bf16 %v3673_v61, %v3669_v17  ;;  %v3674_v57 = vmax.f32 %v2749_v36, 0.0  ;;  %v2753_v28 = vadd.f32 %v2752_v54, %v2560_v39  ;;  %v2562_v47 = vadd.f32 %v2561_v48, %v8016_v35  ;;  %v6981_v54 = vld [vmem:[%s9870_s0 + $0x2a0] ss:$28 sps:$4 sm:$0xff]   ;;  %v6982_v35 = vld [vmem:[%s9870_s0 + $0x2a8] ss:$28 sps:$4 sm:$0xff]  }
 0x19e   :  { %v2563_v27 = vpop.f32.mrf.mxu0  ;;  %v6984_v61 = vld [vmem:[%s9870_s0 + $0x2e4] ss:$28 sps:$4 sm:$0xff]  }
 0x19f   :  { %v2756_v3 = vpop.f32.mrf.mxu1  ;;  %v2755_v29 = vadd.f32 %v2754_v44, %v2562_v47  ;;  %v2564_v20 = vadd.f32 %v2563_v27, %v8022_v41  ;;  %v8517_v34 = vpack.c.bf16 %v3674_v57, %v3670_v30  ;;  %v3677_v41 = vmax.f32 %v2753_v28, 0.0 }
 0x1a0   :  { %v2565_v53 = vpop.f32.mrf.mxu0 }
 0x1a1   :  { %v2758_v51 = vpop.f32.mrf.mxu1  ;;  %v2757_v7 = vadd.f32 %v2756_v3, %v2564_v20  ;;  %v2566_v22 = vadd.f32 %v2565_v53, %v8025_v46  ;;  %v6983_v46 = vld [vmem:[%s9870_s0 + $0x2dc] ss:$28 sps:$4 sm:$0xff]   ;;  %v3678_v36 = vmax.f32 %v2755_v29, 0.0 }
 0x1a2   :  { %v2569_v49 = vpop.f32.mrf.mxu0  ;;  %3034 = vmatmul.mubr.bf16.gmra.mxu0 %v6981_v54 }
 0x1a3   :  { %v2762_v21 = vpop.f32.mrf.mxu1  ;;  %3227 = vmatmul.mubr.bf16.gmra.mxu1 %v6982_v35  ;;  %v3681_v10 = vmax.f32 %v2757_v7, 0.0  ;;  %v2759_v59 = vadd.f32 %v2758_v51, %v2566_v22  ;;  %v2570_v17 = vadd.f32 %v2569_v49, %v8029_v52  ;;  %3043 = vmatprep.mubr.bf16.mxu0 %v6983_v46  ;;  %v6985_v22 = vld [vmem:[%s9870_s0 + $0x2d8] ss:$28 sps:$4 sm:$0xff]  }
 0x1a4   :  { %3236 = vmatprep.mubr.bf16.mxu1 %v6984_v61  ;;  %v2571_v39 = vpop.f32.mrf.mxu0  ;;  %v6988_v35 = vld [vmem:[%s9870_s0 + $0x31c] ss:$28 sps:$4 sm:$0xff]  }
 0x1a5   :  { %v2764_v23 = vpop.f32.mrf.mxu1  ;;  %v8533_v63 = vpack.c.bf16 %v3681_v10, %v3677_v41  ;;  %v3682_v30 = vmax.f32 %v2759_v59, 0.0  ;;  %v2763_v48 = vadd.f32 %v2762_v21, %v2570_v17  ;;  %v2572_v44 = vadd.f32 %v2571_v39, %v8038_v60  ;;  %v6986_v60 = vld [vmem:[%s9870_s0 + $0x2e0] ss:$28 sps:$4 sm:$0xff]  }
 0x1a6   :  { %v2573_v52 = vpop.f32.mrf.mxu0 }
 0x1a7   :  { %v2766_v57 = vpop.f32.mrf.mxu1  ;;  %v2765_v28 = vadd.f32 %v2764_v23, %v2572_v44  ;;  %v2574_v47 = vadd.f32 %v2573_v52, %v8044_v2  ;;  %v8537_v27 = vpack.c.bf16 %v3682_v30, %v3678_v36  ;;  %v3685_v2 = vmax.f32 %v2763_v48, 0.0 }
 0x1a8   :  { %v2575_v3 = vpop.f32.mrf.mxu0 }
 0x1a9   :  { %v2768_v20 = vpop.f32.mrf.mxu1  ;;  %v2767_v53 = vadd.f32 %v2766_v57, %v2574_v47  ;;  %v2576_v29 = vadd.f32 %v2575_v3, %v8047_v8  ;;  %v6987_v8 = vld [vmem:[%s9870_s0 + $0x314] ss:$28 sps:$4 sm:$0xff]   ;;  %v3686_v41 = vmax.f32 %v2765_v28, 0.0 }
 0x1aa   :  { %v2579_v51 = vpop.f32.mrf.mxu0  ;;  %3044 = vmatmul.mubr.bf16.gmra.mxu0 %v6985_v22 }
 0x1ab   :  { %v2772_v7 = vpop.f32.mrf.mxu1  ;;  %3237 = vmatmul.mubr.bf16.gmra.mxu1 %v6986_v60  ;;  %v3689_v49 = vmax.f32 %v2767_v53, 0.0  ;;  %v2769_v21 = vadd.f32 %v2768_v20, %v2576_v29  ;;  %v2580_v54 = vadd.f32 %v2579_v51, %v8051_v14  ;;  %3053 = vmatprep.mubr.bf16.mxu0 %v6987_v8  ;;  %v6989_v20 = vld [vmem:[%s9870_s0 + $0x310] ss:$28 sps:$4 sm:$0xff]  }
 0x1ac   :  { %3246 = vmatprep.mubr.bf16.mxu1 %v6988_v35  ;;  %v2581_v10 = vpop.f32.mrf.mxu0 }
 0x1ad   :  { %v2774_v59 = vpop.f32.mrf.mxu1  ;;  %v8553_v17 = vpack.c.bf16 %v3689_v49, %v3685_v2  ;;  %v3690_v46 = vmax.f32 %v2769_v21, 0.0  ;;  %v2773_v61 = vadd.f32 %v2772_v7, %v2580_v54  ;;  %v2582_v36 = vadd.f32 %v2581_v10, %v8060_v25  ;;  %v6990_v25 = vld [vmem:[%s9870_s0 + $0x318] ss:$28 sps:$4 sm:$0xff]  }
 0x1ae   :  { %v2583_v14 = vpop.f32.mrf.mxu0  ;;  %v6992_v7 = vld [vmem:[%s9870_s0 + $0x354] ss:$28 sps:$4 sm:$0xff]  }
 0x1af   :  { %v2776_v39 = vpop.f32.mrf.mxu1  ;;  %v2775_v23 = vadd.f32 %v2774_v59, %v2582_v36  ;;  %v2584_v30 = vadd.f32 %v2583_v14, %v8066_v32  ;;  %v8557_v48 = vpack.c.bf16 %v3690_v46, %v3686_v41  ;;  %v3693_v32 = vmax.f32 %v2773_v61, 0.0 }
 0x1b0   :  { %v2585_v44 = vpop.f32.mrf.mxu0 }
 0x1b1   :  { %v2778_v52 = vpop.f32.mrf.mxu1  ;;  %v2777_v57 = vadd.f32 %v2776_v39, %v2584_v30  ;;  %v2586_v28 = vadd.f32 %v2585_v44, %v8069_v38  ;;  %v6991_v38 = vld [vmem:[%s9870_s0 + $0x34c] ss:$28 sps:$4 sm:$0xff]   ;;  %v3694_v22 = vmax.f32 %v2775_v23, 0.0 }
 0x1b2   :  { %v2589_v47 = vpop.f32.mrf.mxu0  ;;  %3054 = vmatmul.mubr.bf16.gmra.mxu0 %v6989_v20  ;;  %v6993_v30 = vld [vmem:[%s9870_s0 + $0x348] ss:$28 sps:$4 sm:$0xff]  }
 0x1b3   :  { %v2782_v3 = vpop.f32.mrf.mxu1  ;;  %3247 = vmatmul.mubr.bf16.gmra.mxu1 %v6990_v25  ;;  %v3697_v53 = vmax.f32 %v2777_v57, 0.0  ;;  %v2779_v29 = vadd.f32 %v2778_v52, %v2586_v28  ;;  %v2590_v51 = vadd.f32 %v2589_v47, %v8073_v45  ;;  %3063 = vmatprep.mubr.bf16.mxu0 %v6991_v38  ;;  %v9907_v28 = vmov 0  }
 0x1b4   :  { %3256 = vmatprep.mubr.bf16.mxu1 %v6992_v7  ;;  %v2591_v60 = vpop.f32.mrf.mxu0 }
 0x1b5   :  { %v2784_v2 = vpop.f32.mrf.mxu1  ;;  %v8573_v49 = vpack.c.bf16 %v3697_v53, %v3693_v32  ;;  %v3698_v21 = vmax.f32 %v2779_v29, 0.0  ;;  %v2783_v54 = vadd.f32 %v2782_v3, %v2590_v51  ;;  %v2592_v8 = vadd.f32 %v2591_v60, %v8082_v56  ;;  %v6994_v56 = vld [vmem:[%s9870_s0 + $0x350] ss:$28 sps:$4 sm:$0xff]  }
 0x1b6   :  { %v2593_v45 = vpop.f32.mrf.mxu0 }
 0x1b7   :  { %v2786_v35 = vpop.f32.mrf.mxu1  ;;  %v2785_v41 = vadd.f32 %v2784_v2, %v2592_v8  ;;  %v2594_v10 = vadd.f32 %v2593_v45, %v8085_v62  ;;  %v8577_v59 = vpack.c.bf16 %v3698_v21, %v3694_v22  ;;  %v3701_v62 = vmax.f32 %v2783_v54, 0.0  ;;  %v6803_v21 = vld [vmem:[%s9872_s3 + $0x70] ss:$8 sps:$4 sm:$0xff]   ;;  %v6808_v45 = vld [vmem:[%s9872_s3 + $0x64] ss:$8 sps:$4 sm:$0xff]  }
 0x1b8   :  { %v2595_v46 = vpop.f32.mrf.mxu0  ;;  %v6818_v54 = vld [vmem:[%s9872_s3 + $0x170] ss:$8 sps:$4 sm:$0xff]  }
 0x1b9   :  { %v2788_v61 = vpop.f32.mrf.mxu1  ;;  %v2787_v36 = vadd.f32 %v2786_v35, %v2594_v10  ;;  %v2596_v14 = vadd.f32 %v2595_v46, %v8088_v5  ;;  %v6995_v5 = vld [vmem:[%s9870_s0 + $0x14] ss:$28 sps:$4 sm:$0xff]   ;;  %v3702_v47 = vmax.f32 %v2785_v41, 0.0 }
 0x1ba   :  { %v2599_v39 = vpop.f32.mrf.mxu0  ;;  %3064 = vmatmul.mubr.bf16.gmra.mxu0 %v6993_v30  ;;  %v6996_v10 = vld [vmem:[%s9870_s0 + $0x10] ss:$28 sps:$4 sm:$0xff]   ;;  %v6997_v46 = vld [vmem:[%s9870_s0 + $0x18] ss:$28 sps:$4 sm:$0xff]  }
 0x1bb   :  { %v2792_v23 = vpop.f32.mrf.mxu1  ;;  %3257 = vmatmul.mubr.bf16.gmra.mxu1 %v6994_v56  ;;  %v3705_v44 = vmax.f32 %v2787_v36, 0.0  ;;  %v2789_v52 = vadd.f32 %v2788_v61, %v2596_v14  ;;  %v2600_v57 = vadd.f32 %v2599_v39, %v8097_v18  ;;  %3299 = vmatprep.mubr.bf16.mxu0 %v6995_v5  ;;  %v6998_v39 = vld [vmem:[%s9870_s0 + $0x4c] ss:$28 sps:$4 sm:$0xff]  }
 0x1bc   :  { %3492 = vmatprep.mubr.bf16.mxu1 %v9907_v28  ;;  %v2601_v3 = vpop.f32.mrf.mxu0 }
 0x1bd   :  { %v2794_v20 = vpop.f32.mrf.mxu1  ;;  %v8591_v25 = vpack.c.bf16 %v3705_v44, %v3701_v62  ;;  %v3706_v32 = vmax.f32 %v2789_v52, 0.0  ;;  %v2793_v53 = vadd.f32 %v2792_v23, %v2600_v57  ;;  %v2602_v29 = vadd.f32 %v2601_v3, %v8100_v26  ;;  %v6806_v62 = vld [vmem:[%s9872_s3 + $0x60] ss:$8 sps:$4 sm:$0xff]   ;;  %v6838_v3 = vld [vmem:[%s9872_s3 + $0x154] ss:$8 sps:$4 sm:$0xff]  }
 0x1be   :  { %v2603_v51 = vpop.f32.mrf.mxu0 }
 0x1bf   :  { %v2796_v38 = vpop.f32.mrf.mxu1  ;;  %v2795_v7 = vadd.f32 %v2794_v20, %v2602_v29  ;;  %v2604_v18 = vadd.f32 %v2603_v51, %v8109_v37  ;;  %v8595_v22 = vpack.c.bf16 %v3706_v32, %v3702_v47  ;;  %v6829_v37 = vld [vmem:[%s9872_s3 + $0x164] ss:$8 sps:$4 sm:$0xff]   ;;  %v6811_v47 = vld [vmem:[%s9872_s3 + $0x54] ss:$8 sps:$4 sm:$0xff]  }
 0x1c0   :  { %v2605_v60 = vpop.f32.mrf.mxu0 }
 0x1c1   :  { %v2798_v2 = vpop.f32.mrf.mxu1  ;;  %v2797_v8 = vadd.f32 %v2796_v38, %v2604_v18  ;;  %v2606_v26 = vadd.f32 %v2605_v60, %v8124_v55  ;;  %v3709_v55 = vmax.f32 %v2793_v53, 0.0  ;;  %v3710_v23 = vmax.f32 %v2795_v7, 0.0  ;;  %v6836_v18 = vld [vmem:[%s9872_s3 + $0x150] ss:$8 sps:$4 sm:$0xff]  }
 0x1c2   :  { %v2609_v35 = vpop.f32.mrf.mxu0  ;;  %3300 = vmatmul.mubr.bf16.vlgmr.msra.gmra.mxu0 %v6996_v10  ;;  %v7001_v10 = vld [vmem:[%s9870_s0 + $0x84] ss:$28 sps:$4 sm:$0xff]  }
 0x1c3   :  { %v2802_v41 = vpop.f32.mrf.mxu1  ;;  %3493 = vmatmul.mubr.bf16.vlgmr.msra.gmra.mxu1 %v6997_v46  ;;  %v3713_v61 = vmax.f32 %v2797_v8, 0.0  ;;  %v2799_v36 = vadd.f32 %v2798_v2, %v2606_v26  ;;  %v2610_v14 = vadd.f32 %v2609_v35, %v8145_v13  ;;  %3309 = vmatprep.mubr.bf16.mxu0 %v6998_v39  ;;  %v6827_v13 = vld [vmem:[%s9872_s3 + $0x160] ss:$8 sps:$4 sm:$0xff]  }
 0x1c4   :  { %3502 = vmatprep.mubr.bf16.mxu1 %v9907_v28  ;;  %v2611_v30 = vpop.f32.mrf.mxu0  ;;  %4242 = vmatpush1.bf16.msra.mxu0 %v6803_v21  ;;  %v6847_v21 = vld [vmem:[%s9872_s3 + $0x144] ss:$8 sps:$4 sm:$0xff]  }
 0x1c5   :  { %v2804_v56 = vpop.f32.mrf.mxu1  ;;  %4435 = vmatpush1.bf16.msra.mxu1 %v6818_v54  ;;  %v8627_v44 = vpack.c.bf16 %v3713_v61, %v3709_v55  ;;  %v3714_v52 = vmax.f32 %v2799_v36, 0.0  ;;  %v2803_v57 = vadd.f32 %v2802_v41, %v2610_v14  ;;  %v2612_v5 = vadd.f32 %v2611_v30, %v8148_v24  ;;  %4243 = vmatprep.subr.bf16.mxu0 %v6808_v45  ;;  %v6809_v24 = vld [vmem:[%s9872_s3 + $0x50] ss:$8 sps:$4 sm:$0xff]   ;;  %v6999_v26 = vld [vmem:[%s9870_s0 + $0x48] ss:$28 sps:$4 sm:$0xff]  }
 0x1c6   :  { %4436 = vmatprep.subr.bf16.mxu1 %v6829_v37  ;;  %v2613_v20 = vpop.f32.mrf.mxu0  ;;  %v6812_v36 = vld [vmem:[%s9872_s3 + $0x40] ss:$8 sps:$4 sm:$0xff]  }
 0x1c7   :  { %v2806_v32 = vpop.f32.mrf.mxu1  ;;  %v2805_v53 = vadd.f32 %v2804_v56, %v2612_v5  ;;  %v2614_v29 = vadd.f32 %v2613_v20, %v8157_v40  ;;  %v8637_v51 = vpack.c.bf16 %v3714_v52, %v3710_v23  ;;  %v6814_v40 = vld [vmem:[%s9872_s3 + $0x44] ss:$8 sps:$4 sm:$0xff]   ;;  %v3717_v45 = vmax.f32 %v2803_v57, 0.0  ;;  %v6817_v56 = vld [vmem:[%s9872_s3 + $0x34] ss:$8 sps:$4 sm:$0xff]  }
 0x1c8   :  { %v2615_v38 = vpop.f32.mrf.mxu0  ;;  %4244 = vmatpush1.bf16.msra.mxu0 %v6806_v62  ;;  %v6856_v62 = vld [vmem:[%s9872_s3 + $0x134] ss:$8 sps:$4 sm:$0xff]  }
 0x1c9   :  { %v2808_v7 = vpop.f32.mrf.mxu1  ;;  %4437 = vmatpush1.bf16.msra.mxu1 %v6827_v13  ;;  %v2807_v60 = vadd.f32 %v2806_v32, %v2614_v29  ;;  %v2616_v2 = vadd.f32 %v2615_v38, %v8172_v58  ;;  %4245 = vmatprep.subr.bf16.mxu0 %v6811_v47  ;;  %v7000_v58 = vld [vmem:[%s9870_s0 + $0x50] ss:$28 sps:$4 sm:$0xff]   ;;  %v3718_v46 = vmax.f32 %v2805_v53, 0.0 }
 0x1ca   :  { %4438 = vmatprep.subr.bf16.mxu1 %v6838_v3  ;;  %v2619_v54 = vpop.f32.mrf.mxu0  ;;  %3310 = vmatmul.mubr.bf16.gmra.mxu0 %v6999_v26  ;;  %v6854_v32 = vld [vmem:[%s9872_s3 + $0x130] ss:$8 sps:$4 sm:$0xff]   ;;  %v6865_v38 = vld [vmem:[%s9872_s3 + $0x124] ss:$8 sps:$4 sm:$0xff]  }
 0x1cb   :  { %v2812_v8 = vpop.f32.mrf.mxu1  ;;  %3503 = vmatmul.mubr.bf16.gmra.mxu1 %v7000_v58  ;;  %v3721_v37 = vmax.f32 %v2807_v60, 0.0  ;;  %v2809_v35 = vadd.f32 %v2808_v7, %v2616_v2  ;;  %v2620_v41 = vadd.f32 %v2619_v54, %v8187_v16  ;;  %3319 = vmatprep.mubr.bf16.mxu0 %v7001_v10  ;;  %v6845_v16 = vld [vmem:[%s9872_s3 + $0x140] ss:$8 sps:$4 sm:$0xff]   ;;  %v7004_v54 = vld [vmem:[%s9870_s0 + $0xbc] ss:$28 sps:$4 sm:$0xff]  }
 0x1cc   :  { %3512 = vmatprep.mubr.bf16.mxu1 %v9907_v28  ;;  %v2621_v55 = vpop.f32.mrf.mxu0  ;;  %4246 = vmatpush1.bf16.msra.mxu0 %v6809_v24 }
 0x1cd   :  { %v2814_v61 = vpop.f32.mrf.mxu1  ;;  %4439 = vmatpush1.bf16.msra.mxu1 %v6836_v18  ;;  %v8669_v14 = vpack.c.bf16 %v3721_v37, %v3717_v45  ;;  %v3722_v39 = vmax.f32 %v2809_v35, 0.0  ;;  %v2813_v23 = vadd.f32 %v2812_v8, %v2620_v41  ;;  %v2622_v30 = vadd.f32 %v2621_v55, %v8196_v33  ;;  %4247 = vmatprep.subr.bf16.mxu0 %v6814_v40  ;;  %v6815_v33 = vld [vmem:[%s9872_s3 + $0x30] ss:$8 sps:$4 sm:$0xff]   ;;  %v7002_v18 = vld [vmem:[%s9870_s0 + $0x80] ss:$28 sps:$4 sm:$0xff]  }
 0x1ce   :  { %4440 = vmatprep.subr.bf16.mxu1 %v6847_v21  ;;  %v2623_v13 = vpop.f32.mrf.mxu0  ;;  %v6821_v45 = vld [vmem:[%s9872_s3 + $0x20] ss:$8 sps:$4 sm:$0xff]   ;;  %v6871_v55 = vld [vmem:[%s9872_s3 + $0x114] ss:$8 sps:$4 sm:$0xff]  }
 0x1cf   :  { %v2816_v52 = vpop.f32.mrf.mxu1  ;;  %v2815_v57 = vadd.f32 %v2814_v61, %v2622_v30  ;;  %v2624_v5 = vadd.f32 %v2623_v13, %v8205_v50  ;;  %v8679_v47 = vpack.c.bf16 %v3722_v39, %v3718_v46  ;;  %v6823_v50 = vld [vmem:[%s9872_s3 + $0x24] ss:$8 sps:$4 sm:$0xff]   ;;  %v3725_v60 = vmax.f32 %v2813_v23, 0.0  ;;  %v6826_v46 = vld [vmem:[%s9872_s3 + $0x14] ss:$8 sps:$4 sm:$0xff]  }
 0x1d0   :  { %v2625_v3 = vpop.f32.mrf.mxu0  ;;  %4248 = vmatpush1.bf16.msra.mxu0 %v6812_v36 }
 0x1d1   :  { %v2818_v20 = vpop.f32.mrf.mxu1  ;;  %4441 = vmatpush1.bf16.msra.mxu1 %v6845_v16  ;;  %v2817_v53 = vadd.f32 %v2816_v52, %v2624_v5  ;;  %v2626_v29 = vadd.f32 %v2625_v3, %v8220_v9  ;;  %4249 = vmatprep.subr.bf16.mxu0 %v6817_v56  ;;  %v7003_v9 = vld [vmem:[%s9870_s0 + $0x88] ss:$28 sps:$4 sm:$0xff]   ;;  %v3726_v8 = vmax.f32 %v2815_v57, 0.0 }
 0x1d2   :  { %4442 = vmatprep.subr.bf16.mxu1 %v6856_v62  ;;  %v2629_v7 = vpop.f32.mrf.mxu0  ;;  %3320 = vmatmul.mubr.bf16.gmra.mxu0 %v7002_v18  ;;  %v6869_v62 = vld [vmem:[%s9872_s3 + $0x110] ss:$8 sps:$4 sm:$0xff]   ;;  %v6874_v57 = vld [vmem:[%s9872_s3 + $0x104] ss:$8 sps:$4 sm:$0xff]   ;;  %v6830_v18 = vld [vmem:[%s9872_s3] ss:$8 sps:$4 sm:$0xff]  }
 0x1d3   :  { %v2822_v24 = vpop.f32.mrf.mxu1  ;;  %3513 = vmatmul.mubr.bf16.gmra.mxu1 %v7003_v9  ;;  %v3729_v2 = vmax.f32 %v2817_v53, 0.0  ;;  %v2819_v40 = vadd.f32 %v2818_v20, %v2626_v29  ;;  %v2630_v21 = vadd.f32 %v2629_v7, %v8235_v42  ;;  %3329 = vmatprep.mubr.bf16.mxu0 %v7004_v54  ;;  %v6863_v42 = vld [vmem:[%s9872_s3 + $0x120] ss:$8 sps:$4 sm:$0xff]   ;;  %v7005_v20 = vld [vmem:[%s9870_s0 + $0xb8] ss:$28 sps:$4 sm:$0xff]  }
 0x1d4   :  { %3522 = vmatprep.mubr.bf16.mxu1 %v9907_v28  ;;  %v2631_v26 = vpop.f32.mrf.mxu0  ;;  %4250 = vmatpush1.bf16.msra.mxu0 %v6815_v33  ;;  %v6877_v54 = vld [vmem:[%s9872_s3 + $0x1f4] ss:$8 sps:$4 sm:$0xff]  }
 0x1d5   :  { %v2824_v58 = vpop.f32.mrf.mxu1  ;;  %4443 = vmatpush1.bf16.msra.mxu1 %v6854_v32  ;;  %v8711_v37 = vpack.c.bf16 %v3729_v2, %v3725_v60  ;;  %v3730_v35 = vmax.f32 %v2819_v40, 0.0  ;;  %v2823_v41 = vadd.f32 %v2822_v24, %v2630_v21  ;;  %v2632_v10 = vadd.f32 %v2631_v26, %v8244_v4  ;;  %4251 = vmatprep.subr.bf16.mxu0 %v6823_v50  ;;  %v6824_v4 = vld [vmem:[%s9872_s3 + $0x10] ss:$8 sps:$4 sm:$0xff]   ;;  %v6835_v21 = vld [vmem:[%s9872_s3 + $0xf4] ss:$8 sps:$4 sm:$0xff]  }
 0x1d6   :  { %4444 = vmatprep.subr.bf16.mxu1 %v6865_v38  ;;  %v2633_v61 = vpop.f32.mrf.mxu0  ;;  %v7007_v50 = vld [vmem:[%s9870_s0 + $0xf4] ss:$28 sps:$4 sm:$0xff]  }
 0x1d7   :  { %v2826_v36 = vpop.f32.mrf.mxu1  ;;  %v2825_v16 = vadd.f32 %v2824_v58, %v2632_v10  ;;  %v2634_v39 = vadd.f32 %v2633_v61, %v8253_v19  ;;  %v8721_v23 = vpack.c.bf16 %v3730_v35, %v3726_v8  ;;  %v6832_v19 = vld [vmem:[%s9872_s3 + $0x4] ss:$8 sps:$4 sm:$0xff]   ;;  %v3733_v33 = vmax.f32 %v2823_v41, 0.0  ;;  %v9909_v61 = vld [vmem:[#allocation4_spill] sm:$0xff] }
 0x1d8   :  { %v2635_v30 = vpop.f32.mrf.mxu0  ;;  %4252 = vmatpush1.bf16.msra.mxu0 %v6821_v45  ;;  %v9908_v45 = vld [vmem:[#allocation3_spill] sm:$0xff] }
 0x1d9   :  { %v2828_v56 = vpop.f32.mrf.mxu1  ;;  %4445 = vmatpush1.bf16.msra.mxu1 %v6863_v42  ;;  %v2827_v13 = vadd.f32 %v2826_v36, %v2634_v39  ;;  %v2636_v52 = vadd.f32 %v2635_v30, %v8268_v0  ;;  %4253 = vmatprep.subr.bf16.mxu0 %v6826_v46  ;;  %v7006_v0 = vld [vmem:[%s9870_s0 + $0xc0] ss:$28 sps:$4 sm:$0xff]   ;;  %v3734_v38 = vmax.f32 %v2825_v16, 0.0  ;;  %v6875_v46 = vld [vmem:[%s9872_s3 + $0x1f0] ss:$8 sps:$4 sm:$0xff]  }
 0x1da   :  { %4446 = vmatprep.subr.bf16.mxu1 %v6871_v55  ;;  %v2639_v5 = vpop.f32.mrf.mxu0  ;;  %3330 = vmatmul.mubr.bf16.gmra.mxu0 %v7005_v20  ;;  %v6841_v16 = vld [vmem:[%s9872_s3 + $0xe4] ss:$8 sps:$4 sm:$0xff]  }
 0x1db   :  { %v2832_v3 = vpop.f32.mrf.mxu1  ;;  %3523 = vmatmul.mubr.bf16.gmra.mxu1 %v7006_v0  ;;  %v3737_v32 = vmax.f32 %v2827_v13, 0.0  ;;  %v2829_v53 = vadd.f32 %v2828_v56, %v2636_v52  ;;  %v2640_v29 = vadd.f32 %v2639_v5, %v8283_v31  ;;  %3339 = vmatprep.mubr.bf16.mxu0 %v7007_v50  ;;  %v6872_v31 = vld [vmem:[%s9872_s3 + $0x100] ss:$8 sps:$4 sm:$0xff]   ;;  %v6880_v39 = vld [vmem:[%s9872_s3 + $0x1e4] ss:$8 sps:$4 sm:$0xff]  }
 0x1dc   :  { %3532 = vmatprep.mubr.bf16.mxu1 %v9907_v28  ;;  %v2641_v7 = vpop.f32.mrf.mxu0  ;;  %4254 = vmatpush1.bf16.msra.mxu0 %v6824_v4  ;;  %v7008_v4 = vld [vmem:[%s9870_s0 + $0xf0] ss:$28 sps:$4 sm:$0xff]  }
 0x1dd   :  { %v2834_v24 = vpop.f32.mrf.mxu1  ;;  %4447 = vmatpush1.bf16.msra.mxu1 %v6869_v62  ;;  %v8753_v9 = vpack.c.bf16 %v3737_v32, %v3733_v33  ;;  %v3738_v60 = vmax.f32 %v2829_v53, 0.0  ;;  %v2833_v2 = vadd.f32 %v2832_v3, %v2640_v29  ;;  %v2642_v40 = vadd.f32 %v2641_v7, %v8289_v11  ;;  %4255 = vmatprep.subr.bf16.mxu0 %v6832_v19  ;;  %v6833_v11 = vld [vmem:[%s9872_s3 + $0xf0] ss:$8 sps:$4 sm:$0xff]   ;;  %v7010_v3 = vld [vmem:[%s9870_s0 + $0x12c] ss:$28 sps:$4 sm:$0xff]   ;;  %v9911_v7 = vld [vmem:[#allocation6_spill] sm:$0xff] }
 0x1de   :  { %4448 = vmatprep.subr.bf16.mxu1 %v6874_v57  ;;  %v2643_v8 = vpop.f32.mrf.mxu0  ;;  %v7009_v62 = vld [vmem:[%s9870_s0 + $0xf8] ss:$28 sps:$4 sm:$0xff]   ;;  %v6839_v32 = vld [vmem:[%s9872_s3 + $0xe0] ss:$8 sps:$4 sm:$0xff]  }
 0x1df   :  { %v2836_v26 = vpop.f32.mrf.mxu1  ;;  %v2835_v58 = vadd.f32 %v2834_v24, %v2642_v40  ;;  %v2644_v42 = vadd.f32 %v2643_v8, %v9908_v45  ;;  %v8763_v35 = vpack.c.bf16 %v3738_v60, %v3734_v38  ;;  %v3741_v13 = vmax.f32 %v2833_v2, 0.0  ;;  %v9910_v57 = vld [vmem:[#allocation5_spill] sm:$0xff]  ;;  %v6878_v53 = vld [vmem:[%s9872_s3 + $0x1e0] ss:$8 sps:$4 sm:$0xff]  }
 0x1e0   :  { %v2645_v41 = vpop.f32.mrf.mxu0  ;;  %4256 = vmatpush1.bf16.msra.mxu0 %v6830_v18  ;;  %v6844_v18 = vld [vmem:[%s9872_s3 + $0xd4] ss:$8 sps:$4 sm:$0xff]   ;;  %v6842_v45 = vld [vmem:[%s9872_s3 + $0xd0] ss:$8 sps:$4 sm:$0xff]  }
 0x1e1   :  { %v2838_v10 = vpop.f32.mrf.mxu1  ;;  %4449 = vmatpush1.bf16.msra.mxu1 %v6872_v31  ;;  %v2837_v55 = vadd.f32 %v2836_v26, %v2644_v42  ;;  %v2646_v36 = vadd.f32 %v2645_v41, %v9909_v61  ;;  %4257 = vmatprep.subr.bf16.mxu0 %v6835_v21  ;;  %v3742_v20 = vmax.f32 %v2835_v58, 0.0  ;;  %v6883_v31 = vld [vmem:[%s9872_s3 + $0x1d4] ss:$8 sps:$4 sm:$0xff]   ;;  %v9912_v21 = vld [vmem:[#allocation7_spill] sm:$0xff]  ;;  %v6881_v42 = vld [vmem:[%s9872_s3 + $0x1d0] ss:$8 sps:$4 sm:$0xff]  }
 0x1e2   :  { %4450 = vmatprep.subr.bf16.mxu1 %v6877_v54  ;;  %v2649_v30 = vpop.f32.mrf.mxu0  ;;  %3340 = vmatmul.mubr.bf16.gmra.mxu0 %v7008_v4  ;;  %v9914_v4 = vld [vmem:[#allocation9_spill] sm:$0xff] }
 0x1e3   :  { %v2842_v56 = vpop.f32.mrf.mxu1  ;;  %3533 = vmatmul.mubr.bf16.gmra.mxu1 %v7009_v62  ;;  %v3745_v52 = vmax.f32 %v2837_v55, 0.0  ;;  %v2839_v19 = vadd.f32 %v2838_v10, %v2646_v36  ;;  %v2650_v5 = vadd.f32 %v2649_v30, %v9910_v57  ;;  %3349 = vmatprep.mubr.bf16.mxu0 %v7010_v3  ;;  %v9913_v10 = vld [vmem:[#allocation8_spill] sm:$0xff]  ;;  %v7011_v36 = vld [vmem:[%s9870_s0 + $0x128] ss:$28 sps:$4 sm:$0xff]  }
 0x1e4   :  { %3542 = vmatprep.mubr.bf16.mxu1 %v9907_v28  ;;  %v2651_v0 = vpop.f32.mrf.mxu0  ;;  %4258 = vmatpush2.bf16.msra.mxu0 %v6833_v11  ;;  %v6853_v3 = vld [vmem:[%s9872_s3 + $0xb4] ss:$8 sps:$4 sm:$0xff]  }
 0x1e5   :  { %v2844_v33 = vpop.f32.mrf.mxu1  ;;  %4451 = vmatpush2.bf16.msra.mxu1 %v6875_v46  ;;  %v8795_v29 = vpack.c.bf16 %v3745_v52, %v3741_v13  ;;  %v3746_v50 = vmax.f32 %v2839_v19, 0.0  ;;  %v2843_v38 = vadd.f32 %v2842_v56, %v2650_v5  ;;  %v2652_v24 = vadd.f32 %v2651_v0, %v9911_v7  ;;  %4259 = vmatprep.subr.bf16.mxu0 %v6841_v16  ;;  %v6850_v46 = vld [vmem:[%s9872_s3 + $0xc4] ss:$8 sps:$4 sm:$0xff]   ;;  %v6848_v5 = vld [vmem:[%s9872_s3 + $0xc0] ss:$8 sps:$4 sm:$0xff]  }
 0x1e6   :  { %4452 = vmatprep.subr.bf16.mxu1 %v6880_v39  ;;  %v2653_v60 = vpop.f32.mrf.mxu0  ;;  %v7012_v16 = vld [vmem:[%s9870_s0 + $0x130] ss:$28 sps:$4 sm:$0xff]   ;;  %v7013_v13 = vld [vmem:[%s9870_s0 + $0x164] ss:$28 sps:$4 sm:$0xff]  }
 0x1e7   :  { %v2846_v2 = vpop.f32.mrf.mxu1  ;;  %v2845_v40 = vadd.f32 %v2844_v33, %v2652_v24  ;;  %v2654_v54 = vadd.f32 %v2653_v60, %v9912_v21  ;;  %v8805_v8 = vpack.c.bf16 %v3746_v50, %v3742_v20  ;;  %v3749_v39 = vmax.f32 %v2843_v38, 0.0  ;;  %v6884_v50 = vld [vmem:[%s9872_s3 + $0x1c0] ss:$8 sps:$4 sm:$0xff]   ;;  %v6886_v38 = vld [vmem:[%s9872_s3 + $0x1c4] ss:$8 sps:$4 sm:$0xff]  }
 0x1e8   :  { %v2655_v26 = vpop.f32.mrf.mxu0  ;;  %4260 = vmatpush2.bf16.msra.mxu0 %v6839_v32  ;;  %v9915_v32 = vld [vmem:[#allocation10_spill] sm:$0xff] }
 0x1e9   :  { %v2848_v58 = vpop.f32.mrf.mxu1  ;;  %4453 = vmatpush2.bf16.msra.mxu1 %v6878_v53  ;;  %v2847_v41 = vadd.f32 %v2846_v2, %v2654_v54  ;;  %v2656_v11 = vadd.f32 %v2655_v26, %v9913_v10  ;;  %4261 = vmatprep.subr.bf16.mxu0 %v6844_v18  ;;  %v3750_v52 = vmax.f32 %v2845_v40, 0.0  ;;  %v6851_v54 = vld [vmem:[%s9872_s3 + $0xb0] ss:$8 sps:$4 sm:$0xff]  }
 0x1ea   :  { %4454 = vmatprep.subr.bf16.mxu1 %v6883_v31  ;;  %v2659_v55 = vpop.f32.mrf.mxu0  ;;  %3350 = vmatmul.mubr.bf16.gmra.mxu0 %v7011_v36  ;;  %v9916_v31 = vld [vmem:[#allocation11_spill] sm:$0xff] }
 0x1eb   :  { %v2852_v61 = vpop.f32.mrf.mxu1  ;;  %3543 = vmatmul.mubr.bf16.gmra.mxu1 %v7012_v16  ;;  %v3753_v30 = vmax.f32 %v2847_v41, 0.0  ;;  %v2849_v56 = vadd.f32 %v2848_v58, %v2656_v11  ;;  %v2660_v62 = vadd.f32 %v2659_v55, %v9914_v4  ;;  %3359 = vmatprep.mubr.bf16.mxu0 %v7013_v13  ;;  %v9917_v58 = vld [vmem:[#allocation12_spill] sm:$0xff]  ;;  %v7014_v11 = vld [vmem:[%s9870_s0 + $0x160] ss:$28 sps:$4 sm:$0xff]  }
 0x1ec   :  { %3552 = vmatprep.mubr.bf16.mxu1 %v9907_v28  ;;  %v2661_v19 = vpop.f32.mrf.mxu0  ;;  %4262 = vmatpush2.bf16.msra.mxu0 %v6842_v45  ;;  %v9918_v16 = vld [vmem:[#allocation13_spill] sm:$0xff]  ;;  %v6857_v13 = vld [vmem:[%s9872_s3 + $0xa0] ss:$8 sps:$4 sm:$0xff]  }
 0x1ed   :  { %v2854_v57 = vpop.f32.mrf.mxu1  ;;  %4455 = vmatpush2.bf16.msra.mxu1 %v6881_v42  ;;  %v8834_v20 = vpack.c.bf16 %v3753_v30, %v3749_v39  ;;  %v3754_v0 = vmax.f32 %v2849_v56, 0.0  ;;  %v2853_v33 = vadd.f32 %v2852_v61, %v2660_v62  ;;  %v2662_v53 = vadd.f32 %v2661_v19, %v9915_v32  ;;  %4263 = vmatprep.subr.bf16.mxu0 %v6850_v46  ;;  %v6859_v42 = vld [vmem:[%s9872_s3 + $0xa4] ss:$8 sps:$4 sm:$0xff]   ;;  %v7016_v30 = vld [vmem:[%s9870_s0 + $0x19c] ss:$28 sps:$4 sm:$0xff]  }
 0x1ee   :  { %v2663_v7 = vpop.f32.mrf.mxu0  ;;  %4456 = vmatprep.subr.bf16.mxu1 %v6886_v38  ;;  %v7015_v46 = vld [vmem:[%s9870_s0 + $0x168] ss:$28 sps:$4 sm:$0xff]   ;;  %v6889_v32 = vld [vmem:[%s9872_s3 + $0x1b4] ss:$8 sps:$4 sm:$0xff]  }
 0x1ef   :  { %v2856_v24 = vpop.f32.mrf.mxu1  ;;  %v2855_v18 = vadd.f32 %v2854_v57, %v2662_v53  ;;  %v2664_v60 = vadd.f32 %v2663_v7, %v9916_v31  ;;  %v8844_v2 = vpack.c.bf16 %v3754_v0, %v3750_v52  ;;  %v3757_v55 = vmax.f32 %v2853_v33, 0.0  ;;  %v6862_v52 = vld [vmem:[%s9872_s3 + $0x94] ss:$8 sps:$4 sm:$0xff]   ;;  %v6887_v33 = vld [vmem:[%s9872_s3 + $0x1b0] ss:$8 sps:$4 sm:$0xff]   ;;  %v9921_v7 = vld [vmem:[#allocation15_spill] sm:$0xff] }
 0x1f0   :  { %v2665_v40 = vpop.f32.mrf.mxu0  ;;  %4264 = vmatpush2.bf16.msra.mxu0 %v6848_v5 }
 0x1f1   :  { %v2858_v21 = vpop.f32.mrf.mxu1  ;;  %4457 = vmatpush2.bf16.msra.mxu1 %v6884_v50  ;;  %v2857_v26 = vadd.f32 %v2856_v24, %v2664_v60  ;;  %v2666_v45 = vadd.f32 %v2665_v40, %v9917_v58  ;;  %4265 = vmatprep.subr.bf16.mxu0 %v6853_v3  ;;  %v3758_v56 = vmax.f32 %v2855_v18, 0.0  ;;  %v9920_v3 = vld [vmem:[#allocation14_spill] sm:$0xff]  ;;  %v6860_v40 = vld [vmem:[%s9872_s3 + $0x90] ss:$8 sps:$4 sm:$0xff]  }
 0x1f2   :  { %v2669_v41 = vpop.f32.mrf.mxu0  ;;  %3360 = vmatmul.mubr.bf16.gmra.mxu0 %v7014_v11  ;;  %4458 = vmatprep.subr.bf16.mxu1 %v6889_v32  ;;  %v6868_v58 = vld [vmem:[%s9872_s3 + $0x84] ss:$8 sps:$4 sm:$0xff]   ;;  %v6890_v32 = vld [vmem:[%s9872_s3 + $0x1a0] ss:$8 sps:$4 sm:$0xff]  }
 0x1f3   :  { %v2862_v10 = vpop.f32.mrf.mxu1  ;;  %3553 = vmatmul.mubr.bf16.gmra.mxu1 %v7015_v46  ;;  %v3761_v61 = vmax.f32 %v2857_v26, 0.0  ;;  %v2859_v36 = vadd.f32 %v2858_v21, %v2666_v45  ;;  %v2670_v39 = vadd.f32 %v2669_v41, %v9918_v16  ;;  %3369 = vmatprep.mubr.bf16.mxu0 %v7016_v30  ;;  %v7017_v41 = vld [vmem:[%s9870_s0 + $0x198] ss:$28 sps:$4 sm:$0xff]   ;;  %v9923_v11 = vld [vmem:[#allocation2_spill] sm:$0xff] }
 0x1f4   :  { %3562 = vmatprep.mubr.bf16.mxu1 %v9907_v28  ;;  %v2671_v4 = vpop.f32.mrf.mxu0  ;;  %4266 = vmatpush2.bf16.msra.mxu0 %v6851_v54  ;;  %v9922_v54 = vld [vmem:[#allocation16_spill] sm:$0xff]  ;;  %v403_v46 = vsub.s32 2, %v9923_v11  ;;  %v9924_v16 = vld [vmem:[#allocation17_spill] sm:$0xff] }
 0x1f5   :  { %v2864_v62 = vpop.f32.mrf.mxu1  ;;  %v8870_v19 = vpack.c.bf16 %v3761_v61, %v3757_v55  ;;  %v3762_v57 = vmax.f32 %v2859_v36, 0.0  ;;  %v2863_v5 = vadd.f32 %v2862_v10, %v2670_v39  ;;  %v2672_v0 = vadd.f32 %v2671_v4, %v9920_v3  ;;  %4267 = vmatprep.subr.bf16.mxu0 %v6859_v42  ;;  %4459 = vmatpush2.bf16.msra.mxu1 %v6887_v33  ;;  %v7018_v10 = vld [vmem:[%s9870_s0 + $0x1a0] ss:$28 sps:$4 sm:$0xff]   ;;  %v7019_v30 = vld [vmem:[%s9870_s0 + $0x1d4] ss:$28 sps:$4 sm:$0xff]  }
 0x1f6   :  { %v2673_v53 = vpop.f32.mrf.mxu0 }
 0x1f7   :  { %9919 = vst [vmem:[#allocation3_spill] sm:$0xff] %v8870_v19  ;;  %v2866_v50 = vpop.f32.mrf.mxu1  ;;  %v2865_v38 = vadd.f32 %v2864_v62, %v2672_v0  ;;  %v2674_v24 = vadd.f32 %v2673_v53, %v9921_v7  ;;  %v8880_v18 = vpack.c.bf16 %v3762_v57, %v3758_v56  ;;  %v3765_v55 = vmax.f32 %v2863_v5, 0.0  ;;  %v9926_v0 = vld [vmem:[#allocation18_spill] sm:$0xff] }
 0x1f8   :  { %v2675_v31 = vpop.f32.mrf.mxu0  ;;  %4268 = vmatpush2.bf16.msra.mxu0 %v6857_v13  ;;  %v407_v13 = vsub.s32 3, %v9923_v11  ;;  %v6892_v53 = vld [vmem:[%s9872_s3 + $0x1a4] ss:$8 sps:$4 sm:$0xff]  }
 0x1f9   :  { %v2868_v60 = vpop.f32.mrf.mxu1  ;;  %v2867_v21 = vadd.f32 %v2866_v50, %v2674_v24  ;;  %v2676_v26 = vadd.f32 %v2675_v31, %v9922_v54  ;;  %4269 = vmatprep.subr.bf16.mxu0 %v6862_v52  ;;  %v3766_v56 = vmax.f32 %v2865_v38, 0.0  ;;  %v6866_v52 = vld [vmem:[%s9872_s3 + $0x80] ss:$8 sps:$4 sm:$0xff]   ;;  %4460 = vmatprep.subr.bf16.mxu1 %v6892_v53 }
 0x1fa   :  { %v2679_v45 = vpop.f32.mrf.mxu0  ;;  %3370 = vmatmul.mubr.bf16.gmra.mxu0 %v7017_v41  ;;  %v9927_v24 = vld [vmem:[#allocation19_spill] sm:$0xff]  ;;  %4461 = vmatpush2.bf16.msra.mxu1 %v6890_v32 }
 0x1fb   :  { %v2872_v42 = vpop.f32.mrf.mxu1  ;;  %3563 = vmatmul.mubr.bf16.gmra.mxu1 %v7018_v10  ;;  %v3769_v61 = vmax.f32 %v2867_v21, 0.0  ;;  %v2869_v36 = vadd.f32 %v2868_v60, %v2676_v26  ;;  %v2680_v39 = vadd.f32 %v2679_v45, %v9924_v16  ;;  %3379 = vmatprep.mubr.bf16.mxu0 %v7019_v30  ;;  %v7020_v60 = vld [vmem:[%s9871_s2] sm:$0xf]  ;;  %v9929_v45 = vld [vmem:[#allocation20_spill] sm:$0xff] }
 0x1fc   :  { %3572 = vmatprep.mubr.bf16.mxu1 %v9907_v28  ;;  %v2681_v4 = vpop.f32.mrf.mxu0  ;;  %4270 = vmatpush2.bf16.msra.mxu0 %v6860_v40  ;;  %v8918_v40 = vrot.slane %v7020_v60, %v403_v46  ;;  %v8923_v41 = vrot.slane %v7020_v60, %v407_v13  ;;  %v7022_v46 = vld [vmem:[%s9870_s0 + $0x1d8] ss:$28 sps:$4 sm:$0xff]  }
 0x1fd   :  { %v2874_v62 = vpop.f32.mrf.mxu1  ;;  %v8905_v57 = vpack.c.bf16 %v3769_v61, %v3765_v55  ;;  %v3770_v5 = vmax.f32 %v2869_v36, 0.0  ;;  %v2873_v3 = vadd.f32 %v2872_v42, %v2680_v39  ;;  %v2682_v33 = vadd.f32 %v2681_v4, %v9926_v0  ;;  %4271 = vmatprep.subr.bf16.mxu0 %v6868_v58  ;;  %v7021_v61 = vld [vmem:[%s9870_s0 + $0x1d0] ss:$28 sps:$4 sm:$0xff]  }
 0x1fe   :  { %v2683_v50 = vpop.f32.mrf.mxu0  ;;  %v6893_v60 = vld [vmem:[%s9872_s3 + $0x190] ss:$8 sps:$4 sm:$0xff]  }
 0x1ff   :  { %9925 = vst [vmem:[#allocation4_spill] sm:$0xff] %v8905_v57  ;;  %v2876_v38 = vpop.f32.mrf.mxu1  ;;  %v2875_v7 = vadd.f32 %v2874_v62, %v2682_v33  ;;  %v2684_v31 = vadd.f32 %v2683_v50, %v9927_v24  ;;  %v8920_v21 = vpack.c.bf16 %v3770_v5, %v3766_v56  ;;  %v3773_v36 = vmax.f32 %v2873_v3, 0.0  ;;  %v7023_v56 = vld [vmem:[%s9870_s0 + $0x20c] ss:$28 sps:$4 sm:$0xff]  }
 0x200   :  { %v2685_v54 = vpop.f32.mrf.mxu0  ;;  %4272 = vmatpush2.bf16.msra.mxu0 %v6866_v52 }
 0x201   :  { %9928 = vst [vmem:[#allocation5_spill] sm:$0xff] %v8920_v21  ;;  %v2878_v26 = vpop.f32.mrf.mxu1  ;;  %v2877_v58 = vadd.f32 %v2876_v38, %v2684_v31  ;;  %v2686_v42 = vadd.f32 %v2685_v54, %v9929_v45  ;;  %v3774_v4 = vmax.f32 %v2875_v7, 0.0  ;;  %v6895_v38 = vld [vmem:[%s9872_s3 + $0x194] ss:$8 sps:$4 sm:$0xff]  }
 0x202   :  { %v2915_v10 = vpop.f32.mrf.mxu0  ;;  %3380 = vmatmul.mubr.bf16.gmra.mxu0 %v7021_v61  ;;  %4462 = vmatprep.subr.bf16.mxu1 %v6895_v38 }
 0x203   :  { %v3108_v55 = vpop.f32.mrf.mxu1  ;;  %3573 = vmatmul.mubr.bf16.gmra.mxu1 %v7022_v46  ;;  %v3777_v16 = vmax.f32 %v2877_v58, 0.0  ;;  %v2879_v39 = vadd.f32 %v2878_v26, %v2686_v42  ;;  %v2916_v30 = vadd.f32 %v2915_v10, %v8918_v40  ;;  %3389 = vmatprep.mubr.bf16.mxu0 %v7023_v56  ;;  %v7024_v42 = vld [vmem:[%s9870_s0 + $0x208] ss:$28 sps:$4 sm:$0xff]   ;;  %v7025_v10 = vld [vmem:[%s9870_s0 + $0x210] ss:$28 sps:$4 sm:$0xff]  }
 0x204   :  { %3582 = vmatprep.mubr.bf16.mxu1 %v9907_v28  ;;  %v2917_v62 = vpop.f32.mrf.mxu0  ;;  %v7026_v46 = vld [vmem:[%s9870_s0 + $0x244] ss:$28 sps:$4 sm:$0xff]   ;;  %4463 = vmatpush2.bf16.msra.mxu1 %v6893_v60 }
 0x205   :  { %v3110_v13 = vpop.f32.mrf.mxu1  ;;  %v8936_v52 = vpack.c.bf16 %v3777_v16, %v3773_v36  ;;  %v3778_v5 = vmax.f32 %v2879_v39, 0.0  ;;  %v8938_v0 = vadd.f32 %v3108_v55, %v2916_v30  ;;  %v2918_v3 = vadd.f32 %v2917_v62, %v8923_v41  ;;  %v6898_v39 = vld [vmem:[%s9872_s3 + $0x184] ss:$8 sps:$4 sm:$0xff]   ;;  %v7027_v60 = vld [vmem:[%s9870_s0 + $0x240] ss:$28 sps:$4 sm:$0xff]  }
 0x206   :  { %v2919_v33 = vpop.f32.mrf.mxu0  ;;  %4464 = vmatprep.subr.bf16.mxu1 %v6898_v39 }
 0x207   :  { %9930 = vst [vmem:[#allocation6_spill] sm:$0xff] %v8936_v52  ;;  %v3112_v32 = vpop.f32.mrf.mxu1  ;;  %v8941_v53 = vadd.f32 %v3110_v13, %v2918_v3  ;;  %v2920_v50 = vadd.f32 %v2919_v33, %v8918_v40  ;;  %v8947_v7 = vpack.c.bf16 %v3778_v5, %v3774_v4  ;;  %v6896_v4 = vld [vmem:[%s9872_s3 + $0x180] ss:$8 sps:$4 sm:$0xff]  }
 0x208   :  { %v2921_v24 = vpop.f32.mrf.mxu0  ;;  %4465 = vmatpush2.bf16.msra.mxu1 %v6896_v4 }
 0x209   :  { %9931 = vst [vmem:[#allocation7_spill] sm:$0xff] %v8947_v7  ;;  %v3114_v31 = vpop.f32.mrf.mxu1  ;;  %v8952_v54 = vadd.f32 %v3112_v32, %v2920_v50  ;;  %v2922_v26 = vadd.f32 %v2921_v24, %v8923_v41 }
 0x20a   :  { %v2925_v58 = vpop.f32.mrf.mxu0  ;;  %3390 = vmatmul.mubr.bf16.gmra.mxu0 %v7024_v42  ;;  %v7029_v42 = vld [vmem:[%s9870_s0 + $0x27c] ss:$28 sps:$4 sm:$0xff]  }
 0x20b   :  { %v3118_v45 = vpop.f32.mrf.mxu1  ;;  %3583 = vmatmul.mubr.bf16.gmra.mxu1 %v7025_v10  ;;  %v8961_v55 = vadd.f32 %v3114_v31, %v2922_v26  ;;  %v2926_v61 = vadd.f32 %v2925_v58, %v8918_v40  ;;  %3399 = vmatprep.mubr.bf16.mxu0 %v7026_v46  ;;  %v7028_v26 = vld [vmem:[%s9870_s0 + $0x248] ss:$28 sps:$4 sm:$0xff]  }
 0x20c   :  { %3592 = vmatprep.mubr.bf16.mxu1 %v9907_v28  ;;  %v2927_v36 = vpop.f32.mrf.mxu0 }
 0x20d   :  { %v3120_v16 = vpop.f32.mrf.mxu1  ;;  %v8971_v30 = vadd.f32 %v3118_v45, %v2926_v61  ;;  %v2928_v56 = vadd.f32 %v2927_v36, %v8923_v41 }
 0x20e   :  { %v2929_v62 = vpop.f32.mrf.mxu0 }
 0x20f   :  { %v3122_v13 = vpop.f32.mrf.mxu1  ;;  %v8977_v5 = vadd.f32 %v3120_v16, %v2928_v56  ;;  %v2930_v3 = vadd.f32 %v2929_v62, %v8918_v40 }
 0x210   :  { %v2931_v33 = vpop.f32.mrf.mxu0 }
 0x211   :  { %v3124_v32 = vpop.f32.mrf.mxu1  ;;  %v8980_v50 = vadd.f32 %v3122_v13, %v2930_v3  ;;  %v2932_v38 = vadd.f32 %v2931_v33, %v8923_v41 }
 0x212   :  { %v2935_v24 = vpop.f32.mrf.mxu0  ;;  %3400 = vmatmul.mubr.bf16.gmra.mxu0 %v7027_v60 }
 0x213   :  { %v3128_v31 = vpop.f32.mrf.mxu1  ;;  %3593 = vmatmul.mubr.bf16.gmra.mxu1 %v7028_v26  ;;  %v8989_v58 = vadd.f32 %v3124_v32, %v2932_v38  ;;  %v2936_v45 = vadd.f32 %v2935_v24, %v8918_v40  ;;  %3409 = vmatprep.mubr.bf16.mxu0 %v7029_v42  ;;  %v7030_v24 = vld [vmem:[%s9870_s0 + $0x278] ss:$28 sps:$4 sm:$0xff]  }
 0x214   :  { %3602 = vmatprep.mubr.bf16.mxu1 %v9907_v28  ;;  %v2937_v10 = vpop.f32.mrf.mxu0 }
 0x215   :  { %v3130_v61 = vpop.f32.mrf.mxu1  ;;  %v8996_v46 = vadd.f32 %v3128_v31, %v2936_v45  ;;  %v2938_v36 = vadd.f32 %v2937_v10, %v8923_v41  ;;  %v7031_v31 = vld [vmem:[%s9870_s0 + $0x280] ss:$28 sps:$4 sm:$0xff]   ;;  %v7032_v45 = vld [vmem:[%s9870_s0 + $0x2b4] ss:$28 sps:$4 sm:$0xff]  }
 0x216   :  { %v2939_v16 = vpop.f32.mrf.mxu0 }
 0x217   :  { %v3132_v39 = vpop.f32.mrf.mxu1  ;;  %v8999_v56 = vadd.f32 %v3130_v61, %v2938_v36  ;;  %v2940_v4 = vadd.f32 %v2939_v16, %v8918_v40 }
 0x218   :  { %v2941_v62 = vpop.f32.mrf.mxu0 }
 0x219   :  { %v3134_v13 = vpop.f32.mrf.mxu1  ;;  %v9002_v3 = vadd.f32 %v3132_v39, %v2940_v4  ;;  %v2942_v33 = vadd.f32 %v2941_v62, %v8923_v41 }
 0x21a   :  { %v2945_v32 = vpop.f32.mrf.mxu0  ;;  %3410 = vmatmul.mubr.bf16.gmra.mxu0 %v7030_v24 }
 0x21b   :  { %v3138_v38 = vpop.f32.mrf.mxu1  ;;  %3603 = vmatmul.mubr.bf16.gmra.mxu1 %v7031_v31  ;;  %v9011_v60 = vadd.f32 %v3134_v13, %v2942_v33  ;;  %v2946_v26 = vadd.f32 %v2945_v32, %v8918_v40  ;;  %3419 = vmatprep.mubr.bf16.mxu0 %v7032_v45 }
 0x21c   :  { %3612 = vmatprep.mubr.bf16.mxu1 %v9907_v28  ;;  %v2947_v42 = vpop.f32.mrf.mxu0 }
 0x21d   :  { %v3140_v10 = vpop.f32.mrf.mxu1  ;;  %v9018_v61 = vadd.f32 %v3138_v38, %v2946_v26  ;;  %v2948_v36 = vadd.f32 %v2947_v42, %v8923_v41  ;;  %v7033_v38 = vld [vmem:[%s9870_s0 + $0x2b0] ss:$28 sps:$4 sm:$0xff]   ;;  %v7034_v26 = vld [vmem:[%s9870_s0 + $0x2b8] ss:$28 sps:$4 sm:$0xff]  }
 0x21e   :  { %v2949_v16 = vpop.f32.mrf.mxu0 }
 0x21f   :  { %v3142_v39 = vpop.f32.mrf.mxu1  ;;  %v9021_v4 = vadd.f32 %v3140_v10, %v2948_v36  ;;  %v2950_v62 = vadd.f32 %v2949_v16, %v8918_v40  ;;  %v7035_v36 = vld [vmem:[%s9870_s0 + $0x2ec] ss:$28 sps:$4 sm:$0xff]  }
 0x220   :  { %v2951_v13 = vpop.f32.mrf.mxu0 }
 0x221   :  { %v3144_v33 = vpop.f32.mrf.mxu1  ;;  %v9024_v32 = vadd.f32 %v3142_v39, %v2950_v62  ;;  %v2952_v24 = vadd.f32 %v2951_v13, %v8923_v41 }
 0x222   :  { %v2955_v31 = vpop.f32.mrf.mxu0  ;;  %3420 = vmatmul.mubr.bf16.gmra.mxu0 %v7033_v38 }
 0x223   :  { %v3148_v45 = vpop.f32.mrf.mxu1  ;;  %3613 = vmatmul.mubr.bf16.gmra.mxu1 %v7034_v26  ;;  %v9033_v42 = vadd.f32 %v3144_v33, %v2952_v24  ;;  %v2956_v10 = vadd.f32 %v2955_v31, %v8918_v40  ;;  %3429 = vmatprep.mubr.bf16.mxu0 %v7035_v36 }
 0x224   :  { %3622 = vmatprep.mubr.bf16.mxu1 %v9907_v28  ;;  %v2957_v16 = vpop.f32.mrf.mxu0 }
 0x225   :  { %v3150_v39 = vpop.f32.mrf.mxu1  ;;  %v9040_v62 = vadd.f32 %v3148_v45, %v2956_v10  ;;  %v2958_v13 = vadd.f32 %v2957_v16, %v8923_v41  ;;  %v7036_v45 = vld [vmem:[%s9870_s0 + $0x2e8] ss:$28 sps:$4 sm:$0xff]   ;;  %v7037_v10 = vld [vmem:[%s9870_s0 + $0x2f0] ss:$28 sps:$4 sm:$0xff]  }
 0x226   :  { %v2959_v38 = vpop.f32.mrf.mxu0 }
 0x227   :  { %v3152_v11 = vpop.f32.mrf.mxu1  ;;  %v9043_v26 = vadd.f32 %v3150_v39, %v2958_v13  ;;  %v2960_v33 = vadd.f32 %v2959_v38, %v8918_v40  ;;  %v7038_v39 = vld [vmem:[%s9870_s0 + $0x324] ss:$28 sps:$4 sm:$0xff]  }
 0x228   :  { %v9046_v24 = vpop.f32.mrf.mxu0 }
 0x229   :  { %v9048_v31 = vpop.f32.mrf.mxu1  ;;  %v9050_v52 = vadd.f32 %v3152_v11, %v2960_v33 }
 0x22a   :  { %9932 = vst [vmem:[#allocation8_spill] sm:$0xff] %v9048_v31  ;;  %v2965_v36 = vpop.f32.mrf.mxu0  ;;  %3430 = vmatmul.mubr.bf16.gmra.mxu0 %v7036_v45 }
 0x22b   :  { %9933 = vst [vmem:[#allocation9_spill] sm:$0xff] %v9050_v52  ;;  %v3158_v7 = vpop.f32.mrf.mxu1  ;;  %3623 = vmatmul.mubr.bf16.gmra.mxu1 %v7037_v10  ;;  %v2966_v16 = vadd.f32 %v2965_v36, %v8918_v40  ;;  %3439 = vmatprep.mubr.bf16.mxu0 %v7038_v39 }
 0x22c   :  { %3632 = vmatprep.mubr.bf16.mxu1 %v9907_v28  ;;  %v2967_v11 = vpop.f32.mrf.mxu0 }
 0x22d   :  { %v3160_v13 = vpop.f32.mrf.mxu1  ;;  %v9063_v38 = vadd.f32 %v3158_v7, %v2966_v16  ;;  %v2968_v33 = vadd.f32 %v2967_v11, %v8923_v41  ;;  %v7039_v7 = vld [vmem:[%s9870_s0 + $0x320] ss:$28 sps:$4 sm:$0xff]   ;;  %v7040_v16 = vld [vmem:[%s9870_s0 + $0x328] ss:$28 sps:$4 sm:$0xff]  }
 0x22e   :  { %v2969_v45 = vpop.f32.mrf.mxu0 }
 0x22f   :  { %9934 = vst [vmem:[#allocation10_spill] sm:$0xff] %v9063_v38  ;;  %v3162_v57 = vpop.f32.mrf.mxu1  ;;  %v9066_v21 = vadd.f32 %v3160_v13, %v2968_v33  ;;  %v2970_v10 = vadd.f32 %v2969_v45, %v8918_v40  ;;  %v7041_v13 = vld [vmem:[%s9870_s0 + $0x35c] ss:$28 sps:$4 sm:$0xff]  }
 0x230   :  { %v9069_v36 = vpop.f32.mrf.mxu0 }
 0x231   :  { %9935 = vst [vmem:[#allocation11_spill] sm:$0xff] %v9066_v21  ;;  %v9071_v19 = vpop.f32.mrf.mxu1  ;;  %v9073_v52 = vadd.f32 %v3162_v57, %v2970_v10 }
 0x232   :  { %9936 = vst [vmem:[#allocation12_spill] sm:$0xff] %v9071_v19  ;;  %v2975_v39 = vpop.f32.mrf.mxu0  ;;  %3440 = vmatmul.mubr.bf16.gmra.mxu0 %v7039_v7 }
 0x233   :  { %9937 = vst [vmem:[#allocation13_spill] sm:$0xff] %v9073_v52  ;;  %v3168_v31 = vpop.f32.mrf.mxu1  ;;  %3633 = vmatmul.mubr.bf16.gmra.mxu1 %v7040_v16  ;;  %v2976_v11 = vadd.f32 %v2975_v39, %v8918_v40  ;;  %3449 = vmatprep.mubr.bf16.mxu0 %v7041_v13 }
 0x234   :  { %3642 = vmatprep.mubr.bf16.mxu1 %v9907_v28  ;;  %v2977_v57 = vpop.f32.mrf.mxu0 }
 0x235   :  { %v3170_v33 = vpop.f32.mrf.mxu1  ;;  %v9086_v45 = vadd.f32 %v3168_v31, %v2976_v11  ;;  %v2978_v10 = vadd.f32 %v2977_v57, %v8923_v41  ;;  %v7042_v31 = vld [vmem:[%s9870_s0 + $0x358] ss:$28 sps:$4 sm:$0xff]   ;;  %v7043_v11 = vld [vmem:[%s9870_s0 + $0x360] ss:$28 sps:$4 sm:$0xff]  }
 0x236   :  { %v2979_v7 = vpop.f32.mrf.mxu0 }
 0x237   :  { %9938 = vst [vmem:[#allocation14_spill] sm:$0xff] %v9086_v45  ;;  %v3172_v52 = vpop.f32.mrf.mxu1  ;;  %v9089_v19 = vadd.f32 %v3170_v33, %v2978_v10  ;;  %v2980_v16 = vadd.f32 %v2979_v7, %v8918_v40 }
 0x238   :  { %v9092_v39 = vpop.f32.mrf.mxu0 }
 0x239   :  { %9939 = vst [vmem:[#allocation15_spill] sm:$0xff] %v9089_v19  ;;  %v9094_v21 = vpop.f32.mrf.mxu1  ;;  %v9096_v38 = vadd.f32 %v3172_v52, %v2980_v16 }
 0x23a   :  { %9940 = vst [vmem:[#allocation16_spill] sm:$0xff] %v9094_v21  ;;  %v2985_v13 = vpop.f32.mrf.mxu0  ;;  %3450 = vmatmul.mubr.bf16.gmra.mxu0 %v7042_v31 }
 0x23b   :  { %9941 = vst [vmem:[#allocation17_spill] sm:$0xff] %v9096_v38  ;;  %v3178_v28 = vpop.f32.mrf.mxu1  ;;  %3643 = vmatmul.mubr.bf16.gmra.mxu1 %v7043_v11  ;;  %v2986_v57 = vadd.f32 %v2985_v13, %v8918_v40  ;;  %4273 = vmatprep.mubr.bf16.mxu0 %v8474_v6 }
 0x23c   :  { %v2987_v33 = vpop.f32.mrf.mxu0 }
 0x23d   :  { %v3180_v10 = vpop.f32.mrf.mxu1  ;;  %v9106_v52 = vadd.f32 %v3178_v28, %v2986_v57  ;;  %v2988_v7 = vadd.f32 %v2987_v33, %v8923_v41 }
 0x23e   :  { %v2989_v16 = vpop.f32.mrf.mxu0 }
 0x23f   :  { %9942 = vst [vmem:[#allocation18_spill] sm:$0xff] %v9106_v52  ;;  %v3182_v38 = vpop.f32.mrf.mxu1  ;;  %v9109_v21 = vadd.f32 %v3180_v10, %v2988_v7  ;;  %v2990_v31 = vadd.f32 %v2989_v16, %v8918_v40 }
 0x240   :  { %v9112_v19 = vpop.f32.mrf.mxu0 }
 0x241   :  { %9943 = vst [vmem:[#allocation19_spill] sm:$0xff] %v9109_v21  ;;  %v9114_v45 = vpop.f32.mrf.mxu1  ;;  %v9116_v11 = vadd.f32 %v3182_v38, %v2990_v31 }
 0x242   :  { %v2995_v13 = vpop.f32.mrf.mxu0  ;;  %4274 = vmatmul.mubr.bf16.vlgmr.msra.gmra.mxu0 %v8470_v15 }
 0x243   :  { %9944 = vst [vmem:[#allocation20_spill] sm:$0xff] %v9116_v11  ;;  %v3188_v6 = vpop.f32.mrf.mxu1  ;;  %v2996_v28 = vadd.f32 %v2995_v13, %v8918_v40  ;;  %4283 = vmatprep.mubr.bf16.mxu0 %v8497_v43 }
 0x244   :  { %v2997_v57 = vpop.f32.mrf.mxu0 }
 0x245   :  { %v3190_v33 = vpop.f32.mrf.mxu1  ;;  %v9121_v10 = vadd.f32 %v3188_v6, %v2996_v28  ;;  %v2998_v7 = vadd.f32 %v2997_v57, %v8923_v41 }
 0x246   :  { %v2999_v16 = vpop.f32.mrf.mxu0 }
 0x247   :  { %9945 = vst [vmem:[#allocation21_spill] sm:$0xff] %v9121_v10  ;;  %v3192_v21 = vpop.f32.mrf.mxu1  ;;  %v9124_v52 = vadd.f32 %v3190_v33, %v2998_v7  ;;  %v3000_v38 = vadd.f32 %v2999_v16, %v8918_v40 }
 0x248   :  { %v9127_v31 = vpop.f32.mrf.mxu0 }
 0x249   :  { %9946 = vst [vmem:[#allocation22_spill] sm:$0xff] %v9124_v52  ;;  %v9129_v11 = vpop.f32.mrf.mxu1  ;;  %v9131_v15 = vadd.f32 %v3192_v21, %v3000_v38 }
 0x24a   :  { %v3005_v13 = vpop.f32.mrf.mxu0  ;;  %4284 = vmatmul.mubr.bf16.gmra.mxu0 %v8490_v12 }
 0x24b   :  { %9947 = vst [vmem:[#allocation23_spill] sm:$0xff] %v9131_v15  ;;  %v3198_v43 = vpop.f32.mrf.mxu1  ;;  %v3006_v6 = vadd.f32 %v3005_v13, %v8918_v40  ;;  %4293 = vmatprep.mubr.bf16.mxu0 %v8517_v34 }
 0x24c   :  { %v3007_v28 = vpop.f32.mrf.mxu0 }
 0x24d   :  { %v3200_v57 = vpop.f32.mrf.mxu1  ;;  %v9136_v33 = vadd.f32 %v3198_v43, %v3006_v6  ;;  %v3008_v7 = vadd.f32 %v3007_v28, %v8923_v41 }
 0x24e   :  { %v3009_v16 = vpop.f32.mrf.mxu0 }
 0x24f   :  { %9948 = vst [vmem:[#allocation24_spill] sm:$0xff] %v9136_v33  ;;  %v3202_v52 = vpop.f32.mrf.mxu1  ;;  %v9139_v10 = vadd.f32 %v3200_v57, %v3008_v7  ;;  %v3010_v21 = vadd.f32 %v3009_v16, %v8918_v40 }
 0x250   :  { %v9142_v38 = vpop.f32.mrf.mxu0 }
 0x251   :  { %9949 = vst [vmem:[#allocation25_spill] sm:$0xff] %v9139_v10  ;;  %v9144_v15 = vpop.f32.mrf.mxu1  ;;  %v9146_v12 = vadd.f32 %v3202_v52, %v3010_v21 }
 0x252   :  { %v3015_v13 = vpop.f32.mrf.mxu0  ;;  %4294 = vmatmul.mubr.bf16.gmra.mxu0 %v8513_v1 }
 0x253   :  { %9950 = vst [vmem:[#allocation26_spill] sm:$0xff] %v9146_v12  ;;  %v3208_v34 = vpop.f32.mrf.mxu1  ;;  %v3016_v43 = vadd.f32 %v3015_v13, %v8918_v40  ;;  %4303 = vmatprep.mubr.bf16.mxu0 %v8537_v27 }
 0x254   :  { %v3017_v6 = vpop.f32.mrf.mxu0 }
 0x255   :  { %v3210_v28 = vpop.f32.mrf.mxu1  ;;  %v9151_v57 = vadd.f32 %v3208_v34, %v3016_v43  ;;  %v3018_v7 = vadd.f32 %v3017_v6, %v8923_v41 }
 0x256   :  { %v3019_v16 = vpop.f32.mrf.mxu0 }
 0x257   :  { %9951 = vst [vmem:[#allocation27_spill] sm:$0xff] %v9151_v57  ;;  %v3212_v10 = vpop.f32.mrf.mxu1  ;;  %v9154_v33 = vadd.f32 %v3210_v28, %v3018_v7  ;;  %v3020_v52 = vadd.f32 %v3019_v16, %v8918_v40 }
 0x258   :  { %v9157_v21 = vpop.f32.mrf.mxu0 }
 0x259   :  { %9952 = vst [vmem:[#allocation28_spill] sm:$0xff] %v9154_v33  ;;  %v9159_v12 = vpop.f32.mrf.mxu1  ;;  %v9161_v1 = vadd.f32 %v3212_v10, %v3020_v52 }
 0x25a   :  { %v3025_v13 = vpop.f32.mrf.mxu0  ;;  %4304 = vmatmul.mubr.bf16.gmra.mxu0 %v8533_v63 }
 0x25b   :  { %9953 = vst [vmem:[#allocation29_spill] sm:$0xff] %v9161_v1  ;;  %v3218_v27 = vpop.f32.mrf.mxu1  ;;  %v3026_v34 = vadd.f32 %v3025_v13, %v8918_v40  ;;  %4313 = vmatprep.mubr.bf16.mxu0 %v8557_v48 }
 0x25c   :  { %v3027_v43 = vpop.f32.mrf.mxu0 }
 0x25d   :  { %v3220_v6 = vpop.f32.mrf.mxu1  ;;  %v9166_v28 = vadd.f32 %v3218_v27, %v3026_v34  ;;  %v3028_v7 = vadd.f32 %v3027_v43, %v8923_v41 }
 0x25e   :  { %v3029_v16 = vpop.f32.mrf.mxu0 }
 0x25f   :  { %v3222_v33 = vpop.f32.mrf.mxu1  ;;  %v9169_v57 = vadd.f32 %v3220_v6, %v3028_v7  ;;  %v3030_v10 = vadd.f32 %v3029_v16, %v8918_v40 }
 0x260   :  { %v9172_v52 = vpop.f32.mrf.mxu0 }
 0x261   :  { %9954 = vst [vmem:[#allocation30_spill] sm:$0xff] %v9169_v57  ;;  %v9174_v1 = vpop.f32.mrf.mxu1  ;;  %v9176_v63 = vadd.f32 %v3222_v33, %v3030_v10  ;;  %v6899_v33 = vld [vmem:[%s9873_s5 + $0x78] sm:$0xff]  }
 0x262   :  { %v3035_v13 = vpop.f32.mrf.mxu0  ;;  %4314 = vmatmul.mubr.bf16.gmra.mxu0 %v8553_v17  ;;  %6050 = vmatprep.subr.bf16.mxu0 %v6899_v33 }
 0x263   :  { %9955 = vst [vmem:[#allocation31_spill] sm:$0xff] %v9176_v63  ;;  %v3228_v48 = vpop.f32.mrf.mxu1  ;;  %v3036_v27 = vadd.f32 %v3035_v13, %v8918_v40  ;;  %4323 = vmatprep.mubr.bf16.mxu0 %v8577_v59  ;;  %v6900_v59 = vld [vmem:[%s9873_s5 + $0x38] sm:$0xff]  }
 0x264   :  { %v3037_v34 = vpop.f32.mrf.mxu0  ;;  %6051 = vmatpush3.bf16.msra.mxu0 %v6900_v59 }
 0x265   :  { %v3230_v43 = vpop.f32.mrf.mxu1  ;;  %v9181_v6 = vadd.f32 %v3228_v48, %v3036_v27  ;;  %v3038_v7 = vadd.f32 %v3037_v34, %v8923_v41 }
 0x266   :  { %v3039_v16 = vpop.f32.mrf.mxu0 }
 0x267   :  { %9956 = vst [vmem:[#allocation32_spill] sm:$0xff] %v9181_v6  ;;  %v3232_v57 = vpop.f32.mrf.mxu1  ;;  %v9187_v10 = vadd.f32 %v3230_v43, %v3038_v7  ;;  %v3040_v17 = vadd.f32 %v3039_v16, %v8918_v40 }
 0x268   :  { %v9193_v13 = vpop.f32.mrf.mxu0 }
 0x269   :  { %9957 = vst [vmem:[#allocation33_spill] sm:$0xff] %v9187_v10  ;;  %9958 = vst [vmem:[#allocation34_spill] sm:$0xff] %v9193_v13  ;;  %v9195_v48 = vpop.f32.mrf.mxu1  ;;  %v9197_v27 = vadd.f32 %v3232_v57, %v3040_v17 }
 0x26a   :  { %9959 = vst [vmem:[#allocation35_spill] sm:$0xff] %v9195_v48  ;;  %v3045_v34 = vpop.f32.mrf.mxu0  ;;  %4324 = vmatmul.mubr.bf16.gmra.mxu0 %v8573_v49 }
 0x26b   :  { %v3238_v6 = vpop.f32.mrf.mxu1  ;;  %v3046_v43 = vadd.f32 %v3045_v34, %v8918_v40  ;;  %4333 = vmatprep.mubr.bf16.mxu0 %v8595_v22 }
 0x26c   :  { %v3047_v7 = vpop.f32.mrf.mxu0 }
 0x26d   :  { %v3240_v16 = vpop.f32.mrf.mxu1  ;;  %v9202_v10 = vadd.f32 %v3238_v6, %v3046_v43  ;;  %v3048_v13 = vadd.f32 %v3047_v7, %v8923_v41 }
 0x26e   :  { %v3049_v63 = vpop.f32.mrf.mxu0 }
 0x26f   :  { %v3242_v48 = vpop.f32.mrf.mxu1  ;;  %v9205_v33 = vadd.f32 %v3240_v16, %v3048_v13  ;;  %v3050_v57 = vadd.f32 %v3049_v63, %v8918_v40  ;;  %v6901_v16 = vld [vmem:[%s9873_s5 + $0x70] sm:$0xff]  }
 0x270   :  { %v9208_v17 = vpop.f32.mrf.mxu0  ;;  %6052 = vmatprep.subr.bf16.mxu0 %v6901_v16 }
 0x271   :  { %v9210_v59 = vpop.f32.mrf.mxu1  ;;  %v9212_v49 = vadd.f32 %v3242_v48, %v3050_v57  ;;  %v6902_v48 = vld [vmem:[%s9873_s5 + $0x30] sm:$0xff]  }
 0x272   :  { %9960 = vst [vmem:[#allocation36_spill] sm:$0xff] %v9210_v59  ;;  %v3055_v34 = vpop.f32.mrf.mxu0  ;;  %4334 = vmatmul.mubr.bf16.gmra.mxu0 %v8591_v25 }
 0x273   :  { %9961 = vst [vmem:[#allocation37_spill] sm:$0xff] %v9212_v49  ;;  %v3248_v22 = vpop.f32.mrf.mxu1  ;;  %v3056_v6 = vadd.f32 %v3055_v34, %v8918_v40  ;;  %4343 = vmatprep.mubr.bf16.mxu0 %v8637_v51  ;;  %6053 = vmatpush3.bf16.msra.mxu0 %v6902_v48 }
 0x274   :  { %v3057_v43 = vpop.f32.mrf.mxu0 }
 0x275   :  { %v3250_v7 = vpop.f32.mrf.mxu1  ;;  %v9217_v13 = vadd.f32 %v3248_v22, %v3056_v6  ;;  %v3058_v63 = vadd.f32 %v3057_v43, %v8923_v41 }
 0x276   :  { %v3059_v57 = vpop.f32.mrf.mxu0 }
 0x277   :  { %9962 = vst [vmem:[#allocation38_spill] sm:$0xff] %v9217_v13  ;;  %v3252_v25 = vpop.f32.mrf.mxu1  ;;  %v9226_v49 = vadd.f32 %v3250_v7, %v3058_v63  ;;  %v3060_v51 = vadd.f32 %v3059_v57, %v8918_v40 }
 0x278   :  { %v9229_v34 = vpop.f32.mrf.mxu0 }
 0x279   :  { %9963 = vst [vmem:[#allocation39_spill] sm:$0xff] %v9226_v49  ;;  %9964 = vst [vmem:[#allocation40_spill] sm:$0xff] %v9229_v34  ;;  %v9231_v22 = vpop.f32.mrf.mxu1  ;;  %v9233_v6 = vadd.f32 %v3252_v25, %v3060_v51 }
 0x27a   :  { %9965 = vst [vmem:[#allocation41_spill] sm:$0xff] %v9231_v22  ;;  %v3065_v43 = vpop.f32.mrf.mxu0  ;;  %4344 = vmatmul.mubr.bf16.gmra.mxu0 %v8627_v44 }
 0x27b   :  { %9966 = vst [vmem:[#allocation42_spill] sm:$0xff] %v9233_v6  ;;  %v3258_v13 = vpop.f32.mrf.mxu1  ;;  %v3066_v59 = vadd.f32 %v3065_v43, %v8918_v40  ;;  %4353 = vmatprep.mubr.bf16.mxu0 %v8679_v47 }
 0x27c   :  { %v3067_v7 = vpop.f32.mrf.mxu0 }
 0x27d   :  { %v3260_v63 = vpop.f32.mrf.mxu1  ;;  %v9238_v49 = vadd.f32 %v3258_v13, %v3066_v59  ;;  %v3068_v16 = vadd.f32 %v3067_v7, %v8923_v41 }
 0x27e   :  { %v3069_v57 = vpop.f32.mrf.mxu0 }
 0x27f   :  { %9967 = vst [vmem:[#allocation43_spill] sm:$0xff] %v9238_v49  ;;  %v3262_v34 = vpop.f32.mrf.mxu1  ;;  %v9241_v22 = vadd.f32 %v3260_v63, %v3068_v16  ;;  %v3070_v48 = vadd.f32 %v3069_v57, %v8918_v40  ;;  %v6903_v40 = vld [vmem:[%s9873_s5 + $0x68] sm:$0xff]  }
 0x280   :  { %v9244_v25 = vpop.f32.mrf.mxu0  ;;  %6054 = vmatprep.subr.bf16.mxu0 %v6903_v40 }
 0x281   :  { %9968 = vst [vmem:[#allocation44_spill] sm:$0xff] %v9241_v22  ;;  %9969 = vst [vmem:[#allocation45_spill] sm:$0xff] %v9244_v25  ;;  %v9246_v51 = vpop.f32.mrf.mxu1  ;;  %v9248_v44 = vadd.f32 %v3262_v34, %v3070_v48  ;;  %v6904_v34 = vld [vmem:[%s9873_s5 + $0x28] sm:$0xff]  }
 0x282   :  { %9970 = vst [vmem:[#allocation46_spill] sm:$0xff] %v9246_v51  ;;  %v3301_v43 = vpop.f32.mrf.mxu0  ;;  %4354 = vmatmul.mubr.bf16.gmra.mxu0 %v8669_v14 }
 0x283   :  { %9971 = vst [vmem:[#allocation47_spill] sm:$0xff] %v9248_v44  ;;  %v3494_v47 = vpop.f32.mrf.mxu1  ;;  %v3302_v59 = vadd.f32 %v3301_v43, %v8938_v0  ;;  %4363 = vmatprep.mubr.bf16.mxu0 %v8721_v23  ;;  %6055 = vmatpush3.bf16.msra.mxu0 %v6904_v34 }
 0x284   :  { %v3303_v13 = vpop.f32.mrf.mxu0 }
 0x285   :  { %v3496_v7 = vpop.f32.mrf.mxu1  ;;  %v3304_v63 = vadd.f32 %v3303_v13, %v8941_v53  ;;  %v3495_v48 = vadd.f32 %v3494_v47, %v3302_v59 }
 0x286   :  { %v3305_v16 = vpop.f32.mrf.mxu0 }
 0x287   :  { %v3498_v57 = vpop.f32.mrf.mxu1  ;;  %v3306_v14 = vadd.f32 %v3305_v16, %v8952_v54  ;;  %v3497_v43 = vadd.f32 %v3496_v7, %v3304_v63  ;;  %v3655_v22 = vmax.f32 %v3495_v48, 0.0 }
 0x288   :  { %v3307_v0 = vpop.f32.mrf.mxu0 }
 0x289   :  { %v3500_v23 = vpop.f32.mrf.mxu1  ;;  %v3499_v44 = vadd.f32 %v3498_v57, %v3306_v14  ;;  %v3308_v53 = vadd.f32 %v3307_v0, %v8961_v55  ;;  %v3656_v59 = vmax.f32 %v3497_v43, 0.0 }
 0x28a   :  { %v3311_v13 = vpop.f32.mrf.mxu0  ;;  %4364 = vmatmul.mubr.bf16.gmra.mxu0 %v8711_v37 }
 0x28b   :  { %v3504_v51 = vpop.f32.mrf.mxu1  ;;  %v3659_v49 = vmax.f32 %v3499_v44, 0.0  ;;  %v3501_v25 = vadd.f32 %v3500_v23, %v3308_v53  ;;  %v3312_v6 = vadd.f32 %v3311_v13, %v8971_v30  ;;  %4373 = vmatprep.mubr.bf16.mxu0 %v8763_v35  ;;  %v6905_v35 = vld [vmem:[%s9873_s5 + $0x60] sm:$0xff]  }
 0x28c   :  { %v3313_v54 = vpop.f32.mrf.mxu0  ;;  %6056 = vmatprep.subr.bf16.mxu0 %v6905_v35 }
 0x28d   :  { %v3506_v47 = vpop.f32.mrf.mxu1  ;;  %v3783_v40 = vpack.c.bf16 %v3659_v49, %v3655_v22  ;;  %v3660_v34 = vmax.f32 %v3501_v25, 0.0  ;;  %v3314_v7 = vadd.f32 %v3313_v54, %v8977_v5  ;;  %v3505_v16 = vadd.f32 %v3504_v51, %v3312_v6  ;;  %v6906_v5 = vld [vmem:[%s9873_s5 + $0x20] sm:$0xff]  }
 0x28e   :  { %v3315_v63 = vpop.f32.mrf.mxu0  ;;  %6057 = vmatpush3.bf16.msra.mxu0 %v6906_v5 }
 0x28f   :  { %v3508_v55 = vpop.f32.mrf.mxu1  ;;  %v3316_v57 = vadd.f32 %v3315_v63, %v8980_v50  ;;  %v3784_v37 = vpack.c.bf16 %v3660_v34, %v3656_v59  ;;  %v3507_v14 = vadd.f32 %v3506_v47, %v3314_v7  ;;  %v3663_v50 = vmax.f32 %v3505_v16, 0.0 }
 0x290   :  { %v3317_v48 = vpop.f32.mrf.mxu0 }
 0x291   :  { %v3510_v44 = vpop.f32.mrf.mxu1  ;;  %v3509_v0 = vadd.f32 %v3508_v55, %v3316_v57  ;;  %v3318_v30 = vadd.f32 %v3317_v48, %v8989_v58  ;;  %4466 = vmatprep.mubr.bf16.mxu1 %v3784_v37  ;;  %v3664_v43 = vmax.f32 %v3507_v14, 0.0 }
 0x292   :  { %v3321_v49 = vpop.f32.mrf.mxu0  ;;  %4374 = vmatmul.mubr.bf16.gmra.mxu0 %v8753_v9  ;;  %4467 = vmatmul.mubr.bf16.vlgmr.msra.gmra.mxu1 %v3783_v40 }
 0x293   :  { %v3514_v22 = vpop.f32.mrf.mxu1  ;;  %v3667_v6 = vmax.f32 %v3509_v0, 0.0  ;;  %v3511_v25 = vadd.f32 %v3510_v44, %v3318_v30  ;;  %v3322_v51 = vadd.f32 %v3321_v49, %v8996_v46  ;;  %4383 = vmatprep.mubr.bf16.mxu0 %v8805_v8 }
 0x294   :  { %v3323_v58 = vpop.f32.mrf.mxu0 }
 0x295   :  { %v3516_v23 = vpop.f32.mrf.mxu1  ;;  %v3787_v53 = vpack.c.bf16 %v3667_v6, %v3663_v50  ;;  %v3668_v13 = vmax.f32 %v3511_v25, 0.0  ;;  %v3324_v54 = vadd.f32 %v3323_v58, %v8999_v56  ;;  %v3515_v9 = vadd.f32 %v3514_v22, %v3322_v51 }
 0x296   :  { %v3325_v47 = vpop.f32.mrf.mxu0 }
 0x297   :  { %v3518_v59 = vpop.f32.mrf.mxu1  ;;  %v3326_v40 = vadd.f32 %v3325_v47, %v9002_v3  ;;  %v3788_v34 = vpack.c.bf16 %v3668_v13, %v3664_v43  ;;  %v3517_v46 = vadd.f32 %v3516_v23, %v3324_v54  ;;  %v3671_v37 = vmax.f32 %v3515_v9, 0.0 }
 0x298   :  { %v3327_v7 = vpop.f32.mrf.mxu0  ;;  %v2962_v23 = vadd.f32 %v9046_v24, %v8923_v41 }
 0x299   :  { %v3520_v63 = vpop.f32.mrf.mxu1  ;;  %v3519_v55 = vadd.f32 %v3518_v59, %v3326_v40  ;;  %v3328_v8 = vadd.f32 %v3327_v7, %v9011_v60  ;;  %4476 = vmatprep.mubr.bf16.mxu1 %v3788_v34  ;;  %v3672_v0 = vmax.f32 %v3517_v46, 0.0 }
 0x29a   :  { %v3331_v16 = vpop.f32.mrf.mxu0  ;;  %4384 = vmatmul.mubr.bf16.gmra.mxu0 %v8795_v29  ;;  %4477 = vmatmul.mubr.bf16.gmra.mxu1 %v3787_v53 }
 0x29b   :  { %v3524_v57 = vpop.f32.mrf.mxu1  ;;  %v3675_v56 = vmax.f32 %v3519_v55, 0.0  ;;  %v3521_v48 = vadd.f32 %v3520_v63, %v3328_v8  ;;  %v3332_v44 = vadd.f32 %v3331_v16, %v9018_v61  ;;  %4393 = vmatprep.mubr.bf16.mxu0 %v8844_v2  ;;  %v6907_v2 = vld [vmem:[%s9873_s5 + $0x58] sm:$0xff]  }
 0x29c   :  { %v3333_v3 = vpop.f32.mrf.mxu0  ;;  %6058 = vmatprep.subr.bf16.mxu0 %v6907_v2  ;;  %v9973_v8 = vld [vmem:[#allocation9_spill] sm:$0xff]  ;;  %v9978_v2 = vld [vmem:[#allocation12_spill] sm:$0xff] }
 0x29d   :  { %v3526_v14 = vpop.f32.mrf.mxu1  ;;  %v3791_v30 = vpack.c.bf16 %v3675_v56, %v3671_v37  ;;  %v3676_v35 = vmax.f32 %v3521_v48, 0.0  ;;  %v3334_v60 = vadd.f32 %v3333_v3, %v9021_v4  ;;  %v3525_v22 = vadd.f32 %v3524_v57, %v3332_v44  ;;  %v6908_v4 = vld [vmem:[%s9873_s5 + $0x18] sm:$0xff]  }
 0x29e   :  { %v3335_v5 = vpop.f32.mrf.mxu0  ;;  %6059 = vmatpush3.bf16.msra.mxu0 %v6908_v4  ;;  %v2972_v44 = vadd.f32 %v9069_v36, %v8923_v41 }
 0x29f   :  { %v3528_v49 = vpop.f32.mrf.mxu1  ;;  %v3336_v29 = vadd.f32 %v3335_v5, %v9024_v32  ;;  %v3792_v50 = vpack.c.bf16 %v3676_v35, %v3672_v0  ;;  %v3527_v51 = vadd.f32 %v3526_v14, %v3334_v60  ;;  %v3679_v53 = vmax.f32 %v3525_v22, 0.0  ;;  %v9975_v60 = vld [vmem:[#allocation10_spill] sm:$0xff] }
 0x2a0   :  { %v3337_v6 = vpop.f32.mrf.mxu0  ;;  %v3165_v4 = vadd.f32 %v9978_v2, %v2972_v44 }
 0x2a1   :  { %v3530_v25 = vpop.f32.mrf.mxu1  ;;  %v3529_v58 = vadd.f32 %v3528_v49, %v3336_v29  ;;  %v3338_v61 = vadd.f32 %v3337_v6, %v9033_v42  ;;  %4486 = vmatprep.mubr.bf16.mxu1 %v3792_v50  ;;  %v3680_v9 = vmax.f32 %v3527_v51, 0.0  ;;  %v9976_v49 = vld [vmem:[#allocation5_spill] sm:$0xff]  ;;  %v9977_v51 = vld [vmem:[#allocation11_spill] sm:$0xff] }
 0x2a2   :  { %v3341_v32 = vpop.f32.mrf.mxu0  ;;  %4394 = vmatmul.mubr.bf16.gmra.mxu0 %v8834_v20  ;;  %4487 = vmatmul.mubr.bf16.gmra.mxu1 %v3791_v30  ;;  %v9972_v20 = vld [vmem:[#allocation8_spill] sm:$0xff] }
 0x2a3   :  { %v3534_v43 = vpop.f32.mrf.mxu1  ;;  %v3683_v13 = vmax.f32 %v3529_v58, 0.0  ;;  %v3531_v42 = vadd.f32 %v3530_v25, %v3338_v61  ;;  %v3342_v54 = vadd.f32 %v3341_v32, %v9040_v62  ;;  %4403 = vmatprep.mubr.bf16.mxu0 %v8880_v18  ;;  %v3155_v46 = vadd.f32 %v9972_v20, %v2962_v23  ;;  %v9979_v32 = vld [vmem:[#allocation13_spill] sm:$0xff] }
 0x2a4   :  { %v3343_v47 = vpop.f32.mrf.mxu0 }
 0x2a5   :  { %v3536_v59 = vpop.f32.mrf.mxu1  ;;  %v3795_v40 = vpack.c.bf16 %v3683_v13, %v3679_v53  ;;  %v3684_v34 = vmax.f32 %v3531_v42, 0.0  ;;  %v3344_v24 = vadd.f32 %v3343_v47, %v9043_v26  ;;  %v3535_v55 = vadd.f32 %v3534_v43, %v3342_v54  ;;  %v9974_v26 = vld [vmem:[#allocation3_spill] sm:$0xff] }
 0x2a6   :  { %v3345_v7 = vpop.f32.mrf.mxu0 }
 0x2a7   :  { %v3538_v63 = vpop.f32.mrf.mxu1  ;;  %v3346_v16 = vadd.f32 %v3345_v7, %v9973_v8  ;;  %v3796_v57 = vpack.c.bf16 %v3684_v34, %v3680_v9  ;;  %v3537_v18 = vadd.f32 %v3536_v59, %v3344_v24  ;;  %v3687_v0 = vmax.f32 %v3535_v55, 0.0  ;;  %v6909_v9 = vld [vmem:[%s9873_s5 + $0x50] sm:$0xff]   ;;  %v9981_v8 = vld [vmem:[#allocation14_spill] sm:$0xff] }
 0x2a8   :  { %v3347_v62 = vpop.f32.mrf.mxu0  ;;  %v2982_v34 = vadd.f32 %v9092_v39, %v8923_v41  ;;  %6060 = vmatprep.subr.bf16.mxu0 %v6909_v9  ;;  %v9983_v39 = vld [vmem:[#allocation15_spill] sm:$0xff] }
 0x2a9   :  { %v3540_v37 = vpop.f32.mrf.mxu1  ;;  %v3539_v56 = vadd.f32 %v3538_v63, %v3346_v16  ;;  %v3348_v48 = vadd.f32 %v3347_v62, %v3155_v46  ;;  %4496 = vmatprep.mubr.bf16.mxu1 %v3796_v57  ;;  %v3688_v50 = vmax.f32 %v3537_v18, 0.0  ;;  %v9980_v63 = vld [vmem:[#allocation4_spill] sm:$0xff]  ;;  %v9982_v57 = vld [vmem:[#allocation7_spill] sm:$0xff] }
 0x2aa   :  { %v3351_v3 = vpop.f32.mrf.mxu0  ;;  %4404 = vmatmul.mubr.bf16.gmra.mxu0 %v9974_v26  ;;  %4497 = vmatmul.mubr.bf16.gmra.mxu1 %v3795_v40  ;;  %v6910_v40 = vld [vmem:[%s9873_s5 + $0x10] sm:$0xff]  }
 0x2ab   :  { %v3544_v14 = vpop.f32.mrf.mxu1  ;;  %v3691_v30 = vmax.f32 %v3539_v56, 0.0  ;;  %v3541_v35 = vadd.f32 %v3540_v37, %v3348_v48  ;;  %v3352_v5 = vadd.f32 %v3351_v3, %v9975_v60  ;;  %4413 = vmatprep.mubr.bf16.mxu0 %v9976_v49  ;;  %6061 = vmatpush3.bf16.msra.mxu0 %v6910_v40  ;;  %v9984_v26 = vld [vmem:[#allocation16_spill] sm:$0xff] }
 0x2ac   :  { %v3353_v22 = vpop.f32.mrf.mxu0 }
 0x2ad   :  { %v3546_v29 = vpop.f32.mrf.mxu1  ;;  %v3799_v6 = vpack.c.bf16 %v3691_v30, %v3687_v0  ;;  %v3692_v25 = vmax.f32 %v3541_v35, 0.0  ;;  %v3354_v58 = vadd.f32 %v3353_v22, %v9977_v51  ;;  %v3545_v23 = vadd.f32 %v3544_v14, %v3352_v5  ;;  %v9985_v35 = vld [vmem:[#allocation17_spill] sm:$0xff] }
 0x2ae   :  { %v3355_v36 = vpop.f32.mrf.mxu0  ;;  %v3175_v0 = vadd.f32 %v9984_v26, %v2982_v34 }
 0x2af   :  { %v3548_v61 = vpop.f32.mrf.mxu1  ;;  %v3356_v43 = vadd.f32 %v3355_v36, %v9979_v32  ;;  %v3800_v53 = vpack.c.bf16 %v3692_v25, %v3688_v50  ;;  %v3547_v54 = vadd.f32 %v3546_v29, %v3354_v58  ;;  %v3695_v20 = vmax.f32 %v3545_v23, 0.0  ;;  %v9986_v36 = vld [vmem:[#allocation6_spill] sm:$0xff] }
 0x2b0   :  { %v3357_v13 = vpop.f32.mrf.mxu0  ;;  %v2992_v25 = vadd.f32 %v9112_v19, %v8923_v41  ;;  %v9987_v23 = vld [vmem:[#allocation18_spill] sm:$0xff] }
 0x2b1   :  { %v3550_v42 = vpop.f32.mrf.mxu1  ;;  %v3549_v47 = vadd.f32 %v3548_v61, %v3356_v43  ;;  %v3358_v59 = vadd.f32 %v3357_v13, %v3165_v4  ;;  %4506 = vmatprep.mubr.bf16.mxu1 %v3800_v53  ;;  %v3696_v18 = vmax.f32 %v3547_v54, 0.0 }
 0x2b2   :  { %v3361_v24 = vpop.f32.mrf.mxu0  ;;  %4414 = vmatmul.mubr.bf16.gmra.mxu0 %v9980_v63  ;;  %4507 = vmatmul.mubr.bf16.gmra.mxu1 %v3799_v6  ;;  %v3185_v19 = vadd.f32 %v9114_v45, %v2992_v25  ;;  %v3002_v45 = vadd.f32 %v9127_v31, %v8923_v41 }
 0x2b3   :  { %v3554_v7 = vpop.f32.mrf.mxu1  ;;  %v3699_v46 = vmax.f32 %v3549_v47, 0.0  ;;  %v3551_v55 = vadd.f32 %v3550_v42, %v3358_v59  ;;  %v3362_v16 = vadd.f32 %v3361_v24, %v9981_v8  ;;  %4423 = vmatprep.mubr.bf16.mxu0 %v9982_v57  ;;  %v9988_v47 = vld [vmem:[#allocation19_spill] sm:$0xff]  ;;  %v9989_v24 = vld [vmem:[#allocation20_spill] sm:$0xff] }
 0x2b4   :  { %v3363_v62 = vpop.f32.mrf.mxu0  ;;  %v6911_v57 = vld [vmem:[%s9873_s5 + $0x48] sm:$0xff]   ;;  %v3195_v31 = vadd.f32 %v9129_v11, %v3002_v45  ;;  %v9993_v11 = vld [vmem:[#allocation24_spill] sm:$0xff] }
 0x2b5   :  { %v3556_v37 = vpop.f32.mrf.mxu1  ;;  %v3803_v56 = vpack.c.bf16 %v3699_v46, %v3695_v20  ;;  %v3700_v48 = vmax.f32 %v3551_v55, 0.0  ;;  %v3364_v44 = vadd.f32 %v3363_v62, %v9983_v39  ;;  %v3555_v30 = vadd.f32 %v3554_v7, %v3362_v16  ;;  %v6912_v62 = vld [vmem:[%s9873_s5 + $0x8] sm:$0xff]   ;;  %6062 = vmatprep.subr.bf16.mxu0 %v6911_v57 }
 0x2b6   :  { %v3365_v3 = vpop.f32.mrf.mxu0  ;;  %6063 = vmatpush3.bf16.msra.mxu0 %v6912_v62 }
 0x2b7   :  { %v3558_v14 = vpop.f32.mrf.mxu1  ;;  %v3366_v60 = vadd.f32 %v3365_v3, %v9985_v35  ;;  %v3804_v5 = vpack.c.bf16 %v3700_v48, %v3696_v18  ;;  %v3557_v29 = vadd.f32 %v3556_v37, %v3364_v44  ;;  %v3703_v61 = vmax.f32 %v3555_v30, 0.0  ;;  %v9990_v44 = vld [vmem:[#allocation21_spill] sm:$0xff] }
 0x2b8   :  { %v3367_v49 = vpop.f32.mrf.mxu0 }
 0x2b9   :  { %v3560_v22 = vpop.f32.mrf.mxu1  ;;  %v3559_v50 = vadd.f32 %v3558_v14, %v3366_v60  ;;  %v3368_v6 = vadd.f32 %v3367_v49, %v3175_v0  ;;  %4516 = vmatprep.mubr.bf16.mxu1 %v3804_v5  ;;  %v3704_v13 = vmax.f32 %v3557_v29, 0.0  ;;  %v9991_v60 = vld [vmem:[#allocation22_spill] sm:$0xff] }
 0x2ba   :  { %v3371_v51 = vpop.f32.mrf.mxu0  ;;  %4424 = vmatmul.mubr.bf16.gmra.mxu0 %v9986_v36  ;;  %4517 = vmatmul.mubr.bf16.gmra.mxu1 %v3803_v56 }
 0x2bb   :  { %v3564_v58 = vpop.f32.mrf.mxu1  ;;  %v3707_v2 = vmax.f32 %v3559_v50, 0.0  ;;  %v3561_v4 = vadd.f32 %v3560_v22, %v3368_v6  ;;  %v3372_v32 = vadd.f32 %v3371_v51, %v9987_v23  ;;  %v9992_v50 = vld [vmem:[#allocation23_spill] sm:$0xff] }
 0x2bc   :  { %v3373_v43 = vpop.f32.mrf.mxu0 }
 0x2bd   :  { %v3566_v53 = vpop.f32.mrf.mxu1  ;;  %v3807_v42 = vpack.c.bf16 %v3707_v2, %v3703_v61  ;;  %v3708_v54 = vmax.f32 %v3561_v4, 0.0  ;;  %v3374_v59 = vadd.f32 %v3373_v43, %v9988_v47  ;;  %v3565_v34 = vadd.f32 %v3564_v58, %v3372_v32 }
 0x2be   :  { %v3375_v9 = vpop.f32.mrf.mxu0  ;;  %v3012_v4 = vadd.f32 %v9142_v38, %v8923_v41 }
 0x2bf   :  { %v3568_v40 = vpop.f32.mrf.mxu1  ;;  %v3376_v7 = vadd.f32 %v3375_v9, %v9989_v24  ;;  %v3808_v63 = vpack.c.bf16 %v3708_v54, %v3704_v13  ;;  %v3567_v55 = vadd.f32 %v3566_v53, %v3374_v59  ;;  %v3711_v56 = vmax.f32 %v3565_v34, 0.0 }
 0x2c0   :  { %v3377_v20 = vpop.f32.mrf.mxu0 }
 0x2c1   :  { %v3570_v46 = vpop.f32.mrf.mxu1  ;;  %v3569_v8 = vadd.f32 %v3568_v40, %v3376_v7  ;;  %v3378_v16 = vadd.f32 %v3377_v20, %v3185_v19  ;;  %4526 = vmatprep.mubr.bf16.mxu1 %v3808_v63  ;;  %v3712_v0 = vmax.f32 %v3567_v55, 0.0  ;;  %v9994_v19 = vld [vmem:[#allocation25_spill] sm:$0xff]  ;;  %v3205_v63 = vadd.f32 %v9144_v15, %v3012_v4  ;;  %v9995_v20 = vld [vmem:[#allocation26_spill] sm:$0xff] }
 0x2c2   :  { %v3381_v37 = vpop.f32.mrf.mxu0  ;;  %4527 = vmatmul.mubr.bf16.gmra.mxu1 %v3807_v42  ;;  %v3022_v15 = vadd.f32 %v9157_v21, %v8923_v41 }
 0x2c3   :  { %v3574_v18 = vpop.f32.mrf.mxu1  ;;  %v3715_v48 = vmax.f32 %v3569_v8, 0.0  ;;  %v3571_v39 = vadd.f32 %v3570_v46, %v3378_v16  ;;  %v3382_v3 = vadd.f32 %v3381_v37, %v9990_v44  ;;  %v6913_v37 = vld [vmem:[%s9873_s5 + $0x40] sm:$0xff]  }
 0x2c4   :  { %v3383_v14 = vpop.f32.mrf.mxu0  ;;  %6064 = vmatprep.subr.bf16.mxu0 %v6913_v37  ;;  %v3215_v21 = vadd.f32 %v9159_v12, %v3022_v15 }
 0x2c5   :  { %v3576_v26 = vpop.f32.mrf.mxu1  ;;  %v3811_v30 = vpack.c.bf16 %v3715_v48, %v3711_v56  ;;  %v3716_v35 = vmax.f32 %v3571_v39, 0.0  ;;  %v3384_v5 = vadd.f32 %v3383_v14, %v9991_v60  ;;  %v3575_v29 = vadd.f32 %v3574_v18, %v3382_v3  ;;  %v6914_v18 = vld [vmem:[%s9873_s5] sm:$0xff]   ;;  %v9996_v14 = vld [vmem:[#allocation27_spill] sm:$0xff] }
 0x2c6   :  { %v3385_v49 = vpop.f32.mrf.mxu0  ;;  %6065 = vmatpush3.bf16.msra.mxu0 %v6914_v18 }
 0x2c7   :  { %v3578_v22 = vpop.f32.mrf.mxu1  ;;  %v3386_v6 = vadd.f32 %v3385_v49, %v9992_v50  ;;  %v3812_v25 = vpack.c.bf16 %v3716_v35, %v3712_v0  ;;  %v3577_v36 = vadd.f32 %v3576_v26, %v3384_v5  ;;  %v3719_v43 = vmax.f32 %v3575_v29, 0.0  ;;  %v9997_v49 = vld [vmem:[#allocation28_spill] sm:$0xff] }
 0x2c8   :  { %v3387_v51 = vpop.f32.mrf.mxu0 }
 0x2c9   :  { %v3580_v58 = vpop.f32.mrf.mxu1  ;;  %v3579_v61 = vadd.f32 %v3578_v22, %v3386_v6  ;;  %v3388_v2 = vadd.f32 %v3387_v51, %v3195_v31  ;;  %4536 = vmatprep.mubr.bf16.mxu1 %v3812_v25  ;;  %v3720_v59 = vmax.f32 %v3577_v36, 0.0  ;;  %v9998_v6 = vld [vmem:[#allocation29_spill] sm:$0xff] }
 0x2ca   :  { %v3391_v23 = vpop.f32.mrf.mxu0  ;;  %4537 = vmatmul.mubr.bf16.gmra.mxu1 %v3811_v30 }
 0x2cb   :  { %v3584_v32 = vpop.f32.mrf.mxu1  ;;  %v3723_v53 = vmax.f32 %v3579_v61, 0.0  ;;  %v3581_v13 = vadd.f32 %v3580_v58, %v3388_v2  ;;  %v3392_v42 = vadd.f32 %v3391_v23, %v9993_v11  ;;  %v3032_v23 = vadd.f32 %v9172_v52, %v8923_v41 }
 0x2cc   :  { %v3393_v54 = vpop.f32.mrf.mxu0 }
 0x2cd   :  { %v3586_v47 = vpop.f32.mrf.mxu1  ;;  %v3815_v9 = vpack.c.bf16 %v3723_v53, %v3719_v43  ;;  %v3724_v40 = vmax.f32 %v3581_v13, 0.0  ;;  %v3394_v34 = vadd.f32 %v3393_v54, %v9994_v19  ;;  %v3585_v38 = vadd.f32 %v3584_v32, %v3392_v42 }
 0x2ce   :  { %v3395_v24 = vpop.f32.mrf.mxu0 }
 0x2cf   :  { %v3588_v7 = vpop.f32.mrf.mxu1  ;;  %v3396_v46 = vadd.f32 %v3395_v24, %v9995_v20  ;;  %v3816_v55 = vpack.c.bf16 %v3724_v40, %v3720_v59  ;;  %v3587_v57 = vadd.f32 %v3586_v47, %v3394_v34  ;;  %v3727_v39 = vmax.f32 %v3585_v38, 0.0  ;;  %v9999_v40 = vld [vmem:[#allocation30_spill] sm:$0xff] }
 0x2d0   :  { %v3397_v8 = vpop.f32.mrf.mxu0 }
 0x2d1   :  { %v3590_v16 = vpop.f32.mrf.mxu1  ;;  %v3589_v62 = vadd.f32 %v3588_v7, %v3396_v46  ;;  %v3398_v45 = vadd.f32 %v3397_v8, %v3205_v63  ;;  %4546 = vmatprep.mubr.bf16.mxu1 %v3816_v55  ;;  %v3728_v35 = vmax.f32 %v3587_v57, 0.0  ;;  %v3225_v7 = vadd.f32 %v9174_v1, %v3032_v23  ;;  %v10000_v63 = vld [vmem:[#allocation31_spill] sm:$0xff]  ;;  %v10001_v57 = vld [vmem:[#allocation34_spill] sm:$0xff]  ;;  %v10002_v1 = vld [vmem:[#allocation32_spill] sm:$0xff] }
 0x2d2   :  { %v3401_v56 = vpop.f32.mrf.mxu0  ;;  %4547 = vmatmul.mubr.bf16.gmra.mxu1 %v3815_v9 }
 0x2d3   :  { %v3594_v48 = vpop.f32.mrf.mxu1  ;;  %v3731_v44 = vmax.f32 %v3589_v62, 0.0  ;;  %v3591_v3 = vadd.f32 %v3590_v16, %v3398_v45  ;;  %v3402_v26 = vadd.f32 %v3401_v56, %v9996_v14  ;;  %v3042_v62 = vadd.f32 %v10001_v57, %v8923_v41 }
 0x2d4   :  { %v3403_v0 = vpop.f32.mrf.mxu0 }
 0x2d5   :  { %v3596_v30 = vpop.f32.mrf.mxu1  ;;  %v3819_v60 = vpack.c.bf16 %v3731_v44, %v3727_v39  ;;  %v3732_v5 = vmax.f32 %v3591_v3, 0.0  ;;  %v3404_v22 = vadd.f32 %v3403_v0, %v9997_v49  ;;  %v3595_v50 = vadd.f32 %v3594_v48, %v3402_v26  ;;  %v10003_v0 = vld [vmem:[#allocation33_spill] sm:$0xff] }
 0x2d6   :  { %v3405_v31 = vpop.f32.mrf.mxu0 }
 0x2d7   :  { %v3598_v29 = vpop.f32.mrf.mxu1  ;;  %v3406_v25 = vadd.f32 %v3405_v31, %v9998_v6  ;;  %v3820_v51 = vpack.c.bf16 %v3732_v5, %v3728_v35  ;;  %v3597_v61 = vadd.f32 %v3596_v30, %v3404_v22  ;;  %v3735_v53 = vmax.f32 %v3595_v50, 0.0  ;;  %v10004_v5 = vld [vmem:[#allocation35_spill] sm:$0xff] }
 0x2d8   :  { %v3407_v58 = vpop.f32.mrf.mxu0  ;;  %v3235_v49 = vadd.f32 %v10004_v5, %v3042_v62 }
 0x2d9   :  { %v3600_v36 = vpop.f32.mrf.mxu1  ;;  %v3599_v2 = vadd.f32 %v3598_v29, %v3406_v25  ;;  %v3408_v4 = vadd.f32 %v3407_v58, %v3215_v21  ;;  %4556 = vmatprep.mubr.bf16.mxu1 %v3820_v51  ;;  %v3736_v47 = vmax.f32 %v3597_v61, 0.0  ;;  %v3052_v58 = vadd.f32 %v9208_v17, %v8923_v41 }
 0x2da   :  { %v3411_v32 = vpop.f32.mrf.mxu0  ;;  %4557 = vmatmul.mubr.bf16.gmra.mxu1 %v3819_v60 }
 0x2db   :  { %v3604_v43 = vpop.f32.mrf.mxu1  ;;  %v3739_v13 = vmax.f32 %v3599_v2, 0.0  ;;  %v3601_v11 = vadd.f32 %v3600_v36, %v3408_v4  ;;  %v3412_v12 = vadd.f32 %v3411_v32, %v9166_v28 }
 0x2dc   :  { %v3413_v42 = vpop.f32.mrf.mxu0 }
 0x2dd   :  { %v3606_v54 = vpop.f32.mrf.mxu1  ;;  %v3823_v59 = vpack.c.bf16 %v3739_v13, %v3735_v53  ;;  %v3740_v9 = vmax.f32 %v3601_v11, 0.0  ;;  %v3414_v19 = vadd.f32 %v3413_v42, %v9999_v40  ;;  %v3605_v52 = vadd.f32 %v3604_v43, %v3412_v12 }
 0x2de   :  { %v3415_v34 = vpop.f32.mrf.mxu0 }
 0x2df   :  { %v3608_v24 = vpop.f32.mrf.mxu1  ;;  %v3416_v38 = vadd.f32 %v3415_v34, %v10000_v63  ;;  %v3824_v20 = vpack.c.bf16 %v3740_v9, %v3736_v47  ;;  %v3607_v8 = vadd.f32 %v3606_v54, %v3414_v19  ;;  %v3743_v18 = vmax.f32 %v3605_v52, 0.0  ;;  %v10005_v47 = vld [vmem:[#allocation36_spill] sm:$0xff]  ;;  %v10006_v9 = vld [vmem:[#allocation37_spill] sm:$0xff] }
 0x2e0   :  { %v3417_v46 = vpop.f32.mrf.mxu0  ;;  %v10007_v63 = vld [vmem:[#allocation40_spill] sm:$0xff] }
 0x2e1   :  { %v3610_v55 = vpop.f32.mrf.mxu1  ;;  %v3609_v16 = vadd.f32 %v3608_v24, %v3416_v38  ;;  %v3418_v28 = vadd.f32 %v3417_v46, %v3225_v7  ;;  %4566 = vmatprep.mubr.bf16.mxu1 %v3824_v20  ;;  %v3744_v3 = vmax.f32 %v3607_v8, 0.0  ;;  %v3062_v38 = vadd.f32 %v10007_v63, %v8923_v41 }
 0x2e2   :  { %v3421_v45 = vpop.f32.mrf.mxu0  ;;  %4567 = vmatmul.mubr.bf16.gmra.mxu1 %v3823_v59  ;;  %v3245_v59 = vadd.f32 %v10005_v47, %v3052_v58 }
 0x2e3   :  { %v3614_v37 = vpop.f32.mrf.mxu1  ;;  %v3747_v15 = vmax.f32 %v3609_v16, 0.0  ;;  %v3611_v56 = vadd.f32 %v3610_v55, %v3418_v28  ;;  %v3422_v48 = vadd.f32 %v3421_v45, %v10002_v1  ;;  %v10008_v16 = vld [vmem:[#allocation38_spill] sm:$0xff] }
 0x2e4   :  { %v3423_v39 = vpop.f32.mrf.mxu0 }
 0x2e5   :  { %v3616_v44 = vpop.f32.mrf.mxu1  ;;  %v3827_v14 = vpack.c.bf16 %v3747_v15, %v3743_v18  ;;  %v3748_v26 = vmax.f32 %v3611_v56, 0.0  ;;  %v3424_v30 = vadd.f32 %v3423_v39, %v10003_v0  ;;  %v3615_v22 = vadd.f32 %v3614_v37, %v3422_v48  ;;  %v10009_v15 = vld [vmem:[#allocation39_spill] sm:$0xff]  ;;  %v10010_v39 = vld [vmem:[#allocation41_spill] sm:$0xff] }
 0x2e6   :  { %v3425_v35 = vpop.f32.mrf.mxu0 }
 0x2e7   :  { %v3618_v60 = vpop.f32.mrf.mxu1  ;;  %v3426_v31 = vadd.f32 %v3425_v35, %v9197_v27  ;;  %v3828_v29 = vpack.c.bf16 %v3748_v26, %v3744_v3  ;;  %v3617_v6 = vadd.f32 %v3616_v44, %v3424_v30  ;;  %v3751_v2 = vmax.f32 %v3615_v22, 0.0  ;;  %v10012_v22 = vld [vmem:[#allocation45_spill] sm:$0xff] }
 0x2e8   :  { %v3427_v21 = vpop.f32.mrf.mxu0  ;;  %v3255_v44 = vadd.f32 %v10010_v39, %v3062_v38 }
 0x2e9   :  { %v3620_v50 = vpop.f32.mrf.mxu1  ;;  %v3619_v25 = vadd.f32 %v3618_v60, %v3426_v31  ;;  %v3428_v51 = vadd.f32 %v3427_v21, %v3235_v49  ;;  %4576 = vmatprep.mubr.bf16.mxu1 %v3828_v29  ;;  %v3752_v53 = vmax.f32 %v3617_v6, 0.0  ;;  %v3072_v31 = vadd.f32 %v10012_v22, %v8923_v41 }
 0x2ea   :  { %v3431_v36 = vpop.f32.mrf.mxu0  ;;  %4577 = vmatmul.mubr.bf16.gmra.mxu1 %v3827_v14  ;;  %v10011_v14 = vld [vmem:[#allocation42_spill] sm:$0xff] }
 0x2eb   :  { %v3624_v61 = vpop.f32.mrf.mxu1  ;;  %v3755_v4 = vmax.f32 %v3619_v25, 0.0  ;;  %v3621_v23 = vadd.f32 %v3620_v50, %v3428_v51  ;;  %v3432_v32 = vadd.f32 %v3431_v36, %v9202_v10  ;;  %v10013_v51 = vld [vmem:[#allocation43_spill] sm:$0xff] }
 0x2ec   :  { %v3433_v43 = vpop.f32.mrf.mxu0 }
 0x2ed   :  { %v3626_v27 = vpop.f32.mrf.mxu1  ;;  %v3831_v13 = vpack.c.bf16 %v3755_v4, %v3751_v2  ;;  %v3756_v11 = vmax.f32 %v3621_v23, 0.0  ;;  %v3434_v12 = vadd.f32 %v3433_v43, %v9205_v33  ;;  %v3625_v17 = vadd.f32 %v3624_v61, %v3432_v32  ;;  %v10014_v32 = vld [vmem:[#allocation44_spill] sm:$0xff] }
 0x2ee   :  { %v3435_v42 = vpop.f32.mrf.mxu0 }
 0x2ef   :  { %v3628_v54 = vpop.f32.mrf.mxu1  ;;  %v3436_v40 = vadd.f32 %v3435_v42, %v10006_v9  ;;  %v3832_v19 = vpack.c.bf16 %v3756_v11, %v3752_v53  ;;  %v3627_v7 = vadd.f32 %v3626_v27, %v3434_v12  ;;  %v3759_v33 = vmax.f32 %v3625_v17, 0.0  ;;  %v10016_v12 = vld [vmem:[#allocation47_spill] sm:$0xff] }
 0x2f0   :  { %v3437_v34 = vpop.f32.mrf.mxu0 }
 0x2f1   :  { %v3630_v24 = vpop.f32.mrf.mxu1  ;;  %v3629_v52 = vadd.f32 %v3628_v54, %v3436_v40  ;;  %v3438_v10 = vadd.f32 %v3437_v34, %v3245_v59  ;;  %4586 = vmatprep.mubr.bf16.mxu1 %v3832_v19  ;;  %v3760_v45 = vmax.f32 %v3627_v7, 0.0 }
 0x2f2   :  { %v3441_v20 = vpop.f32.mrf.mxu0  ;;  %4587 = vmatmul.mubr.bf16.gmra.mxu1 %v3831_v13  ;;  %v10015_v13 = vld [vmem:[#allocation46_spill] sm:$0xff] }
 0x2f3   :  { %v3634_v46 = vpop.f32.mrf.mxu1  ;;  %v3763_v55 = vmax.f32 %v3629_v52, 0.0  ;;  %v3631_v8 = vadd.f32 %v3630_v24, %v3438_v10  ;;  %v3442_v28 = vadd.f32 %v3441_v20, %v10008_v16  ;;  %v3265_v11 = vadd.f32 %v10015_v13, %v3072_v31 }
 0x2f4   :  { %v3443_v57 = vpop.f32.mrf.mxu0 }
 0x2f5   :  { %v3636_v62 = vpop.f32.mrf.mxu1  ;;  %v3835_v37 = vpack.c.bf16 %v3763_v55, %v3759_v33  ;;  %v3764_v18 = vmax.f32 %v3631_v8, 0.0  ;;  %v3444_v56 = vadd.f32 %v3443_v57, %v10009_v15  ;;  %v3635_v3 = vadd.f32 %v3634_v46, %v3442_v28 }
 0x2f6   :  { %v3445_v1 = vpop.f32.mrf.mxu0 }
 0x2f7   :  { %v3638_v48 = vpop.f32.mrf.mxu1  ;;  %v3446_v26 = vadd.f32 %v3445_v1, %v10011_v14  ;;  %v3836_v0 = vpack.c.bf16 %v3764_v18, %v3760_v45  ;;  %v3637_v60 = vadd.f32 %v3636_v62, %v3444_v56  ;;  %v3767_v50 = vmax.f32 %v3635_v3, 0.0 }
 0x2f8   :  { %v3447_v30 = vpop.f32.mrf.mxu0 }
 0x2f9   :  { %v3640_v35 = vpop.f32.mrf.mxu1  ;;  %v3639_v5 = vadd.f32 %v3638_v48, %v3446_v26  ;;  %v3448_v49 = vadd.f32 %v3447_v30, %v3255_v44  ;;  %4596 = vmatprep.mubr.bf16.mxu1 %v3836_v0  ;;  %v3768_v2 = vmax.f32 %v3637_v60, 0.0 }
 0x2fa   :  { %v3451_v29 = vpop.f32.mrf.mxu0  ;;  %4597 = vmatmul.mubr.bf16.gmra.mxu1 %v3835_v37 }
 0x2fb   :  { %v3644_v21 = vpop.f32.mrf.mxu1  ;;  %v3771_v6 = vmax.f32 %v3639_v5, 0.0  ;;  %v3641_v25 = vadd.f32 %v3640_v35, %v3448_v49  ;;  %v3452_v58 = vadd.f32 %v3451_v29, %v10013_v51 }
 0x2fc   :  { %v3453_v36 = vpop.f32.mrf.mxu0 }
 0x2fd   :  { %v3646_v61 = vpop.f32.mrf.mxu1  ;;  %v3839_v4 = vpack.c.bf16 %v3771_v6, %v3767_v50  ;;  %v3772_v23 = vmax.f32 %v3641_v25, 0.0  ;;  %v3454_v43 = vadd.f32 %v3453_v36, %v10014_v32  ;;  %v3645_v41 = vadd.f32 %v3644_v21, %v3452_v58  ;;  %v3909_v50 = vld [vmem:[%s9874_s4] sm:$0x3] }
 0x2fe   :  { %v3455_v27 = vpop.f32.mrf.mxu0  ;;  %v10017_v25 = vld [vmem:[#allocation2_spill] sm:$0xff] }
 0x2ff   :  { %v3648_v53 = vpop.f32.mrf.mxu1  ;;  %v3456_v42 = vadd.f32 %v3455_v27, %v10016_v12  ;;  %v3840_v54 = vpack.c.bf16 %v3772_v23, %v3768_v2  ;;  %v3647_v59 = vadd.f32 %v3646_v61, %v3454_v43  ;;  %v3775_v34 = vmax.f32 %v3645_v41, 0.0 }
 0x300   :  { %v3457_v47 = vpop.f32.mrf.mxu0  ;;  %v10018_v51 = vsub.s32 1, %v10017_v25  ;;  %v10019_v36 = vsub.s32 0, %v10017_v25 }
 0x301   :  { %v3649_v17 = vadd.f32 %v3648_v53, %v3456_v42  ;;  %v3458_v9 = vadd.f32 %v3457_v47, %v3265_v11  ;;  %4606 = vmatprep.mubr.bf16.mxu1 %v3840_v54  ;;  %v3650_v40 = vpop.f32.mrf.mxu1  ;;  %v3776_v10 = vmax.f32 %v3647_v59, 0.0  ;;  %v6915_v59 = vld [vmem:[%s9875_s7 + $0x38] sm:$0xff]  }
 0x302   :  { %v4275_v19 = vpop.f32.mrf.mxu0  ;;  %4607 = vmatmul.mubr.bf16.gmra.mxu1 %v3839_v4  ;;  %v9448_v58 = vrot.slane %v3909_v50, %v10018_v51  ;;  %v9452_v61 = vrot.slane %v3909_v50, %v10019_v36  ;;  %6210 = vmatprep.subr.bf16.mxu1 %v6915_v59 }
 0x303   :  { %v3779_v24 = vmax.f32 %v3649_v17, 0.0  ;;  %v3651_v7 = vadd.f32 %v3650_v40, %v3458_v9  ;;  %v6916_v40 = vld [vmem:[%s9875_s7 + $0x30] sm:$0xff]   ;;  %6211 = vmatpush3.bf16.msra.mxu1 %v6915_v59 }
 0x304   :  { %v4277_v52 = vpop.f32.mrf.mxu0  ;;  %v4276_v27 = vadd.f32 %v4275_v19, %v9452_v61  ;;  %6212 = vmatprep.subr.bf16.mxu1 %v6916_v40 }
 0x305   :  { %v3843_v63 = vpack.c.bf16 %v3779_v24, %v3775_v34  ;;  %v3780_v38 = vmax.f32 %v3651_v7, 0.0  ;;  %v4278_v32 = vadd.f32 %v4277_v52, %v9448_v58 }
 0x306   :  { %v4279_v20 = vpop.f32.mrf.mxu0 }
 0x307   :  { %v3844_v46 = vpack.c.bf16 %v3780_v38, %v3776_v10  ;;  %v4280_v43 = vadd.f32 %v4279_v20, %v9452_v61  ;;  %v6917_v20 = vld [vmem:[%s9875_s7 + $0x28] sm:$0xff]   ;;  %6213 = vmatpush3.bf16.msra.mxu1 %v6916_v40 }
 0x308   :  { %v4281_v33 = vpop.f32.mrf.mxu0  ;;  %6214 = vmatprep.subr.bf16.mxu1 %v6917_v20 }
 0x309   :  { %4616 = vmatprep.mubr.bf16.mxu1 %v3844_v46  ;;  %v4282_v13 = vadd.f32 %v4281_v33, %v9448_v58 }
 0x30a   :  { %v9389_v55 = vpop.f32.mrf.mxu0  ;;  %4617 = vmatmul.mubr.bf16.gmra.mxu1 %v3843_v63 }
 0x30b   :  { %v4286_v46 = vadd.f32 %v9389_v55, %v9452_v61  ;;  %v6918_v55 = vld [vmem:[%s9875_s7 + $0x20] sm:$0xff]   ;;  %6215 = vmatpush3.bf16.msra.mxu1 %v6917_v20 }
 0x30c   :  { %v4287_v8 = vpop.f32.mrf.mxu0  ;;  %6216 = vmatprep.subr.bf16.mxu1 %v6918_v55 }
 0x30d   :  { %v4288_v10 = vadd.f32 %v4287_v8, %v9448_v58 }
 0x30e   :  { %v4289_v16 = vpop.f32.mrf.mxu0 }
 0x30f   :  { %v4290_v63 = vadd.f32 %v4289_v16, %v9452_v61  ;;  %6217 = vmatpush3.bf16.msra.mxu1 %v6918_v55 }
 0x310   :  { %v9391_v28 = vpop.f32.mrf.mxu0 }
 0x311   :  { %v4292_v25 = vadd.f32 %v9391_v28, %v9448_v58 }
 0x312   :  { %v9393_v57 = vpop.f32.mrf.mxu0 }
 0x314   :  { %v9395_v62 = vpop.f32.mrf.mxu0 }
 0x316   :  { %v9397_v45 = vpop.f32.mrf.mxu0 }
 0x318   :  { %v9399_v37 = vpop.f32.mrf.mxu0 }
 0x31a   :  { %v9401_v18 = vpop.f32.mrf.mxu0 }
 0x31c   :  { %v9403_v15 = vpop.f32.mrf.mxu0 }
 0x31e   :  { %v9405_v56 = vpop.f32.mrf.mxu0 }
 0x320   :  { %v9407_v1 = vpop.f32.mrf.mxu0 }
 0x322   :  { %v9409_v48 = vpop.f32.mrf.mxu0 }
 0x324   :  { %v9411_v39 = vpop.f32.mrf.mxu0 }
 0x326   :  { %v9413_v44 = vpop.f32.mrf.mxu0 }
 0x328   :  { %v9415_v3 = vpop.f32.mrf.mxu0 }
 0x32a   :  { %v9417_v14 = vpop.f32.mrf.mxu0 }
 0x32c   :  { %v9419_v26 = vpop.f32.mrf.mxu0 }
 0x32e   :  { %v9421_v0 = vpop.f32.mrf.mxu0 }
 0x330   :  { %v9423_v30 = vpop.f32.mrf.mxu0 }
 0x332   :  { %v9425_v35 = vpop.f32.mrf.mxu0 }
 0x334   :  { %v9427_v60 = vpop.f32.mrf.mxu0 }
 0x336   :  { %v9429_v5 = vpop.f32.mrf.mxu0 }
 0x338   :  { %v9431_v49 = vpop.f32.mrf.mxu0 }
 0x33a   :  { %v9433_v22 = vpop.f32.mrf.mxu0 }
 0x33c   :  { %v9435_v31 = vpop.f32.mrf.mxu0 }
 0x33e   :  { %v9437_v29 = vpop.f32.mrf.mxu0 }
 0x340   :  { %v9439_v21 = vpop.f32.mrf.mxu0 }
 0x342   :  { %v9444_v6 = vpop.f32.mrf.mxu0 }
 0x344   :  { %v9454_v4 = vpop.f32.mrf.mxu0 }
 0x346   :  { %v9460_v12 = vpop.f32.mrf.mxu0 }
 0x348   :  { %v9468_v24 = vpop.f32.mrf.mxu0 }
 0x34a   :  { %v9479_v8 = vpop.f32.mrf.mxu0 }
 0x34c   :  { %v9484_v28 = vpop.f32.mrf.mxu0 }
 0x352   :  { %v4468_v2 = vpop.f32.mrf.mxu1 }
 0x353   :  { %v4469_v42 = vadd.f32 %v4468_v2, %v4276_v27 }
 0x354   :  { %v4470_v23 = vpop.f32.mrf.mxu1 }
 0x355   :  { %v4471_v11 = vadd.f32 %v4470_v23, %v4278_v32  ;;  %v4627_v7 = vmax.f32 %v4469_v42, 0.0  ;;  %v4300_v42 = vadd.f32 %v9397_v45, %v9452_v61 }
 0x356   :  { %v4472_v53 = vpop.f32.mrf.mxu1 }
 0x357   :  { %v4473_v41 = vadd.f32 %v4472_v53, %v4280_v43  ;;  %v4628_v19 = vmax.f32 %v4471_v11, 0.0 }
 0x358   :  { %v4474_v54 = vpop.f32.mrf.mxu1 }
 0x359   :  { %v4475_v47 = vadd.f32 %v4474_v54, %v4282_v13  ;;  %v4629_v17 = vmax.f32 %v4473_v41, 0.0  ;;  %v4298_v41 = vadd.f32 %v9395_v62, %v9448_v58 }
 0x35a   :  { %v4478_v9 = vpop.f32.mrf.mxu1 }
 0x35b   :  { %v4630_v34 = vmax.f32 %v4475_v47, 0.0  ;;  %v4691_v33 = vpack.c.bf16 %v4629_v17, %v4627_v7  ;;  %v4479_v16 = vadd.f32 %v4478_v9, %v4286_v46  ;;  %v4296_v47 = vadd.f32 %v9393_v57, %v9452_v61 }
 0x35c   :  { %v4480_v52 = vpop.f32.mrf.mxu1  ;;  %v4302_v9 = vadd.f32 %v9399_v37, %v9448_v58  ;;  %v4308_v37 = vadd.f32 %v9403_v15, %v9448_v58 }
 0x35d   :  { %v4692_v38 = vpack.c.bf16 %v4630_v34, %v4628_v19  ;;  %v4481_v51 = vadd.f32 %v4480_v52, %v4288_v10  ;;  %v4631_v13 = vmax.f32 %v4479_v16, 0.0  ;;  %v9494_v34 = vpop.f32.mrf.mxu0  ;;  %v4312_v16 = vadd.f32 %v9407_v1, %v9448_v58 }
 0x35e   :  { %v4482_v50 = vpop.f32.mrf.mxu1  ;;  %v4318_v1 = vadd.f32 %v9411_v39, %v9448_v58 }
 0x35f   :  { %v4483_v36 = vadd.f32 %v4482_v50, %v4290_v63  ;;  %4890 = vmatprep.mubr.bf16.mxu0 %v4692_v38  ;;  %v4632_v27 = vmax.f32 %v4481_v51, 0.0  ;;  %v9496_v57 = vpop.f32.mrf.mxu0 }
 0x360   :  { %v4484_v2 = vpop.f32.mrf.mxu1  ;;  %4891 = vmatmul.mubr.bf16.vlgmr.msra.gmra.mxu0 %v4691_v33  ;;  %v4310_v33 = vadd.f32 %v9405_v56, %v9452_v61 }
 0x361   :  { %v4485_v23 = vadd.f32 %v4484_v2, %v4292_v25  ;;  %v4633_v32 = vmax.f32 %v4483_v36, 0.0  ;;  %v4306_v25 = vadd.f32 %v9401_v18, %v9452_v61  ;;  %v9506_v55 = vpop.f32.mrf.mxu0 }
 0x362   :  { %v4488_v43 = vpop.f32.mrf.mxu1 }
 0x363   :  { %v4634_v53 = vmax.f32 %v4485_v23, 0.0  ;;  %v4693_v59 = vpack.c.bf16 %v4633_v32, %v4631_v13  ;;  %v4489_v7 = vadd.f32 %v4488_v43, %v4296_v47  ;;  %v4316_v47 = vadd.f32 %v9409_v48, %v9452_v61 }
 0x364   :  { %v4490_v11 = vpop.f32.mrf.mxu1 }
 0x365   :  { %v4694_v54 = vpack.c.bf16 %v4634_v53, %v4632_v27  ;;  %v4491_v40 = vadd.f32 %v4490_v11, %v4298_v41  ;;  %v4635_v20 = vmax.f32 %v4489_v7, 0.0  ;;  %v9508_v11 = vpop.f32.mrf.mxu0 }
 0x366   :  { %v4492_v17 = vpop.f32.mrf.mxu1 }
 0x367   :  { %v4493_v19 = vadd.f32 %v4492_v17, %v4300_v42  ;;  %4898 = vmatprep.mubr.bf16.mxu0 %v4694_v54  ;;  %v4636_v63 = vmax.f32 %v4491_v40, 0.0  ;;  %v4320_v42 = vadd.f32 %v9413_v44, %v9452_v61  ;;  %v9518_v7 = vpop.f32.mrf.mxu0 }
 0x368   :  { %v4494_v62 = vpop.f32.mrf.mxu1  ;;  %4899 = vmatmul.mubr.bf16.gmra.mxu0 %v4693_v59 }
 0x369   :  { %v4495_v45 = vadd.f32 %v4494_v62, %v4302_v9  ;;  %v4637_v52 = vmax.f32 %v4493_v19, 0.0  ;;  %v4322_v9 = vadd.f32 %v9415_v3, %v9448_v58  ;;  %v4328_v3 = vadd.f32 %v9419_v26, %v9448_v58 }
 0x36a   :  { %v4498_v10 = vpop.f32.mrf.mxu1 }
 0x36b   :  { %v4638_v38 = vmax.f32 %v4495_v45, 0.0  ;;  %v4695_v51 = vpack.c.bf16 %v4637_v52, %v4635_v20  ;;  %v4499_v32 = vadd.f32 %v4498_v10, %v4306_v25 }
 0x36c   :  { %v4500_v46 = vpop.f32.mrf.mxu1 }
 0x36d   :  { %v4696_v50 = vpack.c.bf16 %v4638_v38, %v4636_v63  ;;  %v4501_v2 = vadd.f32 %v4500_v46, %v4308_v37  ;;  %v4639_v18 = vmax.f32 %v4499_v32, 0.0  ;;  %v9520_v38 = vpop.f32.mrf.mxu0  ;;  %v4330_v46 = vadd.f32 %v9421_v0, %v9452_v61 }
 0x36e   :  { %v4502_v36 = vpop.f32.mrf.mxu1 }
 0x36f   :  { %v4503_v23 = vadd.f32 %v4502_v36, %v4310_v33  ;;  %4906 = vmatprep.mubr.bf16.mxu0 %v4696_v50  ;;  %v4640_v53 = vmax.f32 %v4501_v2, 0.0  ;;  %v4326_v33 = vadd.f32 %v9417_v14, %v9452_v61  ;;  %v9530_v2 = vpop.f32.mrf.mxu0 }
 0x370   :  { %v4504_v43 = vpop.f32.mrf.mxu1  ;;  %4907 = vmatmul.mubr.bf16.gmra.mxu0 %v4695_v51  ;;  %v4332_v51 = vadd.f32 %v9423_v30, %v9448_v58  ;;  %v4338_v30 = vadd.f32 %v9427_v60, %v9448_v58 }
 0x371   :  { %v4505_v15 = vadd.f32 %v4504_v43, %v4312_v16  ;;  %v4641_v27 = vmax.f32 %v4503_v23, 0.0 }
 0x372   :  { %v4508_v56 = vpop.f32.mrf.mxu1 }
 0x373   :  { %v4642_v13 = vmax.f32 %v4505_v15, 0.0  ;;  %v4697_v59 = vpack.c.bf16 %v4641_v27, %v4639_v18  ;;  %v4509_v62 = vadd.f32 %v4508_v56, %v4316_v47  ;;  %v9532_v56 = vpop.f32.mrf.mxu0 }
 0x374   :  { %v4510_v41 = vpop.f32.mrf.mxu1 }
 0x375   :  { %v4698_v54 = vpack.c.bf16 %v4642_v13, %v4640_v53  ;;  %v4511_v40 = vadd.f32 %v4510_v41, %v4318_v1  ;;  %v4643_v48 = vmax.f32 %v4509_v62, 0.0  ;;  %v4340_v13 = vadd.f32 %v9429_v5, %v9452_v61 }
 0x376   :  { %v4512_v17 = vpop.f32.mrf.mxu1  ;;  %v4336_v41 = vadd.f32 %v9425_v35, %v9452_v61 }
 0x377   :  { %v4513_v19 = vadd.f32 %v4512_v17, %v4320_v42  ;;  %4914 = vmatprep.mubr.bf16.mxu0 %v4698_v54  ;;  %v4644_v10 = vmax.f32 %v4511_v40, 0.0  ;;  %v4342_v54 = vadd.f32 %v9431_v49, %v9448_v58  ;;  %v9542_v17 = vpop.f32.mrf.mxu0  ;;  %v4348_v49 = vadd.f32 %v9435_v31, %v9448_v58 }
 0x378   :  { %v4514_v45 = vpop.f32.mrf.mxu1  ;;  %4915 = vmatmul.mubr.bf16.gmra.mxu0 %v4697_v59 }
 0x379   :  { %v4515_v39 = vadd.f32 %v4514_v45, %v4322_v9  ;;  %v4645_v52 = vmax.f32 %v4513_v19, 0.0 }
 0x37a   :  { %v4518_v44 = vpop.f32.mrf.mxu1 }
 0x37b   :  { %v4646_v63 = vmax.f32 %v4515_v39, 0.0  ;;  %v4699_v50 = vpack.c.bf16 %v4645_v52, %v4643_v48  ;;  %v4519_v23 = vadd.f32 %v4518_v44, %v4326_v33  ;;  %v9544_v39 = vpop.f32.mrf.mxu0  ;;  %v4350_v44 = vadd.f32 %v9437_v29, %v9452_v61 }
 0x37c   :  { %v4520_v20 = vpop.f32.mrf.mxu1 }
 0x37d   :  { %v4700_v37 = vpack.c.bf16 %v4646_v63, %v4644_v10  ;;  %v4521_v36 = vadd.f32 %v4520_v20, %v4328_v3  ;;  %v4647_v14 = vmax.f32 %v4519_v23, 0.0  ;;  %v4346_v63 = vadd.f32 %v9433_v22, %v9452_v61  ;;  %v9554_v33 = vpop.f32.mrf.mxu0 }
 0x37e   :  { %v4522_v25 = vpop.f32.mrf.mxu1  ;;  %v4352_v3 = vadd.f32 %v9439_v21, %v9448_v58  ;;  %v4358_v21 = vadd.f32 %v9454_v4, %v9448_v58 }
 0x37f   :  { %v4523_v16 = vadd.f32 %v4522_v25, %v4330_v46  ;;  %4922 = vmatprep.mubr.bf16.mxu0 %v4700_v37  ;;  %v4648_v15 = vmax.f32 %v4521_v36, 0.0  ;;  %v9556_v23 = vpop.f32.mrf.mxu0 }
 0x380   :  { %v4524_v32 = vpop.f32.mrf.mxu1  ;;  %4923 = vmatmul.mubr.bf16.gmra.mxu0 %v4699_v50 }
 0x381   :  { %v4525_v26 = vadd.f32 %v4524_v32, %v4332_v51  ;;  %v4649_v43 = vmax.f32 %v4523_v16, 0.0 }
 0x382   :  { %v4528_v0 = vpop.f32.mrf.mxu1 }
 0x383   :  { %v4650_v27 = vmax.f32 %v4525_v26, 0.0  ;;  %v4701_v1 = vpack.c.bf16 %v4649_v43, %v4647_v14  ;;  %v4529_v9 = vadd.f32 %v4528_v0, %v4336_v41  ;;  %v4360_v26 = vadd.f32 %v9460_v12, %v9452_v61 }
 0x384   :  { %v4530_v53 = vpop.f32.mrf.mxu1  ;;  %v4356_v0 = vadd.f32 %v9444_v6, %v9452_v61  ;;  %v4362_v14 = vadd.f32 %v9468_v24, %v9448_v58  ;;  %v4368_v24 = vadd.f32 %v9484_v28, %v9448_v58 }
 0x385   :  { %v4702_v18 = vpack.c.bf16 %v4650_v27, %v4648_v15  ;;  %v4531_v47 = vadd.f32 %v4530_v53, %v4338_v30  ;;  %v4651_v35 = vmax.f32 %v4529_v9, 0.0  ;;  %v4370_v9 = vadd.f32 %v9494_v34, %v9452_v61 }
 0x386   :  { %v4532_v42 = vpop.f32.mrf.mxu1 }
 0x387   :  { %v4533_v59 = vadd.f32 %v4532_v42, %v4340_v13  ;;  %4930 = vmatprep.mubr.bf16.mxu0 %v4702_v18  ;;  %v4652_v62 = vmax.f32 %v4531_v47, 0.0  ;;  %v9566_v13 = vpop.f32.mrf.mxu0 }
 0x388   :  { %v4534_v40 = vpop.f32.mrf.mxu1  ;;  %4931 = vmatmul.mubr.bf16.gmra.mxu0 %v4701_v1 }
 0x389   :  { %v4535_v60 = vadd.f32 %v4534_v40, %v4342_v54  ;;  %v4653_v19 = vmax.f32 %v4533_v59, 0.0  ;;  %v9568_v47 = vpop.f32.mrf.mxu0 }
 0x38a   :  { %v4538_v5 = vpop.f32.mrf.mxu1 }
 0x38b   :  { %v4654_v45 = vmax.f32 %v4535_v60, 0.0  ;;  %v4703_v48 = vpack.c.bf16 %v4653_v19, %v4651_v35  ;;  %v4539_v50 = vadd.f32 %v4538_v5, %v4346_v63  ;;  %v4366_v60 = vadd.f32 %v9479_v8, %v9452_v61 }
 0x38c   :  { %v4540_v52 = vpop.f32.mrf.mxu1 }
 0x38d   :  { %v4704_v10 = vpack.c.bf16 %v4654_v45, %v4652_v62  ;;  %v4541_v46 = vadd.f32 %v4540_v52, %v4348_v49  ;;  %v4655_v22 = vmax.f32 %v4539_v50, 0.0  ;;  %v4372_v62 = vadd.f32 %v9496_v57, %v9448_v58  ;;  %v9578_v52 = vpop.f32.mrf.mxu0  ;;  %v6919_v50 = vld [vmem:[%s9875_s7 + $0x18] sm:$0xff]  }
 0x38e   :  { %v4542_v20 = vpop.f32.mrf.mxu1  ;;  %v4378_v57 = vadd.f32 %v9508_v11, %v9448_v58  ;;  %6218 = vmatprep.subr.bf16.mxu1 %v6919_v50 }
 0x38f   :  { %v4543_v37 = vadd.f32 %v4542_v20, %v4350_v44  ;;  %4938 = vmatprep.mubr.bf16.mxu0 %v4704_v10  ;;  %v4656_v36 = vmax.f32 %v4541_v46, 0.0  ;;  %v9580_v20 = vpop.f32.mrf.mxu0  ;;  %v4380_v46 = vadd.f32 %v9518_v7, %v9452_v61  ;;  %6219 = vmatpush3.bf16.msra.mxu1 %v6919_v50 }
 0x390   :  { %v4544_v25 = vpop.f32.mrf.mxu1  ;;  %4939 = vmatmul.mubr.bf16.gmra.mxu0 %v4703_v48 }
 0x391   :  { %v4545_v31 = vadd.f32 %v4544_v25, %v4352_v3  ;;  %v4657_v51 = vmax.f32 %v4543_v37, 0.0  ;;  %v4376_v25 = vadd.f32 %v9506_v55, %v9452_v61  ;;  %v9593_v11 = vpop.f32.mrf.mxu0  ;;  %v6920_v55 = vld [vmem:[%s9875_s7 + $0x10] sm:$0xff]  }
 0x392   :  { %v4548_v29 = vpop.f32.mrf.mxu1  ;;  %6220 = vmatprep.subr.bf16.mxu1 %v6920_v55 }
 0x393   :  { %v4658_v16 = vmax.f32 %v4545_v31, 0.0  ;;  %v4705_v15 = vpack.c.bf16 %v4657_v51, %v4655_v22  ;;  %v4549_v18 = vadd.f32 %v4548_v29, %v4356_v0  ;;  %v4382_v29 = vadd.f32 %v9520_v38, %v9448_v58  ;;  %v4411_v38 = vpop.f32.mrf.mxu0  ;;  %6221 = vmatpush3.bf16.msra.mxu1 %v6920_v55 }
 0x394   :  { %v4550_v32 = vpop.f32.mrf.mxu1 }
 0x395   :  { %v4706_v43 = vpack.c.bf16 %v4658_v16, %v4656_v36  ;;  %v4551_v53 = vadd.f32 %v4550_v32, %v4358_v21  ;;  %v4659_v6 = vmax.f32 %v4549_v18, 0.0  ;;  %v6921_v18 = vld [vmem:[%s9875_s7 + $0x8] sm:$0xff]  }
 0x396   :  { %v4552_v27 = vpop.f32.mrf.mxu1  ;;  %6222 = vmatprep.subr.bf16.mxu1 %v6921_v18 }
 0x397   :  { %v4553_v30 = vadd.f32 %v4552_v27, %v4360_v26  ;;  %4946 = vmatprep.mubr.bf16.mxu0 %v4706_v43  ;;  %v4660_v42 = vmax.f32 %v4551_v53, 0.0  ;;  %v4390_v53 = vadd.f32 %v9542_v17, %v9452_v61  ;;  %6223 = vmatpush3.bf16.msra.mxu1 %v6921_v18 }
 0x398   :  { %v4554_v41 = vpop.f32.mrf.mxu1  ;;  %4947 = vmatmul.mubr.bf16.gmra.mxu0 %v4705_v15 }
 0x399   :  { %v4555_v4 = vadd.f32 %v4554_v41, %v4362_v14  ;;  %v4661_v1 = vmax.f32 %v4553_v30, 0.0  ;;  %v4388_v14 = vadd.f32 %v9532_v56, %v9448_v58  ;;  %v4386_v41 = vadd.f32 %v9530_v2, %v9452_v61  ;;  %v9609_v56 = vpop.f32.mrf.mxu0  ;;  %v6922_v2 = vld [vmem:[%s9875_s7] sm:$0xff]  }
 0x39a   :  { %v4558_v12 = vpop.f32.mrf.mxu1  ;;  %6224 = vmatprep.subr.bf16.mxu1 %v6922_v2  ;;  %v4416_v18 = vadd.f32 %v9609_v56, %v9452_v61 }
 0x39b   :  { %v4662_v54 = vmax.f32 %v4555_v4, 0.0  ;;  %v4707_v19 = vpack.c.bf16 %v4661_v1, %v4659_v6  ;;  %v4559_v49 = vadd.f32 %v4558_v12, %v4366_v60  ;;  %v4392_v12 = vadd.f32 %v9544_v39, %v9448_v58  ;;  %v4417_v39 = vpop.f32.mrf.mxu0  ;;  %6225 = vmatpush3.bf16.msra.mxu1 %v6922_v2 }
 0x39c   :  { %v4560_v59 = vpop.f32.mrf.mxu1 }
 0x39d   :  { %v4708_v40 = vpack.c.bf16 %v4662_v54, %v4660_v42  ;;  %v4561_v45 = vadd.f32 %v4560_v59, %v4368_v24  ;;  %v4663_v8 = vmax.f32 %v4559_v49, 0.0  ;;  %v4396_v49 = vadd.f32 %v9554_v33, %v9452_v61 }
 0x39e   :  { %v4562_v5 = vpop.f32.mrf.mxu1 }
 0x39f   :  { %v4563_v35 = vadd.f32 %v4562_v5, %v4370_v9  ;;  %4954 = vmatprep.mubr.bf16.mxu0 %v4708_v40  ;;  %v4664_v63 = vmax.f32 %v4561_v45, 0.0  ;;  %v4400_v45 = vadd.f32 %v9566_v13, %v9452_v61 }
 0x3a0   :  { %v4564_v44 = vpop.f32.mrf.mxu1  ;;  %4955 = vmatmul.mubr.bf16.gmra.mxu0 %v4707_v19 }
 0x3a1   :  { %v4565_v28 = vadd.f32 %v4564_v44, %v4372_v62  ;;  %v4665_v10 = vmax.f32 %v4563_v35, 0.0  ;;  %v4398_v62 = vadd.f32 %v9556_v23, %v9448_v58 }
 0x3a2   :  { %v4568_v34 = vpop.f32.mrf.mxu1 }
 0x3a3   :  { %v4666_v48 = vmax.f32 %v4565_v28, 0.0  ;;  %v4709_v31 = vpack.c.bf16 %v4665_v10, %v4663_v8  ;;  %v4569_v7 = vadd.f32 %v4568_v34, %v4376_v25  ;;  %v4402_v10 = vadd.f32 %v9568_v47, %v9448_v58 }
 0x3a4   :  { %v4570_v3 = vpop.f32.mrf.mxu1  ;;  %v4410_v47 = vadd.f32 %v9593_v11, %v9452_v61 }
 0x3a5   :  { %v4710_v37 = vpack.c.bf16 %v4666_v48, %v4664_v63  ;;  %v4571_v36 = vadd.f32 %v4570_v3, %v4378_v57  ;;  %v4667_v15 = vmax.f32 %v4569_v7, 0.0  ;;  %v4419_v48 = vpop.f32.mrf.mxu0  ;;  %v4412_v7 = vadd.f32 %v4411_v38, %v9448_v58 }
 0x3a6   :  { %v4572_v51 = vpop.f32.mrf.mxu1 }
 0x3a7   :  { %v4573_v16 = vadd.f32 %v4572_v51, %v4380_v46  ;;  %4962 = vmatprep.mubr.bf16.mxu0 %v4710_v37  ;;  %v4668_v43 = vmax.f32 %v4571_v36, 0.0  ;;  %v4421_v50 = vpop.f32.mrf.mxu0 }
 0x3a8   :  { %v4574_v22 = vpop.f32.mrf.mxu1  ;;  %4963 = vmatmul.mubr.bf16.gmra.mxu0 %v4709_v31  ;;  %v4408_v31 = vadd.f32 %v9580_v20, %v9448_v58 }
 0x3a9   :  { %v4575_v32 = vadd.f32 %v4574_v22, %v4382_v29  ;;  %v4669_v21 = vmax.f32 %v4573_v16, 0.0  ;;  %v4406_v29 = vadd.f32 %v9578_v52, %v9452_v61  ;;  %v4425_v55 = vpop.f32.mrf.mxu0  ;;  %v4418_v52 = vadd.f32 %v4417_v39, %v9448_v58 }
 0x3aa   :  { %v4578_v26 = vpop.f32.mrf.mxu1 }
 0x3ab   :  { %v4670_v0 = vmax.f32 %v4575_v32, 0.0  ;;  %v4711_v4 = vpack.c.bf16 %v4669_v21, %v4667_v15  ;;  %v4579_v17 = vadd.f32 %v4578_v26, %v4386_v41 }
 0x3ac   :  { %v4580_v27 = vpop.f32.mrf.mxu1 }
 0x3ad   :  { %v4712_v30 = vpack.c.bf16 %v4670_v0, %v4668_v43  ;;  %v4581_v42 = vadd.f32 %v4580_v27, %v4388_v14  ;;  %v4671_v19 = vmax.f32 %v4579_v17, 0.0  ;;  %v4427_v27 = vpop.f32.mrf.mxu0 }
 0x3ae   :  { %v4582_v1 = vpop.f32.mrf.mxu1  ;;  %v4428_v56 = vadd.f32 %v4427_v27, %v9448_v58 }
 0x3af   :  { %v4583_v54 = vadd.f32 %v4582_v1, %v4390_v53  ;;  %4970 = vmatprep.mubr.bf16.mxu0 %v4712_v30  ;;  %v4672_v40 = vmax.f32 %v4581_v42, 0.0  ;;  %v4420_v30 = vadd.f32 %v4419_v48, %v9452_v61  ;;  %v4422_v1 = vadd.f32 %v4421_v50, %v9448_v58 }
 0x3b0   :  { %v4584_v6 = vpop.f32.mrf.mxu1  ;;  %4971 = vmatmul.mubr.bf16.gmra.mxu0 %v4711_v4 }
 0x3b1   :  { %v4585_v59 = vadd.f32 %v4584_v6, %v4392_v12  ;;  %v4673_v24 = vmax.f32 %v4583_v54, 0.0  ;;  %v4429_v54 = vpop.f32.mrf.mxu0 }
 0x3b2   :  { %v4588_v9 = vpop.f32.mrf.mxu1 }
 0x3b3   :  { %v4674_v60 = vmax.f32 %v4585_v59, 0.0  ;;  %v4713_v44 = vpack.c.bf16 %v4673_v24, %v4671_v19  ;;  %v4589_v8 = vadd.f32 %v4588_v9, %v4396_v49 }
 0x3b4   :  { %v4590_v5 = vpop.f32.mrf.mxu1 }
 0x3b5   :  { %v4714_v35 = vpack.c.bf16 %v4674_v60, %v4672_v40  ;;  %v4591_v34 = vadd.f32 %v4590_v5, %v4398_v62  ;;  %v4675_v25 = vmax.f32 %v4589_v8, 0.0  ;;  %v4431_v60 = vpop.f32.mrf.mxu0  ;;  %v4430_v5 = vadd.f32 %v4429_v54, %v9452_v61 }
 0x3b6   :  { %v4592_v28 = vpop.f32.mrf.mxu1 }
 0x3b7   :  { %v4593_v63 = vadd.f32 %v4592_v28, %v4400_v45  ;;  %4978 = vmatprep.mubr.bf16.mxu0 %v4714_v35  ;;  %v4676_v13 = vmax.f32 %v4591_v34, 0.0  ;;  %v4426_v45 = vadd.f32 %v4425_v55, %v9452_v61 }
 0x3b8   :  { %v4594_v3 = vpop.f32.mrf.mxu1  ;;  %4979 = vmatmul.mubr.bf16.gmra.mxu0 %v4713_v44  ;;  %v4432_v44 = vadd.f32 %v4431_v60, %v9448_v58  ;;  %v9641_v58 = vld [vmem:[%s9876_s6] ss:$0 sm:$0xff] }
 0x3b9   :  { %v4595_v23 = vadd.f32 %v4594_v3, %v4402_v10  ;;  %v4677_v57 = vmax.f32 %v4593_v63, 0.0 }
 0x3ba   :  { %v4598_v46 = vpop.f32.mrf.mxu1 }
 0x3bb   :  { %v4678_v37 = vmax.f32 %v4595_v23, 0.0  ;;  %v4715_v36 = vpack.c.bf16 %v4677_v57, %v4675_v25  ;;  %v4599_v21 = vadd.f32 %v4598_v46, %v4406_v29  ;;  %v6923_v29 = vld [vmem:[%s9877_s9 + $0x38] sm:$0xff]  }
 0x3bc   :  { %v4600_v33 = vpop.f32.mrf.mxu1  ;;  %6258 = vmatprep.subr.bf16.mxu1 %v6923_v29 }
 0x3bd   :  { %v4716_v51 = vpack.c.bf16 %v4678_v37, %v4676_v13  ;;  %v4601_v22 = vadd.f32 %v4600_v33, %v4408_v31  ;;  %v4679_v14 = vmax.f32 %v4599_v21, 0.0 }
 0x3be   :  { %v4602_v16 = vpop.f32.mrf.mxu1 }
 0x3bf   :  { %v4603_v32 = vadd.f32 %v4602_v16, %v4410_v47  ;;  %4986 = vmatprep.mubr.bf16.mxu0 %v4716_v51  ;;  %v4680_v15 = vmax.f32 %v4601_v22, 0.0 }
 0x3c0   :  { %v4604_v26 = vpop.f32.mrf.mxu1  ;;  %4987 = vmatmul.mubr.bf16.gmra.mxu0 %v4715_v36 }
 0x3c1   :  { %v4605_v43 = vadd.f32 %v4604_v26, %v4412_v7  ;;  %v4681_v20 = vmax.f32 %v4603_v32, 0.0 }
 0x3c2   :  { %v4608_v0 = vpop.f32.mrf.mxu1 }
 0x3c3   :  { %v4682_v11 = vmax.f32 %v4605_v43, 0.0  ;;  %v4717_v41 = vpack.c.bf16 %v4681_v20, %v4679_v14  ;;  %v4609_v17 = vadd.f32 %v4608_v0, %v4416_v18 }
 0x3c4   :  { %v4610_v53 = vpop.f32.mrf.mxu1 }
 0x3c5   :  { %v4718_v38 = vpack.c.bf16 %v4682_v11, %v4680_v15  ;;  %v4611_v12 = vadd.f32 %v4610_v53, %v4418_v52  ;;  %v4683_v39 = vmax.f32 %v4609_v17, 0.0 }
 0x3c6   :  { %v4612_v4 = vpop.f32.mrf.mxu1 }
 0x3c7   :  { %v4613_v42 = vadd.f32 %v4612_v4, %v4420_v30  ;;  %4994 = vmatprep.mubr.bf16.mxu0 %v4718_v38  ;;  %v4684_v9 = vmax.f32 %v4611_v12, 0.0  ;;  %v6924_v38 = vld [vmem:[%s9877_s9 + $0x30] sm:$0xff]  }
 0x3c8   :  { %v4614_v6 = vpop.f32.mrf.mxu1  ;;  %4995 = vmatmul.mubr.bf16.gmra.mxu0 %v4717_v41 }
 0x3c9   :  { %v4615_v59 = vadd.f32 %v4614_v6, %v4422_v1  ;;  %v4685_v2 = vmax.f32 %v4613_v42, 0.0  ;;  %v6925_v42 = vld [vmem:[%s9877_s9 + $0x28] sm:$0xff]  }
 0x3ca   :  { %v4618_v24 = vpop.f32.mrf.mxu1 }
 0x3cb   :  { %v4686_v40 = vmax.f32 %v4615_v59, 0.0  ;;  %v4719_v35 = vpack.c.bf16 %v4685_v2, %v4683_v39  ;;  %v4619_v34 = vadd.f32 %v4618_v24, %v4426_v45 }
 0x3cc   :  { %v4620_v19 = vpop.f32.mrf.mxu1 }
 0x3cd   :  { %v4720_v62 = vpack.c.bf16 %v4686_v40, %v4684_v9  ;;  %v4621_v28 = vadd.f32 %v4620_v19, %v4428_v56  ;;  %v4687_v57 = vmax.f32 %v4619_v34, 0.0  ;;  %v6926_v9 = vld [vmem:[%s9877_s9 + $0x20] sm:$0xff]  }
 0x3ce   :  { %v4622_v49 = vpop.f32.mrf.mxu1 }
 0x3cf   :  { %v4623_v10 = vadd.f32 %v4622_v49, %v4430_v5  ;;  %5002 = vmatprep.mubr.bf16.mxu0 %v4720_v62  ;;  %v4688_v3 = vmax.f32 %v4621_v28, 0.0  ;;  %v6927_v5 = vld [vmem:[%s9877_s9 + $0x18] sm:$0xff]  }
 0x3d0   :  { %v4624_v63 = vpop.f32.mrf.mxu1  ;;  %5003 = vmatmul.mubr.bf16.gmra.mxu0 %v4719_v35 }
 0x3d1   :  { %v4625_v48 = vadd.f32 %v4624_v63, %v4432_v44  ;;  %v4689_v8 = vmax.f32 %v4623_v10, 0.0 }
 0x3d3   :  { %v4690_v23 = vmax.f32 %v4625_v48, 0.0  ;;  %v4721_v13 = vpack.c.bf16 %v4689_v8, %v4687_v57 }
 0x3d5   :  { %v4722_v46 = vpack.c.bf16 %v4690_v23, %v4688_v3 }
 0x3d7   :  { %5010 = vmatprep.mubr.bf16.mxu0 %v4722_v46 }
 0x3d8   :  { %5011 = vmatmul.mubr.bf16.gmra.mxu0 %v4721_v13 }
 0x420   :  { %v6066_v61 = vpop.f32.mrf.mxu0 }
 0x422   :  { %v6067_v37 = vpop.f32.mrf.mxu0 }
 0x423   :  { %v6068_v50 = vadd.f32 %v6067_v37, %v6066_v61 }
 0x424   :  { %v6069_v25 = vpop.f32.mrf.mxu0 }
 0x425   :  { %v4893_v31 = vadd.f32 %v6068_v50, %v9641_v58 }
 0x426   :  { %v6070_v33 = vpop.f32.mrf.mxu0 }
 0x427   :  { %v6071_v47 = vadd.f32 %v6070_v33, %v6069_v25  ;;  %v5019_v7 = vmax.f32 %v4893_v31, 0.0 }
 0x428   :  { %v6072_v51 = vpop.f32.mrf.mxu0 }
 0x429   :  { %v4896_v36 = vadd.f32 %v6071_v47, %v9641_v58 }
 0x42a   :  { %v6073_v16 = vpop.f32.mrf.mxu0 }
 0x42b   :  { %v5020_v22 = vmax.f32 %v4896_v36, 0.0  ;;  %v6074_v32 = vadd.f32 %v6073_v16, %v6072_v51 }
 0x42c   :  { %v6075_v55 = vpop.f32.mrf.mxu0 }
 0x42d   :  { %v5051_v21 = vpack.c.bf16 %v5020_v22, %v5019_v7  ;;  %v4901_v43 = vadd.f32 %v6074_v32, %v9641_v58 }
 0x42e   :  { %v6076_v26 = vpop.f32.mrf.mxu0 }
 0x42f   :  { %v6077_v20 = vadd.f32 %v6076_v26, %v6075_v55  ;;  %6226 = vmatprep.mubr.bf16.mxu1 %v5051_v21  ;;  %v5021_v27 = vmax.f32 %v4901_v43, 0.0 }
 0x430   :  { %v6078_v0 = vpop.f32.mrf.mxu0 }
 0x431   :  { %v4904_v15 = vadd.f32 %v6077_v20, %v9641_v58 }
 0x432   :  { %v6079_v11 = vpop.f32.mrf.mxu0 }
 0x433   :  { %v5022_v14 = vmax.f32 %v4904_v15, 0.0  ;;  %v6080_v53 = vadd.f32 %v6079_v11, %v6078_v0 }
 0x434   :  { %v6081_v52 = vpop.f32.mrf.mxu0 }
 0x435   :  { %v5052_v30 = vpack.c.bf16 %v5022_v14, %v5021_v27  ;;  %v4909_v41 = vadd.f32 %v6080_v53, %v9641_v58 }
 0x436   :  { %v6082_v18 = vpop.f32.mrf.mxu0 }
 0x437   :  { %v6083_v4 = vadd.f32 %v6082_v18, %v6081_v52  ;;  %6227 = vmatmul.mubr.bf16.vlgmr.msra.gmra.mxu1 %v5052_v30  ;;  %v5023_v17 = vmax.f32 %v4909_v41, 0.0 }
 0x438   :  { %v6084_v1 = vpop.f32.mrf.mxu0  ;;  %6259 = vmatpush3.bf16.msra.mxu1 %v6923_v29 }
 0x439   :  { %v4912_v12 = vadd.f32 %v6083_v4, %v9641_v58  ;;  %6260 = vmatprep.subr.bf16.mxu1 %v6924_v38 }
 0x43a   :  { %v6085_v54 = vpop.f32.mrf.mxu0 }
 0x43b   :  { %v5024_v6 = vmax.f32 %v4912_v12, 0.0  ;;  %v6086_v59 = vadd.f32 %v6085_v54, %v6084_v1 }
 0x43c   :  { %v6087_v2 = vpop.f32.mrf.mxu0  ;;  %6261 = vmatpush3.bf16.msra.mxu1 %v6924_v38 }
 0x43d   :  { %v5053_v24 = vpack.c.bf16 %v5024_v6, %v5023_v17  ;;  %6262 = vmatprep.subr.bf16.mxu1 %v6925_v42  ;;  %v4917_v60 = vadd.f32 %v6086_v59, %v9641_v58 }
 0x43e   :  { %v6088_v40 = vpop.f32.mrf.mxu0 }
 0x43f   :  { %v6089_v39 = vadd.f32 %v6088_v40, %v6087_v2  ;;  %6230 = vmatprep.mubr.bf16.mxu1 %v5053_v24  ;;  %v5025_v45 = vmax.f32 %v4917_v60, 0.0 }
 0x440   :  { %v6090_v19 = vpop.f32.mrf.mxu0  ;;  %6263 = vmatpush3.bf16.msra.mxu1 %v6925_v42 }
 0x441   :  { %v4920_v56 = vadd.f32 %v6089_v39, %v9641_v58  ;;  %6264 = vmatprep.subr.bf16.mxu1 %v6926_v9 }
 0x442   :  { %v6091_v62 = vpop.f32.mrf.mxu0 }
 0x443   :  { %v5026_v35 = vmax.f32 %v4920_v56, 0.0  ;;  %v6092_v49 = vadd.f32 %v6091_v62, %v6090_v19 }
 0x444   :  { %v6093_v44 = vpop.f32.mrf.mxu0  ;;  %6265 = vmatpush3.bf16.msra.mxu1 %v6926_v9 }
 0x445   :  { %v5054_v28 = vpack.c.bf16 %v5026_v35, %v5025_v45  ;;  %6266 = vmatprep.subr.bf16.mxu1 %v6927_v5  ;;  %v4925_v34 = vadd.f32 %v6092_v49, %v9641_v58 }
 0x446   :  { %v6094_v10 = vpop.f32.mrf.mxu0 }
 0x447   :  { %v6095_v63 = vadd.f32 %v6094_v10, %v6093_v44  ;;  %6231 = vmatmul.mubr.bf16.gmra.mxu1 %v5054_v28  ;;  %v5027_v23 = vmax.f32 %v4925_v34, 0.0 }
 0x448   :  { %v6096_v48 = vpop.f32.mrf.mxu0  ;;  %6267 = vmatpush3.bf16.msra.mxu1 %v6927_v5 }
 0x449   :  { %v4928_v8 = vadd.f32 %v6095_v63, %v9641_v58 }
 0x44a   :  { %v6097_v3 = vpop.f32.mrf.mxu0 }
 0x44b   :  { %v5028_v57 = vmax.f32 %v4928_v8, 0.0  ;;  %v6098_v46 = vadd.f32 %v6097_v3, %v6096_v48 }
 0x44c   :  { %v6099_v13 = vpop.f32.mrf.mxu0 }
 0x44d   :  { %v5055_v61 = vpack.c.bf16 %v5028_v57, %v5027_v23  ;;  %v4933_v50 = vadd.f32 %v6098_v46, %v9641_v58  ;;  %v6928_v23 = vld [vmem:[%s9877_s9 + $0x10] sm:$0xff]  }
 0x44e   :  { %v6100_v37 = vpop.f32.mrf.mxu0  ;;  %6268 = vmatprep.subr.bf16.mxu1 %v6928_v23 }
 0x44f   :  { %v6101_v25 = vadd.f32 %v6100_v37, %v6099_v13  ;;  %6234 = vmatprep.mubr.bf16.mxu1 %v5055_v61  ;;  %v5029_v51 = vmax.f32 %v4933_v50, 0.0  ;;  %6269 = vmatpush3.bf16.msra.mxu1 %v6928_v23 }
 0x450   :  { %v6102_v33 = vpop.f32.mrf.mxu0 }
 0x451   :  { %v4936_v31 = vadd.f32 %v6101_v25, %v9641_v58  ;;  %v6929_v25 = vld [vmem:[%s9877_s9 + $0x8] sm:$0xff]  }
 0x452   :  { %v6103_v47 = vpop.f32.mrf.mxu0  ;;  %6270 = vmatprep.subr.bf16.mxu1 %v6929_v25 }
 0x453   :  { %v5030_v29 = vmax.f32 %v4936_v31, 0.0  ;;  %v6104_v36 = vadd.f32 %v6103_v47, %v6102_v33  ;;  %6271 = vmatpush3.bf16.msra.mxu1 %v6929_v25 }
 0x454   :  { %v6105_v16 = vpop.f32.mrf.mxu0 }
 0x455   :  { %v5056_v7 = vpack.c.bf16 %v5030_v29, %v5029_v51  ;;  %v4941_v32 = vadd.f32 %v6104_v36, %v9641_v58  ;;  %v6930_v36 = vld [vmem:[%s9877_s9] sm:$0xff]  }
 0x456   :  { %v6106_v22 = vpop.f32.mrf.mxu0  ;;  %6272 = vmatprep.subr.bf16.mxu1 %v6930_v36 }
 0x457   :  { %v6107_v55 = vadd.f32 %v6106_v22, %v6105_v16  ;;  %6235 = vmatmul.mubr.bf16.gmra.mxu1 %v5056_v7  ;;  %v5031_v20 = vmax.f32 %v4941_v32, 0.0 }
 0x458   :  { %v6108_v21 = vpop.f32.mrf.mxu0  ;;  %6273 = vmatpush3.bf16.msra.mxu1 %v6930_v36 }
 0x459   :  { %v4944_v26 = vadd.f32 %v6107_v55, %v9641_v58 }
 0x45a   :  { %v6109_v43 = vpop.f32.mrf.mxu0 }
 0x45b   :  { %v5032_v0 = vmax.f32 %v4944_v26, 0.0  ;;  %v6110_v15 = vadd.f32 %v6109_v43, %v6108_v21 }
 0x45c   :  { %v6111_v11 = vpop.f32.mrf.mxu0 }
 0x45d   :  { %v5057_v27 = vpack.c.bf16 %v5032_v0, %v5031_v20  ;;  %v4949_v53 = vadd.f32 %v6110_v15, %v9641_v58 }
 0x45e   :  { %v6112_v14 = vpop.f32.mrf.mxu0 }
 0x45f   :  { %v6113_v52 = vadd.f32 %v6112_v14, %v6111_v11  ;;  %6238 = vmatprep.mubr.bf16.mxu1 %v5057_v27  ;;  %v5033_v41 = vmax.f32 %v4949_v53, 0.0 }
 0x460   :  { %v6114_v30 = vpop.f32.mrf.mxu0 }
 0x461   :  { %v4952_v38 = vadd.f32 %v6113_v52, %v9641_v58 }
 0x462   :  { %v6115_v18 = vpop.f32.mrf.mxu0 }
 0x463   :  { %v5034_v4 = vmax.f32 %v4952_v38, 0.0  ;;  %v6116_v1 = vadd.f32 %v6115_v18, %v6114_v30 }
 0x464   :  { %v6117_v12 = vpop.f32.mrf.mxu0 }
 0x465   :  { %v5058_v42 = vpack.c.bf16 %v5034_v4, %v5033_v41  ;;  %v4957_v17 = vadd.f32 %v6116_v1, %v9641_v58 }
 0x466   :  { %v6118_v54 = vpop.f32.mrf.mxu0 }
 0x467   :  { %v6119_v6 = vadd.f32 %v6118_v54, %v6117_v12  ;;  %6239 = vmatmul.mubr.bf16.gmra.mxu1 %v5058_v42  ;;  %v5035_v9 = vmax.f32 %v4957_v17, 0.0 }
 0x468   :  { %v6120_v59 = vpop.f32.mrf.mxu0 }
 0x469   :  { %v4960_v2 = vadd.f32 %v6119_v6, %v9641_v58 }
 0x46a   :  { %v6121_v24 = vpop.f32.mrf.mxu0 }
 0x46b   :  { %v5036_v40 = vmax.f32 %v4960_v2, 0.0  ;;  %v6122_v60 = vadd.f32 %v6121_v24, %v6120_v59 }
 0x46c   :  { %v6123_v39 = vpop.f32.mrf.mxu0 }
 0x46d   :  { %v5059_v19 = vpack.c.bf16 %v5036_v40, %v5035_v9  ;;  %v4965_v5 = vadd.f32 %v6122_v60, %v9641_v58 }
 0x46e   :  { %v6124_v56 = vpop.f32.mrf.mxu0 }
 0x46f   :  { %v6125_v62 = vadd.f32 %v6124_v56, %v6123_v39  ;;  %6242 = vmatprep.mubr.bf16.mxu1 %v5059_v19  ;;  %v5037_v44 = vmax.f32 %v4965_v5, 0.0 }
 0x470   :  { %v6126_v45 = vpop.f32.mrf.mxu0 }
 0x471   :  { %v4968_v35 = vadd.f32 %v6125_v62, %v9641_v58 }
 0x472   :  { %v6127_v49 = vpop.f32.mrf.mxu0 }
 0x473   :  { %v5038_v28 = vmax.f32 %v4968_v35, 0.0  ;;  %v6128_v10 = vadd.f32 %v6127_v49, %v6126_v45 }
 0x474   :  { %v6129_v34 = vpop.f32.mrf.mxu0 }
 0x475   :  { %v5060_v63 = vpack.c.bf16 %v5038_v28, %v5037_v44  ;;  %v4973_v8 = vadd.f32 %v6128_v10, %v9641_v58 }
 0x476   :  { %v6130_v48 = vpop.f32.mrf.mxu0 }
 0x477   :  { %v6131_v3 = vadd.f32 %v6130_v48, %v6129_v34  ;;  %6243 = vmatmul.mubr.bf16.gmra.mxu1 %v5060_v63  ;;  %v5039_v61 = vmax.f32 %v4973_v8, 0.0 }
 0x478   :  { %v6132_v57 = vpop.f32.mrf.mxu0 }
 0x479   :  { %v4976_v46 = vadd.f32 %v6131_v3, %v9641_v58 }
 0x47a   :  { %v6133_v13 = vpop.f32.mrf.mxu0 }
 0x47b   :  { %v5040_v37 = vmax.f32 %v4976_v46, 0.0  ;;  %v6134_v50 = vadd.f32 %v6133_v13, %v6132_v57  ;;  %v9702_v57 = vld [vmem:[%s9878_s8] ss:$0 sm:$0xff] }
 0x47c   :  { %v6135_v33 = vpop.f32.mrf.mxu0 }
 0x47d   :  { %v5061_v31 = vpack.c.bf16 %v5040_v37, %v5039_v61  ;;  %v4981_v51 = vadd.f32 %v6134_v50, %v9641_v58 }
 0x47e   :  { %v6136_v47 = vpop.f32.mrf.mxu0 }
 0x47f   :  { %v6137_v29 = vadd.f32 %v6136_v47, %v6135_v33  ;;  %6246 = vmatprep.mubr.bf16.mxu1 %v5061_v31  ;;  %v5041_v32 = vmax.f32 %v4981_v51, 0.0 }
 0x480   :  { %v6138_v16 = vpop.f32.mrf.mxu0 }
 0x481   :  { %v4984_v7 = vadd.f32 %v6137_v29, %v9641_v58 }
 0x482   :  { %v6139_v22 = vpop.f32.mrf.mxu0 }
 0x483   :  { %v5042_v55 = vmax.f32 %v4984_v7, 0.0  ;;  %v6140_v21 = vadd.f32 %v6139_v22, %v6138_v16 }
 0x484   :  { %v6141_v26 = vpop.f32.mrf.mxu0 }
 0x485   :  { %v5062_v43 = vpack.c.bf16 %v5042_v55, %v5041_v32  ;;  %v4989_v0 = vadd.f32 %v6140_v21, %v9641_v58 }
 0x486   :  { %v6142_v20 = vpop.f32.mrf.mxu0 }
 0x487   :  { %v6143_v15 = vadd.f32 %v6142_v20, %v6141_v26  ;;  %6247 = vmatmul.mubr.bf16.gmra.mxu1 %v5062_v43  ;;  %v5043_v53 = vmax.f32 %v4989_v0, 0.0 }
 0x488   :  { %v6144_v11 = vpop.f32.mrf.mxu0 }
 0x489   :  { %v4992_v27 = vadd.f32 %v6143_v15, %v9641_v58 }
 0x48a   :  { %v6145_v14 = vpop.f32.mrf.mxu0 }
 0x48b   :  { %v5044_v52 = vmax.f32 %v4992_v27, 0.0  ;;  %v6146_v30 = vadd.f32 %v6145_v14, %v6144_v11 }
 0x48c   :  { %v6147_v38 = vpop.f32.mrf.mxu0 }
 0x48d   :  { %v5063_v18 = vpack.c.bf16 %v5044_v52, %v5043_v53  ;;  %v4997_v4 = vadd.f32 %v6146_v30, %v9641_v58 }
 0x48e   :  { %v6148_v41 = vpop.f32.mrf.mxu0 }
 0x48f   :  { %v6149_v1 = vadd.f32 %v6148_v41, %v6147_v38  ;;  %6250 = vmatprep.mubr.bf16.mxu1 %v5063_v18  ;;  %v5045_v17 = vmax.f32 %v4997_v4, 0.0 }
 0x490   :  { %v6150_v12 = vpop.f32.mrf.mxu0 }
 0x491   :  { %v5000_v42 = vadd.f32 %v6149_v1, %v9641_v58 }
 0x492   :  { %v6151_v54 = vpop.f32.mrf.mxu0 }
 0x493   :  { %v5046_v6 = vmax.f32 %v5000_v42, 0.0  ;;  %v6152_v59 = vadd.f32 %v6151_v54, %v6150_v12 }
 0x494   :  { %v6153_v2 = vpop.f32.mrf.mxu0 }
 0x495   :  { %v5064_v24 = vpack.c.bf16 %v5046_v6, %v5045_v17  ;;  %v5005_v40 = vadd.f32 %v6152_v59, %v9641_v58 }
 0x496   :  { %v6154_v9 = vpop.f32.mrf.mxu0 }
 0x497   :  { %v6155_v60 = vadd.f32 %v6154_v9, %v6153_v2  ;;  %6251 = vmatmul.mubr.bf16.gmra.mxu1 %v5064_v24  ;;  %v5047_v5 = vmax.f32 %v5005_v40, 0.0 }
 0x498   :  { %v6156_v39 = vpop.f32.mrf.mxu0 }
 0x499   :  { %v5008_v19 = vadd.f32 %v6155_v60, %v9641_v58 }
 0x49a   :  { %v6157_v56 = vpop.f32.mrf.mxu0 }
 0x49b   :  { %v5048_v62 = vmax.f32 %v5008_v19, 0.0  ;;  %v6158_v45 = vadd.f32 %v6157_v56, %v6156_v39 }
 0x49c   :  { %v6159_v35 = vpop.f32.mrf.mxu0 }
 0x49d   :  { %v5065_v49 = vpack.c.bf16 %v5048_v62, %v5047_v5  ;;  %v5013_v28 = vadd.f32 %v6158_v45, %v9641_v58 }
 0x49e   :  { %v6160_v44 = vpop.f32.mrf.mxu0 }
 0x49f   :  { %v6161_v10 = vadd.f32 %v6160_v44, %v6159_v35  ;;  %6254 = vmatprep.mubr.bf16.mxu1 %v5065_v49  ;;  %v5049_v63 = vmax.f32 %v5013_v28, 0.0 }
 0x4a1   :  { %v5016_v34 = vadd.f32 %v6161_v10, %v9641_v58 }
 0x4a3   :  { %v5050_v48 = vmax.f32 %v5016_v34, 0.0 }
 0x4a5   :  { %v5066_v8 = vpack.c.bf16 %v5050_v48, %v5049_v63 }
 0x4a7   :  { %6255 = vmatmul.mubr.bf16.gmra.mxu1 %v5066_v8 }
 0x4f7   :  { %v6228_v3 = vpop.f32.mrf.mxu1 }
 0x4f8   :  { %v5181_v37 = vadd.f32 %v6228_v3, %v9702_v57 }
 0x4f9   :  { %v5172_v23 = vpop.f32.mrf.mxu1 }
 0x4fa   :  { %v5173_v13 = vadd.f32 %v9702_v57, %v5172_v23  ;;  %v5301_v47 = vmax.f32 %v5181_v37, 0.0 }
 0x4fb   :  { %v6229_v46 = vpop.f32.mrf.mxu1 }
 0x4fc   :  { %v5184_v61 = vadd.f32 %v6229_v46, %v9702_v57  ;;  %v5299_v33 = vmax.f32 %v5173_v13, 0.0 }
 0x4fd   :  { %v5175_v50 = vpop.f32.mrf.mxu1 }
 0x4fe   :  { %v5176_v58 = vadd.f32 %v9702_v57, %v5175_v50  ;;  %v5302_v25 = vmax.f32 %v5184_v61, 0.0 }
 0x500   :  { %v5300_v31 = vmax.f32 %v5176_v58, 0.0  ;;  %v5332_v29 = vpack.c.bf16 %v5302_v25, %v5301_v47 }
 0x502   :  { %v5331_v51 = vpack.c.bf16 %v5300_v31, %v5299_v33 }
 0x504   :  { %6274 = vmatprep.mubr.bf16.mxu1 %v5331_v51 }
 0x505   :  { %6275 = vmatmul.mubr.bf16.vlgmr.msra.gmra.mxu1 %v5332_v29 }
 0x507   :  { %v6232_v36 = vpop.f32.mrf.mxu1 }
 0x508   :  { %v5197_v55 = vadd.f32 %v6232_v36, %v9702_v57 }
 0x509   :  { %v5188_v16 = vpop.f32.mrf.mxu1 }
 0x50a   :  { %v5189_v22 = vadd.f32 %v9702_v57, %v5188_v16  ;;  %v5305_v15 = vmax.f32 %v5197_v55, 0.0 }
 0x50b   :  { %v6233_v7 = vpop.f32.mrf.mxu1 }
 0x50c   :  { %v5200_v32 = vadd.f32 %v6233_v7, %v9702_v57  ;;  %v5303_v20 = vmax.f32 %v5189_v22, 0.0 }
 0x50d   :  { %v5191_v21 = vpop.f32.mrf.mxu1 }
 0x50e   :  { %v5192_v26 = vadd.f32 %v9702_v57, %v5191_v21  ;;  %v5306_v43 = vmax.f32 %v5200_v32, 0.0 }
 0x510   :  { %v5304_v0 = vmax.f32 %v5192_v26, 0.0  ;;  %v5334_v27 = vpack.c.bf16 %v5306_v43, %v5305_v15 }
 0x512   :  { %v5333_v11 = vpack.c.bf16 %v5304_v0, %v5303_v20 }
 0x514   :  { %6278 = vmatprep.mubr.bf16.mxu1 %v5333_v11 }
 0x515   :  { %6279 = vmatmul.mubr.bf16.gmra.mxu1 %v5334_v27 }
 0x517   :  { %v6236_v14 = vpop.f32.mrf.mxu1 }
 0x518   :  { %v5213_v18 = vadd.f32 %v6236_v14, %v9702_v57 }
 0x519   :  { %v5204_v53 = vpop.f32.mrf.mxu1 }
 0x51a   :  { %v5205_v30 = vadd.f32 %v9702_v57, %v5204_v53  ;;  %v5309_v54 = vmax.f32 %v5213_v18, 0.0 }
 0x51b   :  { %v6237_v52 = vpop.f32.mrf.mxu1 }
 0x51c   :  { %v5216_v38 = vadd.f32 %v6237_v52, %v9702_v57  ;;  %v5307_v12 = vmax.f32 %v5205_v30, 0.0 }
 0x51d   :  { %v5207_v41 = vpop.f32.mrf.mxu1 }
 0x51e   :  { %v5208_v4 = vadd.f32 %v9702_v57, %v5207_v41  ;;  %v5310_v1 = vmax.f32 %v5216_v38, 0.0 }
 0x520   :  { %v5308_v42 = vmax.f32 %v5208_v4, 0.0  ;;  %v5336_v6 = vpack.c.bf16 %v5310_v1, %v5309_v54 }
 0x522   :  { %v5335_v17 = vpack.c.bf16 %v5308_v42, %v5307_v12 }
 0x524   :  { %6282 = vmatprep.mubr.bf16.mxu1 %v5335_v17 }
 0x525   :  { %6283 = vmatmul.mubr.bf16.gmra.mxu1 %v5336_v6 }
 0x527   :  { %v6240_v59 = vpop.f32.mrf.mxu1 }
 0x528   :  { %v5229_v60 = vadd.f32 %v6240_v59, %v9702_v57 }
 0x529   :  { %v5220_v2 = vpop.f32.mrf.mxu1 }
 0x52a   :  { %v5221_v9 = vadd.f32 %v9702_v57, %v5220_v2  ;;  %v5313_v45 = vmax.f32 %v5229_v60, 0.0 }
 0x52b   :  { %v6241_v24 = vpop.f32.mrf.mxu1 }
 0x52c   :  { %v5232_v40 = vadd.f32 %v6241_v24, %v9702_v57  ;;  %v5311_v5 = vmax.f32 %v5221_v9, 0.0 }
 0x52d   :  { %v5223_v39 = vpop.f32.mrf.mxu1 }
 0x52e   :  { %v5224_v19 = vadd.f32 %v9702_v57, %v5223_v39  ;;  %v5314_v56 = vmax.f32 %v5232_v40, 0.0 }
 0x530   :  { %v5312_v62 = vmax.f32 %v5224_v19, 0.0  ;;  %v5338_v49 = vpack.c.bf16 %v5314_v56, %v5313_v45  ;;  %v9739_v19 = vld [vmem:[%s9879_s10] ss:$0 sm:$0xff] }
 0x532   :  { %v5337_v35 = vpack.c.bf16 %v5312_v62, %v5311_v5 }
 0x534   :  { %6286 = vmatprep.mubr.bf16.mxu1 %v5337_v35 }
 0x535   :  { %6287 = vmatmul.mubr.bf16.gmra.mxu1 %v5338_v49 }
 0x537   :  { %v6244_v44 = vpop.f32.mrf.mxu1 }
 0x538   :  { %v5245_v48 = vadd.f32 %v6244_v44, %v9702_v57 }
 0x539   :  { %v5236_v28 = vpop.f32.mrf.mxu1 }
 0x53a   :  { %v5237_v34 = vadd.f32 %v9702_v57, %v5236_v28  ;;  %v5317_v61 = vmax.f32 %v5245_v48, 0.0 }
 0x53b   :  { %v6245_v10 = vpop.f32.mrf.mxu1 }
 0x53c   :  { %v5248_v63 = vadd.f32 %v6245_v10, %v9702_v57  ;;  %v5315_v46 = vmax.f32 %v5237_v34, 0.0 }
 0x53d   :  { %v5239_v8 = vpop.f32.mrf.mxu1 }
 0x53e   :  { %v5240_v3 = vadd.f32 %v9702_v57, %v5239_v8  ;;  %v5318_v23 = vmax.f32 %v5248_v63, 0.0 }
 0x540   :  { %v5316_v13 = vmax.f32 %v5240_v3, 0.0  ;;  %v5340_v50 = vpack.c.bf16 %v5318_v23, %v5317_v61 }
 0x542   :  { %v5339_v37 = vpack.c.bf16 %v5316_v13, %v5315_v46 }
 0x544   :  { %6290 = vmatprep.mubr.bf16.mxu1 %v5339_v37 }
 0x545   :  { %6291 = vmatmul.mubr.bf16.gmra.mxu1 %v5340_v50 }
 0x547   :  { %v6248_v58 = vpop.f32.mrf.mxu1 }
 0x548   :  { %v5261_v51 = vadd.f32 %v6248_v58, %v9702_v57 }
 0x549   :  { %v5252_v25 = vpop.f32.mrf.mxu1 }
 0x54a   :  { %v5253_v31 = vadd.f32 %v9702_v57, %v5252_v25  ;;  %v5321_v32 = vmax.f32 %v5261_v51, 0.0 }
 0x54b   :  { %v6249_v33 = vpop.f32.mrf.mxu1 }
 0x54c   :  { %v5264_v47 = vadd.f32 %v6249_v33, %v9702_v57  ;;  %v5319_v7 = vmax.f32 %v5253_v31, 0.0 }
 0x54d   :  { %v5255_v29 = vpop.f32.mrf.mxu1 }
 0x54e   :  { %v5256_v36 = vadd.f32 %v9702_v57, %v5255_v29  ;;  %v5322_v16 = vmax.f32 %v5264_v47, 0.0 }
 0x550   :  { %v5320_v22 = vmax.f32 %v5256_v36, 0.0  ;;  %v5342_v21 = vpack.c.bf16 %v5322_v16, %v5321_v32 }
 0x552   :  { %v5341_v55 = vpack.c.bf16 %v5320_v22, %v5319_v7 }
 0x554   :  { %6294 = vmatprep.mubr.bf16.mxu1 %v5341_v55 }
 0x555   :  { %6295 = vmatmul.mubr.bf16.gmra.mxu1 %v5342_v21 }
 0x557   :  { %v6252_v26 = vpop.f32.mrf.mxu1 }
 0x558   :  { %v5277_v11 = vadd.f32 %v6252_v26, %v9702_v57 }
 0x559   :  { %v5268_v43 = vpop.f32.mrf.mxu1 }
 0x55a   :  { %v5269_v0 = vadd.f32 %v9702_v57, %v5268_v43  ;;  %v5325_v38 = vmax.f32 %v5277_v11, 0.0 }
 0x55b   :  { %v6253_v20 = vpop.f32.mrf.mxu1 }
 0x55c   :  { %v5280_v15 = vadd.f32 %v6253_v20, %v9702_v57  ;;  %v5323_v52 = vmax.f32 %v5269_v0, 0.0 }
 0x55d   :  { %v5271_v27 = vpop.f32.mrf.mxu1 }
 0x55e   :  { %v5272_v14 = vadd.f32 %v9702_v57, %v5271_v27  ;;  %v5326_v53 = vmax.f32 %v5280_v15, 0.0 }
 0x560   :  { %v5324_v30 = vmax.f32 %v5272_v14, 0.0  ;;  %v5344_v41 = vpack.c.bf16 %v5326_v53, %v5325_v38 }
 0x562   :  { %v5343_v18 = vpack.c.bf16 %v5324_v30, %v5323_v52 }
 0x564   :  { %6298 = vmatprep.mubr.bf16.mxu1 %v5343_v18 }
 0x565   :  { %6299 = vmatmul.mubr.bf16.gmra.mxu1 %v5344_v41 }
 0x567   :  { %v6256_v4 = vpop.f32.mrf.mxu1 }
 0x568   :  { %v5293_v17 = vadd.f32 %v6256_v4, %v9702_v57 }
 0x569   :  { %v5284_v1 = vpop.f32.mrf.mxu1 }
 0x56a   :  { %v5285_v42 = vadd.f32 %v9702_v57, %v5284_v1  ;;  %v5329_v40 = vmax.f32 %v5293_v17, 0.0 }
 0x56b   :  { %v6257_v12 = vpop.f32.mrf.mxu1 }
 0x56c   :  { %v5296_v54 = vadd.f32 %v6257_v12, %v9702_v57  ;;  %v5327_v24 = vmax.f32 %v5285_v42, 0.0 }
 0x56d   :  { %v5287_v6 = vpop.f32.mrf.mxu1 }
 0x56e   :  { %v5288_v59 = vadd.f32 %v9702_v57, %v5287_v6  ;;  %v5330_v2 = vmax.f32 %v5296_v54, 0.0 }
 0x570   :  { %v5328_v9 = vmax.f32 %v5288_v59, 0.0  ;;  %v5346_v39 = vpack.c.bf16 %v5330_v2, %v5329_v40 }
 0x572   :  { %v5345_v60 = vpack.c.bf16 %v5328_v9, %v5327_v24 }
 0x574   :  { %6302 = vmatprep.mubr.bf16.mxu1 %v5345_v60 }
 0x575   :  { %6303 = vmatmul.mubr.bf16.gmra.mxu1 %v5346_v39 }
 0x5c5   :  { %v6276_v56 = vpop.f32.mrf.mxu1 }
 0x5c6   :  { %v5461_v5 = vadd.f32 %v6276_v56, %v9739_v19 }
 0x5c7   :  { %v5452_v62 = vpop.f32.mrf.mxu1 }
 0x5c8   :  { %5581 = vst [vmem:[%s9880_s11 + $0x10] sm:$0xff] %v5461_v5  ;;  %v5453_v57 = vadd.f32 %v9739_v19, %v5452_v62 }
 0x5c9   :  { %v6277_v45 = vpop.f32.mrf.mxu1 }
 0x5ca   :  { %5579 = vst [vmem:[%s9880_s11] sm:$0xff] %v5453_v57  ;;  %v5464_v35 = vadd.f32 %v6277_v45, %v9739_v19 }
 0x5cb   :  { %v5455_v49 = vpop.f32.mrf.mxu1 }
 0x5cc   :  { %5582 = vst [vmem:[%s9880_s11 + $0x18] sm:$0xff] %v5464_v35  ;;  %v5456_v44 = vadd.f32 %v9739_v19, %v5455_v49 }
 0x5ce   :  { %5580 = vst [vmem:[%s9880_s11 + $0x8] sm:$0xff] %v5456_v44 }
 0x5d5   :  { %v6280_v28 = vpop.f32.mrf.mxu1 }
 0x5d6   :  { %v5477_v10 = vadd.f32 %v6280_v28, %v9739_v19 }
 0x5d7   :  { %v5468_v34 = vpop.f32.mrf.mxu1 }
 0x5d8   :  { %5585 = vst [vmem:[%s9880_s11 + $0x30] sm:$0xff] %v5477_v10  ;;  %v5469_v63 = vadd.f32 %v9739_v19, %v5468_v34 }
 0x5d9   :  { %v6281_v48 = vpop.f32.mrf.mxu1 }
 0x5da   :  { %5583 = vst [vmem:[%s9880_s11 + $0x20] sm:$0xff] %v5469_v63  ;;  %v5480_v8 = vadd.f32 %v6281_v48, %v9739_v19 }
 0x5db   :  { %v5471_v3 = vpop.f32.mrf.mxu1 }
 0x5dc   :  { %5586 = vst [vmem:[%s9880_s11 + $0x38] sm:$0xff] %v5480_v8  ;;  %v5472_v23 = vadd.f32 %v9739_v19, %v5471_v3 }
 0x5de   :  { %5584 = vst [vmem:[%s9880_s11 + $0x28] sm:$0xff] %v5472_v23 }
 0x5e5   :  { %v6284_v46 = vpop.f32.mrf.mxu1 }
 0x5e6   :  { %v5493_v13 = vadd.f32 %v6284_v46, %v9739_v19 }
 0x5e7   :  { %v5484_v61 = vpop.f32.mrf.mxu1 }
 0x5e8   :  { %5589 = vst [vmem:[%s9880_s11 + $0x50] sm:$0xff] %v5493_v13  ;;  %v5485_v37 = vadd.f32 %v9739_v19, %v5484_v61 }
 0x5e9   :  { %v6285_v50 = vpop.f32.mrf.mxu1 }
 0x5ea   :  { %5587 = vst [vmem:[%s9880_s11 + $0x40] sm:$0xff] %v5485_v37  ;;  %v5496_v58 = vadd.f32 %v6285_v50, %v9739_v19 }
 0x5eb   :  { %v5487_v25 = vpop.f32.mrf.mxu1 }
 0x5ec   :  { %5590 = vst [vmem:[%s9880_s11 + $0x58] sm:$0xff] %v5496_v58  ;;  %v5488_v33 = vadd.f32 %v9739_v19, %v5487_v25 }
 0x5ee   :  { %5588 = vst [vmem:[%s9880_s11 + $0x48] sm:$0xff] %v5488_v33 }
 0x5f5   :  { %v6288_v31 = vpop.f32.mrf.mxu1 }
 0x5f6   :  { %v5509_v47 = vadd.f32 %v6288_v31, %v9739_v19 }
 0x5f7   :  { %v5500_v51 = vpop.f32.mrf.mxu1 }
 0x5f8   :  { %5593 = vst [vmem:[%s9880_s11 + $0x70] sm:$0xff] %v5509_v47  ;;  %v5501_v29 = vadd.f32 %v9739_v19, %v5500_v51 }
 0x5f9   :  { %v6289_v36 = vpop.f32.mrf.mxu1 }
 0x5fa   :  { %5591 = vst [vmem:[%s9880_s11 + $0x60] sm:$0xff] %v5501_v29  ;;  %v5512_v16 = vadd.f32 %v6289_v36, %v9739_v19 }
 0x5fb   :  { %v5503_v7 = vpop.f32.mrf.mxu1 }
 0x5fc   :  { %5594 = vst [vmem:[%s9880_s11 + $0x78] sm:$0xff] %v5512_v16  ;;  %v5504_v22 = vadd.f32 %v9739_v19, %v5503_v7 }
 0x5fe   :  { %5592 = vst [vmem:[%s9880_s11 + $0x68] sm:$0xff] %v5504_v22 }
 0x605   :  { %v6292_v32 = vpop.f32.mrf.mxu1 }
 0x606   :  { %v5525_v55 = vadd.f32 %v6292_v32, %v9739_v19 }
 0x607   :  { %v5516_v21 = vpop.f32.mrf.mxu1 }
 0x608   :  { %5597 = vst [vmem:[%s9880_s11 + $0x90] sm:$0xff] %v5525_v55  ;;  %v5517_v26 = vadd.f32 %v9739_v19, %v5516_v21 }
 0x609   :  { %v6293_v43 = vpop.f32.mrf.mxu1 }
 0x60a   :  { %5595 = vst [vmem:[%s9880_s11 + $0x80] sm:$0xff] %v5517_v26  ;;  %v5528_v20 = vadd.f32 %v6293_v43, %v9739_v19 }
 0x60b   :  { %v5519_v0 = vpop.f32.mrf.mxu1 }
 0x60c   :  { %5598 = vst [vmem:[%s9880_s11 + $0x98] sm:$0xff] %v5528_v20  ;;  %v5520_v15 = vadd.f32 %v9739_v19, %v5519_v0 }
 0x60e   :  { %5596 = vst [vmem:[%s9880_s11 + $0x88] sm:$0xff] %v5520_v15 }
 0x615   :  { %v6296_v11 = vpop.f32.mrf.mxu1 }
 0x616   :  { %v5541_v27 = vadd.f32 %v6296_v11, %v9739_v19 }
 0x617   :  { %v5532_v14 = vpop.f32.mrf.mxu1 }
 0x618   :  { %5601 = vst [vmem:[%s9880_s11 + $0xb0] sm:$0xff] %v5541_v27  ;;  %v5533_v53 = vadd.f32 %v9739_v19, %v5532_v14 }
 0x619   :  { %v6297_v52 = vpop.f32.mrf.mxu1 }
 0x61a   :  { %5599 = vst [vmem:[%s9880_s11 + $0xa0] sm:$0xff] %v5533_v53  ;;  %v5544_v30 = vadd.f32 %v6297_v52, %v9739_v19 }
 0x61b   :  { %v5535_v38 = vpop.f32.mrf.mxu1 }
 0x61c   :  { %5602 = vst [vmem:[%s9880_s11 + $0xb8] sm:$0xff] %v5544_v30  ;;  %v5536_v18 = vadd.f32 %v9739_v19, %v5535_v38 }
 0x61e   :  { %5600 = vst [vmem:[%s9880_s11 + $0xa8] sm:$0xff] %v5536_v18 }
 0x625   :  { %v6300_v41 = vpop.f32.mrf.mxu1 }
 0x626   :  { %v5557_v4 = vadd.f32 %v6300_v41, %v9739_v19 }
 0x627   :  { %v5548_v1 = vpop.f32.mrf.mxu1 }
 0x628   :  { %5605 = vst [vmem:[%s9880_s11 + $0xd0] sm:$0xff] %v5557_v4  ;;  %v5549_v12 = vadd.f32 %v9739_v19, %v5548_v1 }
 0x629   :  { %v6301_v42 = vpop.f32.mrf.mxu1 }
 0x62a   :  { %5603 = vst [vmem:[%s9880_s11 + $0xc0] sm:$0xff] %v5549_v12  ;;  %v5560_v54 = vadd.f32 %v6301_v42, %v9739_v19 }
 0x62b   :  { %v5551_v17 = vpop.f32.mrf.mxu1 }
 0x62c   :  { %5606 = vst [vmem:[%s9880_s11 + $0xd8] sm:$0xff] %v5560_v54  ;;  %v5552_v6 = vadd.f32 %v9739_v19, %v5551_v17 }
 0x62e   :  { %5604 = vst [vmem:[%s9880_s11 + $0xc8] sm:$0xff] %v5552_v6 }
 0x635   :  { %v6304_v59 = vpop.f32.mrf.mxu1 }
 0x636   :  { %v5573_v2 = vadd.f32 %v6304_v59, %v9739_v19 }
 0x637   :  { %v5564_v24 = vpop.f32.mrf.mxu1 }
 0x638   :  { %5609 = vst [vmem:[%s9880_s11 + $0xf0] sm:$0xff] %v5573_v2  ;;  %v5565_v9 = vadd.f32 %v9739_v19, %v5564_v24 }
 0x639   :  { %v6305_v40 = vpop.f32.mrf.mxu1 }
 0x63a   :  { %5607 = vst [vmem:[%s9880_s11 + $0xe0] sm:$0xff] %v5565_v9  ;;  %v5576_v60 = vadd.f32 %v6305_v40, %v9739_v19 }
 0x63b   :  { %v5567_v39 = vpop.f32.mrf.mxu1 }
 0x63c   :  { %5610 = vst [vmem:[%s9880_s11 + $0xf8] sm:$0xff] %v5576_v60  ;;  %v5568_v56 = vadd.f32 %v9739_v19, %v5567_v39 }
 0x63e   :  { %5608 = vst [vmem:[%s9880_s11 + $0xe8] sm:$0xff] %v5568_v56 }

</bundles_post_ra>
